<compile_context>
chip_gen: v6e
topology: v6e:2x2x1
jax: 0.10.0
libtpu: 0.0.40
codegen_flags: <defaults>
</compile_context>

<pallas_src>
from functools import partial

import jax
import jax.numpy as jnp
from jax.experimental import pallas as pl
from jax.experimental.pallas import tpu as pltpu

BN_EPS = 1e-5
LANE = 128
SUBLANE = 8


def _round_up(x, m):
    return ((x + m - 1) // m) * m


# ----------------------------------------------------------------------------
# Pallas kernels
# ----------------------------------------------------------------------------
def _conv_bn_kernel(*refs, m_valid, relu, has_res):
    """Fused (patches @ weight) + training-mode BatchNorm (exact centered
    variance) + optional residual add + optional ReLU.

    Grid = (Np // tn,): each program owns a full-M x tn column slab, so the
    per-channel batch statistics are complete inside the kernel."""
    if has_res:
        x_ref, w_ref, g_ref, b_ref, r_ref, o_ref = refs
    else:
        x_ref, w_ref, g_ref, b_ref, o_ref = refs
        r_ref = None

    # Single-K-step matmul (K <= 1152 in this shard): bf16 in, f32 accumulate.
    y = jnp.dot(x_ref[...], w_ref[...], preferred_element_type=jnp.float32)

    mp = y.shape[0]
    inv_m = 1.0 / float(m_valid)
    if m_valid == mp:                       # (always true at these shapes)
        mean = jnp.sum(y, axis=0, keepdims=True) * inv_m
        cent = y - mean
        var = jnp.sum(cent * cent, axis=0, keepdims=True) * inv_m
    else:                                   # robust path for padded rows
        rows = jax.lax.broadcasted_iota(jnp.int32, y.shape, 0)
        valid = rows < m_valid
        mean = jnp.sum(jnp.where(valid, y, 0.0), axis=0, keepdims=True) * inv_m
        cent = jnp.where(valid, y - mean, 0.0)
        var = jnp.sum(cent * cent, axis=0, keepdims=True) * inv_m

    inv = jax.lax.rsqrt(var + BN_EPS)
    out = (y - mean) * (inv * g_ref[...]) + b_ref[...]
    if has_res:
        out = out + r_ref[...].astype(jnp.float32)
    if relu:
        out = jnp.maximum(out, 0.0)
    o_ref[...] = out.astype(o_ref.dtype)


def _maxpool_kernel(*refs):
    """max over 9 taps; refs = 9 inputs + 1 output, each (Mp, Cp) bf16."""
    o_ref = refs[-1]
    m = refs[0][...]
    for r in refs[1:-1]:
        m = jnp.maximum(m, r[...])
    o_ref[...] = m


# ----------------------------------------------------------------------------
# Pallas-call wrappers
# ----------------------------------------------------------------------------
def conv_bn_act(x_mat, m_valid, cp, *, relu, residual=None):
    """x_mat (Mp, Kp) bf16 -> (Mp, Np) bf16 = relu?(BN(x @ w) [+ residual])."""
    mp, kp = x_mat.shape
    kpw, npad = cp["w"].shape
    assert kp == kpw, (kp, kpw)
    tn = LANE                      # 128-wide N tiles (v5e MXU; >=2 programs
    gn = npad // tn                # on the 256/512-wide convs for v7x)

    inputs = [x_mat, cp["w"], cp["g"], cp["b"]]
    in_specs = [
        pl.BlockSpec((mp, kp), lambda j: (0, 0)),
        pl.BlockSpec((kpw, tn), lambda j: (0, j)),
        pl.BlockSpec((1, tn), lambda j: (0, j)),
        pl.BlockSpec((1, tn), lambda j: (0, j)),
    ]
    if residual is not None:
        assert residual.shape == (mp, npad), (residual.shape, (mp, npad))
        inputs.append(residual)
        in_specs.append(pl.BlockSpec((mp, tn), lambda j: (0, j)))

    return pl.pallas_call(
        partial(_conv_bn_kernel, m_valid=m_valid, relu=relu,
                has_res=residual is not None),
        out_shape=jax.ShapeDtypeStruct((mp, npad), jnp.bfloat16),
        grid_spec=pltpu.PrefetchScalarGridSpec(
            num_scalar_prefetch=0,
            grid=(gn,),
            in_specs=in_specs,
            out_specs=pl.BlockSpec((mp, tn), lambda j: (0, j))),
        compiler_params=pltpu.CompilerParams(
            dimension_semantics=("parallel",)),
    )(*inputs)


def maxpool3x3_s2_p1(act):
    """3x3 stride-2 pad-1 max pool on a padded (Mp, Cp) bf16 activation."""
    n, h, w, c = act["n"], act["h"], act["w"], act["c"]
    cpad = act["mat"].shape[1]
    m = n * h * w
    x4 = act["mat"][:m].reshape(n, h, w, cpad)
    # Post-ReLU values are >= 0, so zero padding is equivalent to -inf padding
    # (every pooling window contains at least one real element).
    x4 = jnp.pad(x4, ((0, 0), (1, 1), (1, 1), (0, 0)))
    ho = (h + 2 - 3) // 2 + 1
    wo = (w + 2 - 3) // 2 + 1
    mo = n * ho * wo
    mop = _round_up(mo, SUBLANE)

    taps = []
    for i in range(3):
        for j in range(3):
            t = x4[:, i:i + 2 * ho:2, j:j + 2 * wo:2, :].reshape(mo, cpad)
            if mop > mo:
                t = jnp.pad(t, ((0, mop - mo), (0, 0)))
            taps.append(t)

    spec = pl.BlockSpec((mop, cpad), lambda i: (0, 0))
    out = pl.pallas_call(
        _maxpool_kernel,
        out_shape=jax.ShapeDtypeStruct((mop, cpad), jnp.bfloat16),
        grid_spec=pltpu.PrefetchScalarGridSpec(
            num_scalar_prefetch=0,
            grid=(1,),
            in_specs=[spec] * 9,
            out_specs=spec),
        compiler_params=pltpu.CompilerParams(
            dimension_semantics=("arbitrary",)),
    )(*taps)
    return _to_act(out, n, ho, wo, c)


# ----------------------------------------------------------------------------
# Layout plumbing (tiny XLA glue; all compute lives in the kernels above)
# ----------------------------------------------------------------------------
def _to_act(mat, n, h, w, c):
    return {"mat": mat, "n": n, "h": h, "w": w, "c": c}


def _im2col(x4, k, stride, pad, kp):
    """x4 (N,H,W,C) real channels -> (Mp, kp) bf16 patches, (n,ho,wo), M."""
    n, h, w, c = x4.shape
    if pad:
        x4 = jnp.pad(x4, ((0, 0), (pad, pad), (pad, pad), (0, 0)))
    ho = (h + 2 * pad - k) // stride + 1
    wo = (w + 2 * pad - k) // stride + 1
    cols = []
    for i in range(k):
        for j in range(k):
            cols.append(x4[:, i:i + stride * ho:stride,
                           j:j + stride * wo:stride, :])
    cols = jnp.concatenate(cols, axis=-1).reshape(n * ho * wo, k * k * c)
    m = n * ho * wo
    mp = _round_up(m, SUBLANE)
    cols = jnp.pad(cols, ((0, mp - m), (0, kp - k * k * c)))
    return cols.astype(jnp.bfloat16), (n, ho, wo), m


def conv1x1_bn(act, cp, *, relu, residual=None, stride=1):
    n, h, w = act["n"], act["h"], act["w"]
    if stride == 1:
        x_mat = act["mat"]                       # already padded bf16, no glue
        ho, wo, m = h, w, n * h * w
    else:
        cpad = act["mat"].shape[1]
        m_in = n * h * w
        x4 = act["mat"][:m_in].reshape(n, h, w, cpad)[:, ::stride, ::stride, :]
        ho, wo = x4.shape[1], x4.shape[2]
        m = n * ho * wo
        x_mat = x4.reshape(m, cpad)
        mp = _round_up(m, SUBLANE)
        if mp > m:
            x_mat = jnp.pad(x_mat, ((0, mp - m), (0, 0)))
    out = conv_bn_act(x_mat, m, cp, relu=relu, residual=residual)
    return _to_act(out, n, ho, wo, cp["cout"])


def conv3x3_bn(act, cp, *, stride, relu):
    n, h, w, c = act["n"], act["h"], act["w"], act["c"]
    m_in = n * h * w
    x4 = act["mat"][:m_in, :c].reshape(n, h, w, c)
    cols, (_, ho, wo), m = _im2col(x4, 3, stride, 1, cp["w"].shape[0])
    out = conv_bn_act(cols, m, cp, relu=relu)
    return _to_act(out, n, ho, wo, cp["cout"])


def bottleneck_fwd(act, p):
    out = conv1x1_bn(act, p["c1"], relu=True)
    out = conv3x3_bn(out, p["c2"], stride=p["stride"], relu=True)
    if p["down"] is not None:
        identity = conv1x1_bn(act, p["down"], relu=False,
                              stride=p["stride"])["mat"]
    else:
        identity = act["mat"]
    # residual add + final ReLU fused into c3's kernel
    return conv1x1_bn(out, p["c3"], relu=True, residual=identity)


# ----------------------------------------------------------------------------
# Deterministic parameters (kaiming-normal fan_out, BN gamma=1 / beta=0),
# pre-padded / pre-cast once (bf16 weights, lane-dense layouts).
# ----------------------------------------------------------------------------
class KeyGen:
    def __init__(self, key):
        self._key = key

    def __call__(self):
        self._key, sub = jax.random.split(self._key)
        return sub


def conv_params(kg, cin, cout, k):
    kk = k * k * cin
    kp = _round_up(kk, LANE)
    npad = _round_up(cout, LANE)
    fan_out = cout * k * k
    std = (2.0 / fan_out) ** 0.5
    # weight stored as (k*k*cin, cout) matching (tap-major, channel) patches
    w = jax.random.normal(kg(), (kk, cout), jnp.float32) * std
    w_p = jnp.zeros((kp, npad), jnp.bfloat16).at[:kk, :cout].set(
        w.astype(jnp.bfloat16))
    g = jnp.zeros((1, npad), jnp.float32).at[0, :cout].set(1.0)
    b = jnp.zeros((1, npad), jnp.float32)
    return {"w": w_p, "g": g, "b": b, "k": k, "cin": cin, "cout": cout}


def bottleneck_params(kg, inplanes, planes, stride, downsample):
    width = planes  # groups=1, base_width=64
    return {
        "c1": conv_params(kg, inplanes, width, 1),
        "c2": conv_params(kg, width, width, 3),
        "c3": conv_params(kg, width, planes * 4, 1),
        "down": conv_params(kg, inplanes, planes * 4, 1) if downsample else None,
        "stride": stride,
    }


def make_params(seed=0):
    kg = KeyGen(jax.random.PRNGKey(seed))
    params = {"stem": conv_params(kg, 3, 64, 7)}
    # layer1: _make_layer(64, 3)  — inplanes 64 -> 256
    layer1 = [bottleneck_params(kg, 64, 64, 1, downsample=True)]
    layer1 += [bottleneck_params(kg, 256, 64, 1, downsample=False)
               for _ in range(2)]
    # layer2: _make_layer(128, 4, stride=2) — inplanes 256 -> 512
    layer2 = [bottleneck_params(kg, 256, 128, 2, downsample=True)]
    layer2 += [bottleneck_params(kg, 512, 128, 1, downsample=False)
               for _ in range(3)]
    params["layer1"] = layer1
    params["layer2"] = layer2
    return params


def resnet_shard1_forward(x_nchw, params):
    x = jnp.transpose(x_nchw, (0, 2, 3, 1)).astype(jnp.float32)   # -> NHWC
    cols, (n, ho, wo), m = _im2col(x, 7, 2, 3, params["stem"]["w"].shape[0])
    act = _to_act(conv_bn_act(cols, m, params["stem"], relu=True),
                  n, ho, wo, 64)
    act = maxpool3x3_s2_p1(act)
    for p in params["layer1"]:
        act = bottleneck_fwd(act, p)
    for p in params["layer2"]:
        act = bottleneck_fwd(act, p)
    # single slice back to real rows/channels at the shard boundary
    m = act["n"] * act["h"] * act["w"]
    out = act["mat"][:m, :act["c"]].astype(jnp.float32)
    out = out.reshape(act["n"], act["h"], act["w"], act["c"])
    return jnp.transpose(out, (0, 3, 1, 2))                       # -> NCHW


if __name__ == "__main__":
    params = make_params(seed=0)
    x = jax.random.normal(jax.random.PRNGKey(0), (2, 3, 16, 16), jnp.float32)

    fwd = jax.jit(lambda xx: resnet_shard1_forward(xx, params))
    out = fwd(x)
    jax.block_until_ready(out)

    assert out.shape == (2, 512, 2, 2), out.shape
    assert out.dtype == jnp.float32
    assert bool(jnp.all(jnp.isfinite(out)))
    print("KERNEL_OK")
</pallas_src>

<mosaic_0001>
module attributes {stable_mosaic.version = 11 : i64} {
  func.func @_conv_bn_kernel(%arg0: i32, %arg1: memref<128x256xbf16, #tpu.memory_space<vmem>>, %arg2: memref<256x128xbf16, #tpu.memory_space<vmem>>, %arg3: memref<1x128xf32, #tpu.memory_space<vmem>>, %arg4: memref<1x128xf32, #tpu.memory_space<vmem>>, %arg5: memref<128x128xbf16, #tpu.memory_space<vmem>>) attributes {dimension_semantics = [#tpu.dimension_semantics<parallel>], iteration_bounds = array<i64: 1>, scalar_prefetch = 0 : i64, scratch_operands = 0 : i64, tpu.core_type = #tpu.core_type<tc>, window_params = [{pipeline_mode = #tpu.pipeline_mode<synchronous>, transform_indices = @transform_0, window_bounds = array<i64: 128, 256>}, {transform_indices = @transform_1, window_bounds = array<i64: 256, 128>}, {transform_indices = @transform_2, window_bounds = array<i64: 1, 128>}, {transform_indices = @transform_3, window_bounds = array<i64: 1, 128>}, {transform_indices = @transform_4, window_bounds = array<i64: 128, 128>}]} {
    %c0 = arith.constant 0 : index
    %c0_0 = arith.constant 0 : index
    %0 = vector.load %arg1[%c0, %c0_0] : memref<128x256xbf16, #tpu.memory_space<vmem>>, vector<128x256xbf16>
    %c0_1 = arith.constant 0 : index
    %c0_2 = arith.constant 0 : index
    %1 = vector.load %arg2[%c0_1, %c0_2] : memref<256x128xbf16, #tpu.memory_space<vmem>>, vector<256x128xbf16>
    %cst = arith.constant dense<0.000000e+00> : vector<128x128xf32>
    %2 = tpu.matmul %0, %1, %cst {dimension_numbers = #tpu.dot_dimension_numbers<[1], [0], [0], [1], [0, 0, 1, 1], [], []>} : vector<128x256xbf16>, vector<256x128xbf16>, vector<128x128xf32> -> vector<128x128xf32>
    %cst_3 = arith.constant dense<0.000000e+00> : vector<128xf32>
    %3 = vector.multi_reduction <add>, %2, %cst_3 [0] : vector<128x128xf32> to vector<128xf32>
    %4 = vector.shape_cast %3 : vector<128xf32> to vector<1x128xf32>
    %cst_4 = arith.constant 7.812500e-03 : f32
    %5 = vector.broadcast %cst_4 : f32 to vector<1x128xf32>
    %6 = arith.mulf %4, %5 : vector<1x128xf32>
    %7 = vector.broadcast %6 : vector<1x128xf32> to vector<128x128xf32>
    %8 = arith.subf %2, %7 : vector<128x128xf32>
    %9 = arith.mulf %8, %8 : vector<128x128xf32>
    %cst_5 = arith.constant dense<0.000000e+00> : vector<128xf32>
    %10 = vector.multi_reduction <add>, %9, %cst_5 [0] : vector<128x128xf32> to vector<128xf32>
    %11 = vector.shape_cast %10 : vector<128xf32> to vector<1x128xf32>
    %cst_6 = arith.constant 7.812500e-03 : f32
    %12 = vector.broadcast %cst_6 : f32 to vector<1x128xf32>
    %13 = arith.mulf %11, %12 : vector<1x128xf32>
    %cst_7 = arith.constant 9.99999974E-6 : f32
    %14 = vector.broadcast %cst_7 : f32 to vector<1x128xf32>
    %15 = arith.addf %13, %14 : vector<1x128xf32>
    %16 = math.rsqrt %15 : vector<1x128xf32>
    %17 = vector.broadcast %6 : vector<1x128xf32> to vector<128x128xf32>
    %18 = arith.subf %2, %17 : vector<128x128xf32>
    %c0_8 = arith.constant 0 : index
    %c0_9 = arith.constant 0 : index
    %19 = vector.load %arg3[%c0_8, %c0_9] : memref<1x128xf32, #tpu.memory_space<vmem>>, vector<1x128xf32>
    %20 = arith.mulf %16, %19 : vector<1x128xf32>
    %21 = vector.broadcast %20 : vector<1x128xf32> to vector<128x128xf32>
    %22 = arith.mulf %18, %21 : vector<128x128xf32>
    %c0_10 = arith.constant 0 : index
    %c0_11 = arith.constant 0 : index
    %23 = vector.load %arg4[%c0_10, %c0_11] : memref<1x128xf32, #tpu.memory_space<vmem>>, vector<1x128xf32>
    %24 = vector.broadcast %23 : vector<1x128xf32> to vector<128x128xf32>
    %25 = arith.addf %22, %24 : vector<128x128xf32>
    %cst_12 = arith.constant 0.000000e+00 : f32
    %26 = vector.broadcast %cst_12 : f32 to vector<128x128xf32>
    %27 = arith.maximumf %25, %26 : vector<128x128xf32>
    %28 = arith.truncf %27 : vector<128x128xf32> to vector<128x128xbf16>
    %c0_13 = arith.constant 0 : index
    %c0_14 = arith.constant 0 : index
    %29 = vector.load %arg5[%c0_13, %c0_14] : memref<128x128xbf16, #tpu.memory_space<vmem>>, vector<128x128xbf16>
    tpu.vector_store %arg5[%c0_13, %c0_14], %28 {strides = array<i32>} : memref<128x128xbf16, #tpu.memory_space<vmem>>, vector<128x128xbf16>,
    return
  }
  func.func @transform_0(%arg0: i32) -> (i32, i32) {
    %c0_i32 = arith.constant 0 : i32
    %c0_i32_0 = arith.constant 0 : i32
    %c0_i32_1 = arith.constant 0 : i32
    return %c0_i32, %c0_i32_0 : i32, i32
  }
  func.func @transform_1(%arg0: i32) -> (i32, i32) {
    %c0_i32 = arith.constant 0 : i32
    %c0_i32_0 = arith.constant 0 : i32
    return %c0_i32, %arg0 : i32, i32
  }
  func.func @transform_2(%arg0: i32) -> (i32, i32) {
    %c0_i32 = arith.constant 0 : i32
    %c0_i32_0 = arith.constant 0 : i32
    return %c0_i32, %arg0 : i32, i32
  }
  func.func @transform_3(%arg0: i32) -> (i32, i32) {
    %c0_i32 = arith.constant 0 : i32
    %c0_i32_0 = arith.constant 0 : i32
    return %c0_i32, %arg0 : i32, i32
  }
  func.func @transform_4(%arg0: i32) -> (i32, i32) {
    %c0_i32 = arith.constant 0 : i32
    %c0_i32_0 = arith.constant 0 : i32
    return %c0_i32, %arg0 : i32, i32
  }
}

module attributes {stable_mosaic.version = 11 : i64} {
  func.func @_maxpool_kernel(%arg0: i32, %arg1: memref<32x128xbf16, #tpu.memory_space<vmem>>, %arg2: memref<32x128xbf16, #tpu.memory_space<vmem>>, %arg3: memref<32x128xbf16, #tpu.memory_space<vmem>>, %arg4: memref<32x128xbf16, #tpu.memory_space<vmem>>, %arg5: memref<32x128xbf16, #tpu.memory_space<vmem>>, %arg6: memref<32x128xbf16, #tpu.memory_space<vmem>>, %arg7: memref<32x128xbf16, #tpu.memory_space<vmem>>, %arg8: memref<32x128xbf16, #tpu.memory_space<vmem>>, %arg9: memref<32x128xbf16, #tpu.memory_space<vmem>>, %arg10: memref<32x128xbf16, #tpu.memory_space<vmem>>) attributes {dimension_semantics = [#tpu.dimension_semantics<arbitrary>], iteration_bounds = array<i64: 1>, scalar_prefetch = 0 : i64, scratch_operands = 0 : i64, tpu.core_type = #tpu.core_type<tc>, window_params = [{pipeline_mode = #tpu.pipeline_mode<synchronous>, transform_indices = @transform_0, window_bounds = array<i64: 32, 128>}, {pipeline_mode = #tpu.pipeline_mode<synchronous>, transform_indices = @transform_1, window_bounds = array<i64: 32, 128>}, {pipeline_mode = #tpu.pipeline_mode<synchronous>, transform_indices = @transform_2, window_bounds = array<i64: 32, 128>}, {pipeline_mode = #tpu.pipeline_mode<synchronous>, transform_indices = @transform_3, window_bounds = array<i64: 32, 128>}, {pipeline_mode = #tpu.pipeline_mode<synchronous>, transform_indices = @transform_4, window_bounds = array<i64: 32, 128>}, {pipeline_mode = #tpu.pipeline_mode<synchronous>, transform_indices = @transform_5, window_bounds = array<i64: 32, 128>}, {pipeline_mode = #tpu.pipeline_mode<synchronous>, transform_indices = @transform_6, window_bounds = array<i64: 32, 128>}, {pipeline_mode = #tpu.pipeline_mode<synchronous>, transform_indices = @transform_7, window_bounds = array<i64: 32, 128>}, {pipeline_mode = #tpu.pipeline_mode<synchronous>, transform_indices = @transform_8, window_bounds = array<i64: 32, 128>}, {pipeline_mode = #tpu.pipeline_mode<synchronous>, transform_indices = @transform_9, window_bounds = array<i64: 32, 128>}]} {
    %c0 = arith.constant 0 : index
    %c0_0 = arith.constant 0 : index
    %0 = vector.load %arg1[%c0, %c0_0] : memref<32x128xbf16, #tpu.memory_space<vmem>>, vector<32x128xbf16>
    %c0_1 = arith.constant 0 : index
    %c0_2 = arith.constant 0 : index
    %1 = vector.load %arg2[%c0_1, %c0_2] : memref<32x128xbf16, #tpu.memory_space<vmem>>, vector<32x128xbf16>
    %2 = arith.maximumf %0, %1 : vector<32x128xbf16>
    %c0_3 = arith.constant 0 : index
    %c0_4 = arith.constant 0 : index
    %3 = vector.load %arg3[%c0_3, %c0_4] : memref<32x128xbf16, #tpu.memory_space<vmem>>, vector<32x128xbf16>
    %4 = arith.maximumf %2, %3 : vector<32x128xbf16>
    %c0_5 = arith.constant 0 : index
    %c0_6 = arith.constant 0 : index
    %5 = vector.load %arg4[%c0_5, %c0_6] : memref<32x128xbf16, #tpu.memory_space<vmem>>, vector<32x128xbf16>
    %6 = arith.maximumf %4, %5 : vector<32x128xbf16>
    %c0_7 = arith.constant 0 : index
    %c0_8 = arith.constant 0 : index
    %7 = vector.load %arg5[%c0_7, %c0_8] : memref<32x128xbf16, #tpu.memory_space<vmem>>, vector<32x128xbf16>
    %8 = arith.maximumf %6, %7 : vector<32x128xbf16>
    %c0_9 = arith.constant 0 : index
    %c0_10 = arith.constant 0 : index
    %9 = vector.load %arg6[%c0_9, %c0_10] : memref<32x128xbf16, #tpu.memory_space<vmem>>, vector<32x128xbf16>
    %10 = arith.maximumf %8, %9 : vector<32x128xbf16>
    %c0_11 = arith.constant 0 : index
    %c0_12 = arith.constant 0 : index
    %11 = vector.load %arg7[%c0_11, %c0_12] : memref<32x128xbf16, #tpu.memory_space<vmem>>, vector<32x128xbf16>
    %12 = arith.maximumf %10, %11 : vector<32x128xbf16>
    %c0_13 = arith.constant 0 : index
    %c0_14 = arith.constant 0 : index
    %13 = vector.load %arg8[%c0_13, %c0_14] : memref<32x128xbf16, #tpu.memory_space<vmem>>, vector<32x128xbf16>
    %14 = arith.maximumf %12, %13 : vector<32x128xbf16>
    %c0_15 = arith.constant 0 : index
    %c0_16 = arith.constant 0 : index
    %15 = vector.load %arg9[%c0_15, %c0_16] : memref<32x128xbf16, #tpu.memory_space<vmem>>, vector<32x128xbf16>
    %16 = arith.maximumf %14, %15 : vector<32x128xbf16>
    %c0_17 = arith.constant 0 : index
    %c0_18 = arith.constant 0 : index
    %17 = vector.load %arg10[%c0_17, %c0_18] : memref<32x128xbf16, #tpu.memory_space<vmem>>, vector<32x128xbf16>
    tpu.vector_store %arg10[%c0_17, %c0_18], %16 {strides = array<i32>} : memref<32x128xbf16, #tpu.memory_space<vmem>>, vector<32x128xbf16>,
    return
  }
  func.func @transform_0(%arg0: i32) -> (i32, i32) {
    %c0_i32 = arith.constant 0 : i32
    %c0_i32_0 = arith.constant 0 : i32
    %c0_i32_1 = arith.constant 0 : i32
    return %c0_i32, %c0_i32_0 : i32, i32
  }
  func.func @transform_1(%arg0: i32) -> (i32, i32) {
    %c0_i32 = arith.constant 0 : i32
    %c0_i32_0 = arith.constant 0 : i32
    %c0_i32_1 = arith.constant 0 : i32
    return %c0_i32, %c0_i32_0 : i32, i32
  }
  func.func @transform_2(%arg0: i32) -> (i32, i32) {
    %c0_i32 = arith.constant 0 : i32
    %c0_i32_0 = arith.constant 0 : i32
    %c0_i32_1 = arith.constant 0 : i32
    return %c0_i32, %c0_i32_0 : i32, i32
  }
  func.func @transform_3(%arg0: i32) -> (i32, i32) {
    %c0_i32 = arith.constant 0 : i32
    %c0_i32_0 = arith.constant 0 : i32
    %c0_i32_1 = arith.constant 0 : i32
    return %c0_i32, %c0_i32_0 : i32, i32
  }
  func.func @transform_4(%arg0: i32) -> (i32, i32) {
    %c0_i32 = arith.constant 0 : i32
    %c0_i32_0 = arith.constant 0 : i32
    %c0_i32_1 = arith.constant 0 : i32
    return %c0_i32, %c0_i32_0 : i32, i32
  }
  func.func @transform_5(%arg0: i32) -> (i32, i32) {
    %c0_i32 = arith.constant 0 : i32
    %c0_i32_0 = arith.constant 0 : i32
    %c0_i32_1 = arith.constant 0 : i32
    return %c0_i32, %c0_i32_0 : i32, i32
  }
  func.func @transform_6(%arg0: i32) -> (i32, i32) {
    %c0_i32 = arith.constant 0 : i32
    %c0_i32_0 = arith.constant 0 : i32
    %c0_i32_1 = arith.constant 0 : i32
    return %c0_i32, %c0_i32_0 : i32, i32
  }
  func.func @transform_7(%arg0: i32) -> (i32, i32) {
    %c0_i32 = arith.constant 0 : i32
    %c0_i32_0 = arith.constant 0 : i32
    %c0_i32_1 = arith.constant 0 : i32
    return %c0_i32, %c0_i32_0 : i32, i32
  }
  func.func @transform_8(%arg0: i32) -> (i32, i32) {
    %c0_i32 = arith.constant 0 : i32
    %c0_i32_0 = arith.constant 0 : i32
    %c0_i32_1 = arith.constant 0 : i32
    return %c0_i32, %c0_i32_0 : i32, i32
  }
  func.func @transform_9(%arg0: i32) -> (i32, i32) {
    %c0_i32 = arith.constant 0 : i32
    %c0_i32_0 = arith.constant 0 : i32
    %c0_i32_1 = arith.constant 0 : i32
    return %c0_i32, %c0_i32_0 : i32, i32
  }
}

module attributes {stable_mosaic.version = 11 : i64} {
  func.func @_conv_bn_kernel(%arg0: i32, %arg1: memref<32x128xbf16, #tpu.memory_space<vmem>>, %arg2: memref<128x128xbf16, #tpu.memory_space<vmem>>, %arg3: memref<1x128xf32, #tpu.memory_space<vmem>>, %arg4: memref<1x128xf32, #tpu.memory_space<vmem>>, %arg5: memref<32x128xbf16, #tpu.memory_space<vmem>>) attributes {dimension_semantics = [#tpu.dimension_semantics<parallel>], iteration_bounds = array<i64: 1>, scalar_prefetch = 0 : i64, scratch_operands = 0 : i64, tpu.core_type = #tpu.core_type<tc>, window_params = [{pipeline_mode = #tpu.pipeline_mode<synchronous>, transform_indices = @transform_0, window_bounds = array<i64: 32, 128>}, {transform_indices = @transform_1, window_bounds = array<i64: 128, 128>}, {transform_indices = @transform_2, window_bounds = array<i64: 1, 128>}, {transform_indices = @transform_3, window_bounds = array<i64: 1, 128>}, {transform_indices = @transform_4, window_bounds = array<i64: 32, 128>}]} {
    %c0 = arith.constant 0 : index
    %c0_0 = arith.constant 0 : index
    %0 = vector.load %arg1[%c0, %c0_0] : memref<32x128xbf16, #tpu.memory_space<vmem>>, vector<32x128xbf16>
    %c0_1 = arith.constant 0 : index
    %c0_2 = arith.constant 0 : index
    %1 = vector.load %arg2[%c0_1, %c0_2] : memref<128x128xbf16, #tpu.memory_space<vmem>>, vector<128x128xbf16>
    %cst = arith.constant dense<0.000000e+00> : vector<32x128xf32>
    %2 = tpu.matmul %0, %1, %cst {dimension_numbers = #tpu.dot_dimension_numbers<[1], [0], [0], [1], [0, 0, 1, 1], [], []>} : vector<32x128xbf16>, vector<128x128xbf16>, vector<32x128xf32> -> vector<32x128xf32>
    %cst_3 = arith.constant dense<0.000000e+00> : vector<128xf32>
    %3 = vector.multi_reduction <add>, %2, %cst_3 [0] : vector<32x128xf32> to vector<128xf32>
    %4 = vector.shape_cast %3 : vector<128xf32> to vector<1x128xf32>
    %cst_4 = arith.constant 3.125000e-02 : f32
    %5 = vector.broadcast %cst_4 : f32 to vector<1x128xf32>
    %6 = arith.mulf %4, %5 : vector<1x128xf32>
    %7 = vector.broadcast %6 : vector<1x128xf32> to vector<32x128xf32>
    %8 = arith.subf %2, %7 : vector<32x128xf32>
    %9 = arith.mulf %8, %8 : vector<32x128xf32>
    %cst_5 = arith.constant dense<0.000000e+00> : vector<128xf32>
    %10 = vector.multi_reduction <add>, %9, %cst_5 [0] : vector<32x128xf32> to vector<128xf32>
    %11 = vector.shape_cast %10 : vector<128xf32> to vector<1x128xf32>
    %cst_6 = arith.constant 3.125000e-02 : f32
    %12 = vector.broadcast %cst_6 : f32 to vector<1x128xf32>
    %13 = arith.mulf %11, %12 : vector<1x128xf32>
    %cst_7 = arith.constant 9.99999974E-6 : f32
    %14 = vector.broadcast %cst_7 : f32 to vector<1x128xf32>
    %15 = arith.addf %13, %14 : vector<1x128xf32>
    %16 = math.rsqrt %15 : vector<1x128xf32>
    %17 = vector.broadcast %6 : vector<1x128xf32> to vector<32x128xf32>
    %18 = arith.subf %2, %17 : vector<32x128xf32>
    %c0_8 = arith.constant 0 : index
    %c0_9 = arith.constant 0 : index
    %19 = vector.load %arg3[%c0_8, %c0_9] : memref<1x128xf32, #tpu.memory_space<vmem>>, vector<1x128xf32>
    %20 = arith.mulf %16, %19 : vector<1x128xf32>
    %21 = vector.broadcast %20 : vector<1x128xf32> to vector<32x128xf32>
    %22 = arith.mulf %18, %21 : vector<32x128xf32>
    %c0_10 = arith.constant 0 : index
    %c0_11 = arith.constant 0 : index
    %23 = vector.load %arg4[%c0_10, %c0_11] : memref<1x128xf32, #tpu.memory_space<vmem>>, vector<1x128xf32>
    %24 = vector.broadcast %23 : vector<1x128xf32> to vector<32x128xf32>
    %25 = arith.addf %22, %24 : vector<32x128xf32>
    %cst_12 = arith.constant 0.000000e+00 : f32
    %26 = vector.broadcast %cst_12 : f32 to vector<32x128xf32>
    %27 = arith.maximumf %25, %26 : vector<32x128xf32>
    %28 = arith.truncf %27 : vector<32x128xf32> to vector<32x128xbf16>
    %c0_13 = arith.constant 0 : index
    %c0_14 = arith.constant 0 : index
    %29 = vector.load %arg5[%c0_13, %c0_14] : memref<32x128xbf16, #tpu.memory_space<vmem>>, vector<32x128xbf16>
    tpu.vector_store %arg5[%c0_13, %c0_14], %28 {strides = array<i32>} : memref<32x128xbf16, #tpu.memory_space<vmem>>, vector<32x128xbf16>,
    return
  }
  func.func @transform_0(%arg0: i32) -> (i32, i32) {
    %c0_i32 = arith.constant 0 : i32
    %c0_i32_0 = arith.constant 0 : i32
    %c0_i32_1 = arith.constant 0 : i32
    return %c0_i32, %c0_i32_0 : i32, i32
  }
  func.func @transform_1(%arg0: i32) -> (i32, i32) {
    %c0_i32 = arith.constant 0 : i32
    %c0_i32_0 = arith.constant 0 : i32
    return %c0_i32, %arg0 : i32, i32
  }
  func.func @transform_2(%arg0: i32) -> (i32, i32) {
    %c0_i32 = arith.constant 0 : i32
    %c0_i32_0 = arith.constant 0 : i32
    return %c0_i32, %arg0 : i32, i32
  }
  func.func @transform_3(%arg0: i32) -> (i32, i32) {
    %c0_i32 = arith.constant 0 : i32
    %c0_i32_0 = arith.constant 0 : i32
    return %c0_i32, %arg0 : i32, i32
  }
  func.func @transform_4(%arg0: i32) -> (i32, i32) {
    %c0_i32 = arith.constant 0 : i32
    %c0_i32_0 = arith.constant 0 : i32
    return %c0_i32, %arg0 : i32, i32
  }
}

module attributes {stable_mosaic.version = 11 : i64} {
  func.func @_conv_bn_kernel(%arg0: i32, %arg1: memref<32x128xbf16, #tpu.memory_space<vmem>>, %arg2: memref<128x128xbf16, #tpu.memory_space<vmem>>, %arg3: memref<1x128xf32, #tpu.memory_space<vmem>>, %arg4: memref<1x128xf32, #tpu.memory_space<vmem>>, %arg5: memref<32x128xbf16, #tpu.memory_space<vmem>>, %arg6: memref<32x128xbf16, #tpu.memory_space<vmem>>) attributes {dimension_semantics = [#tpu.dimension_semantics<parallel>], iteration_bounds = array<i64: 2>, scalar_prefetch = 0 : i64, scratch_operands = 0 : i64, tpu.core_type = #tpu.core_type<tc>, window_params = [{pipeline_mode = #tpu.pipeline_mode<synchronous>, transform_indices = @transform_0, window_bounds = array<i64: 32, 128>}, {transform_indices = @transform_1, window_bounds = array<i64: 128, 128>}, {transform_indices = @transform_2, window_bounds = array<i64: 1, 128>}, {transform_indices = @transform_3, window_bounds = array<i64: 1, 128>}, {transform_indices = @transform_4, window_bounds = array<i64: 32, 128>}, {transform_indices = @transform_5, window_bounds = array<i64: 32, 128>}]} {
    %c0 = arith.constant 0 : index
    %c0_0 = arith.constant 0 : index
    %0 = vector.load %arg1[%c0, %c0_0] : memref<32x128xbf16, #tpu.memory_space<vmem>>, vector<32x128xbf16>
    %c0_1 = arith.constant 0 : index
    %c0_2 = arith.constant 0 : index
    %1 = vector.load %arg2[%c0_1, %c0_2] : memref<128x128xbf16, #tpu.memory_space<vmem>>, vector<128x128xbf16>
    %cst = arith.constant dense<0.000000e+00> : vector<32x128xf32>
    %2 = tpu.matmul %0, %1, %cst {dimension_numbers = #tpu.dot_dimension_numbers<[1], [0], [0], [1], [0, 0, 1, 1], [], []>} : vector<32x128xbf16>, vector<128x128xbf16>, vector<32x128xf32> -> vector<32x128xf32>
    %cst_3 = arith.constant dense<0.000000e+00> : vector<128xf32>
    %3 = vector.multi_reduction <add>, %2, %cst_3 [0] : vector<32x128xf32> to vector<128xf32>
    %4 = vector.shape_cast %3 : vector<128xf32> to vector<1x128xf32>
    %cst_4 = arith.constant 3.125000e-02 : f32
    %5 = vector.broadcast %cst_4 : f32 to vector<1x128xf32>
    %6 = arith.mulf %4, %5 : vector<1x128xf32>
    %7 = vector.broadcast %6 : vector<1x128xf32> to vector<32x128xf32>
    %8 = arith.subf %2, %7 : vector<32x128xf32>
    %9 = arith.mulf %8, %8 : vector<32x128xf32>
    %cst_5 = arith.constant dense<0.000000e+00> : vector<128xf32>
    %10 = vector.multi_reduction <add>, %9, %cst_5 [0] : vector<32x128xf32> to vector<128xf32>
    %11 = vector.shape_cast %10 : vector<128xf32> to vector<1x128xf32>
    %cst_6 = arith.constant 3.125000e-02 : f32
    %12 = vector.broadcast %cst_6 : f32 to vector<1x128xf32>
    %13 = arith.mulf %11, %12 : vector<1x128xf32>
    %cst_7 = arith.constant 9.99999974E-6 : f32
    %14 = vector.broadcast %cst_7 : f32 to vector<1x128xf32>
    %15 = arith.addf %13, %14 : vector<1x128xf32>
    %16 = math.rsqrt %15 : vector<1x128xf32>
    %17 = vector.broadcast %6 : vector<1x128xf32> to vector<32x128xf32>
    %18 = arith.subf %2, %17 : vector<32x128xf32>
    %c0_8 = arith.constant 0 : index
    %c0_9 = arith.constant 0 : index
    %19 = vector.load %arg3[%c0_8, %c0_9] : memref<1x128xf32, #tpu.memory_space<vmem>>, vector<1x128xf32>
    %20 = arith.mulf %16, %19 : vector<1x128xf32>
    %21 = vector.broadcast %20 : vector<1x128xf32> to vector<32x128xf32>
    %22 = arith.mulf %18, %21 : vector<32x128xf32>
    %c0_10 = arith.constant 0 : index
    %c0_11 = arith.constant 0 : index
    %23 = vector.load %arg4[%c0_10, %c0_11] : memref<1x128xf32, #tpu.memory_space<vmem>>, vector<1x128xf32>
    %24 = vector.broadcast %23 : vector<1x128xf32> to vector<32x128xf32>
    %25 = arith.addf %22, %24 : vector<32x128xf32>
    %c0_12 = arith.constant 0 : index
    %c0_13 = arith.constant 0 : index
    %26 = vector.load %arg5[%c0_12, %c0_13] : memref<32x128xbf16, #tpu.memory_space<vmem>>, vector<32x128xbf16>
    %27 = arith.extf %26 : vector<32x128xbf16> to vector<32x128xf32>
    %28 = arith.addf %25, %27 : vector<32x128xf32>
    %cst_14 = arith.constant 0.000000e+00 : f32
    %29 = vector.broadcast %cst_14 : f32 to vector<32x128xf32>
    %30 = arith.maximumf %28, %29 : vector<32x128xf32>
    %31 = arith.truncf %30 : vector<32x128xf32> to vector<32x128xbf16>
    %c0_15 = arith.constant 0 : index
    %c0_16 = arith.constant 0 : index
    %32 = vector.load %arg6[%c0_15, %c0_16] : memref<32x128xbf16, #tpu.memory_space<vmem>>, vector<32x128xbf16>
    tpu.vector_store %arg6[%c0_15, %c0_16], %31 {strides = array<i32>} : memref<32x128xbf16, #tpu.memory_space<vmem>>, vector<32x128xbf16>,
    return
  }
  func.func @transform_0(%arg0: i32) -> (i32, i32) {
    %c0_i32 = arith.constant 0 : i32
    %c0_i32_0 = arith.constant 0 : i32
    %c0_i32_1 = arith.constant 0 : i32
    return %c0_i32, %c0_i32_0 : i32, i32
  }
  func.func @transform_1(%arg0: i32) -> (i32, i32) {
    %c0_i32 = arith.constant 0 : i32
    %c0_i32_0 = arith.constant 0 : i32
    return %c0_i32, %arg0 : i32, i32
  }
  func.func @transform_2(%arg0: i32) -> (i32, i32) {
    %c0_i32 = arith.constant 0 : i32
    %c0_i32_0 = arith.constant 0 : i32
    return %c0_i32, %arg0 : i32, i32
  }
  func.func @transform_3(%arg0: i32) -> (i32, i32) {
    %c0_i32 = arith.constant 0 : i32
    %c0_i32_0 = arith.constant 0 : i32
    return %c0_i32, %arg0 : i32, i32
  }
  func.func @transform_4(%arg0: i32) -> (i32, i32) {
    %c0_i32 = arith.constant 0 : i32
    %c0_i32_0 = arith.constant 0 : i32
    return %c0_i32, %arg0 : i32, i32
  }
  func.func @transform_5(%arg0: i32) -> (i32, i32) {
    %c0_i32 = arith.constant 0 : i32
    %c0_i32_0 = arith.constant 0 : i32
    return %c0_i32, %arg0 : i32, i32
  }
}

module attributes {stable_mosaic.version = 11 : i64} {
  func.func @_conv_bn_kernel(%arg0: i32, %arg1: memref<32x128xbf16, #tpu.memory_space<vmem>>, %arg2: memref<128x128xbf16, #tpu.memory_space<vmem>>, %arg3: memref<1x128xf32, #tpu.memory_space<vmem>>, %arg4: memref<1x128xf32, #tpu.memory_space<vmem>>, %arg5: memref<32x128xbf16, #tpu.memory_space<vmem>>) attributes {dimension_semantics = [#tpu.dimension_semantics<parallel>], iteration_bounds = array<i64: 2>, scalar_prefetch = 0 : i64, scratch_operands = 0 : i64, tpu.core_type = #tpu.core_type<tc>, window_params = [{pipeline_mode = #tpu.pipeline_mode<synchronous>, transform_indices = @transform_0, window_bounds = array<i64: 32, 128>}, {transform_indices = @transform_1, window_bounds = array<i64: 128, 128>}, {transform_indices = @transform_2, window_bounds = array<i64: 1, 128>}, {transform_indices = @transform_3, window_bounds = array<i64: 1, 128>}, {transform_indices = @transform_4, window_bounds = array<i64: 32, 128>}]} {
    %c0 = arith.constant 0 : index
    %c0_0 = arith.constant 0 : index
    %0 = vector.load %arg1[%c0, %c0_0] : memref<32x128xbf16, #tpu.memory_space<vmem>>, vector<32x128xbf16>
    %c0_1 = arith.constant 0 : index
    %c0_2 = arith.constant 0 : index
    %1 = vector.load %arg2[%c0_1, %c0_2] : memref<128x128xbf16, #tpu.memory_space<vmem>>, vector<128x128xbf16>
    %cst = arith.constant dense<0.000000e+00> : vector<32x128xf32>
    %2 = tpu.matmul %0, %1, %cst {dimension_numbers = #tpu.dot_dimension_numbers<[1], [0], [0], [1], [0, 0, 1, 1], [], []>} : vector<32x128xbf16>, vector<128x128xbf16>, vector<32x128xf32> -> vector<32x128xf32>
    %cst_3 = arith.constant dense<0.000000e+00> : vector<128xf32>
    %3 = vector.multi_reduction <add>, %2, %cst_3 [0] : vector<32x128xf32> to vector<128xf32>
    %4 = vector.shape_cast %3 : vector<128xf32> to vector<1x128xf32>
    %cst_4 = arith.constant 3.125000e-02 : f32
    %5 = vector.broadcast %cst_4 : f32 to vector<1x128xf32>
    %6 = arith.mulf %4, %5 : vector<1x128xf32>
    %7 = vector.broadcast %6 : vector<1x128xf32> to vector<32x128xf32>
    %8 = arith.subf %2, %7 : vector<32x128xf32>
    %9 = arith.mulf %8, %8 : vector<32x128xf32>
    %cst_5 = arith.constant dense<0.000000e+00> : vector<128xf32>
    %10 = vector.multi_reduction <add>, %9, %cst_5 [0] : vector<32x128xf32> to vector<128xf32>
    %11 = vector.shape_cast %10 : vector<128xf32> to vector<1x128xf32>
    %cst_6 = arith.constant 3.125000e-02 : f32
    %12 = vector.broadcast %cst_6 : f32 to vector<1x128xf32>
    %13 = arith.mulf %11, %12 : vector<1x128xf32>
    %cst_7 = arith.constant 9.99999974E-6 : f32
    %14 = vector.broadcast %cst_7 : f32 to vector<1x128xf32>
    %15 = arith.addf %13, %14 : vector<1x128xf32>
    %16 = math.rsqrt %15 : vector<1x128xf32>
    %17 = vector.broadcast %6 : vector<1x128xf32> to vector<32x128xf32>
    %18 = arith.subf %2, %17 : vector<32x128xf32>
    %c0_8 = arith.constant 0 : index
    %c0_9 = arith.constant 0 : index
    %19 = vector.load %arg3[%c0_8, %c0_9] : memref<1x128xf32, #tpu.memory_space<vmem>>, vector<1x128xf32>
    %20 = arith.mulf %16, %19 : vector<1x128xf32>
    %21 = vector.broadcast %20 : vector<1x128xf32> to vector<32x128xf32>
    %22 = arith.mulf %18, %21 : vector<32x128xf32>
    %c0_10 = arith.constant 0 : index
    %c0_11 = arith.constant 0 : index
    %23 = vector.load %arg4[%c0_10, %c0_11] : memref<1x128xf32, #tpu.memory_space<vmem>>, vector<1x128xf32>
    %24 = vector.broadcast %23 : vector<1x128xf32> to vector<32x128xf32>
    %25 = arith.addf %22, %24 : vector<32x128xf32>
    %26 = arith.truncf %25 : vector<32x128xf32> to vector<32x128xbf16>
    %c0_12 = arith.constant 0 : index
    %c0_13 = arith.constant 0 : index
    %27 = vector.load %arg5[%c0_12, %c0_13] : memref<32x128xbf16, #tpu.memory_space<vmem>>, vector<32x128xbf16>
    tpu.vector_store %arg5[%c0_12, %c0_13], %26 {strides = array<i32>} : memref<32x128xbf16, #tpu.memory_space<vmem>>, vector<32x128xbf16>,
    return
  }
  func.func @transform_0(%arg0: i32) -> (i32, i32) {
    %c0_i32 = arith.constant 0 : i32
    %c0_i32_0 = arith.constant 0 : i32
    %c0_i32_1 = arith.constant 0 : i32
    return %c0_i32, %c0_i32_0 : i32, i32
  }
  func.func @transform_1(%arg0: i32) -> (i32, i32) {
    %c0_i32 = arith.constant 0 : i32
    %c0_i32_0 = arith.constant 0 : i32
    return %c0_i32, %arg0 : i32, i32
  }
  func.func @transform_2(%arg0: i32) -> (i32, i32) {
    %c0_i32 = arith.constant 0 : i32
    %c0_i32_0 = arith.constant 0 : i32
    return %c0_i32, %arg0 : i32, i32
  }
  func.func @transform_3(%arg0: i32) -> (i32, i32) {
    %c0_i32 = arith.constant 0 : i32
    %c0_i32_0 = arith.constant 0 : i32
    return %c0_i32, %arg0 : i32, i32
  }
  func.func @transform_4(%arg0: i32) -> (i32, i32) {
    %c0_i32 = arith.constant 0 : i32
    %c0_i32_0 = arith.constant 0 : i32
    return %c0_i32, %arg0 : i32, i32
  }
}

module attributes {stable_mosaic.version = 11 : i64} {
  func.func @_conv_bn_kernel(%arg0: i32, %arg1: memref<32x640xbf16, #tpu.memory_space<vmem>>, %arg2: memref<640x128xbf16, #tpu.memory_space<vmem>>, %arg3: memref<1x128xf32, #tpu.memory_space<vmem>>, %arg4: memref<1x128xf32, #tpu.memory_space<vmem>>, %arg5: memref<32x128xbf16, #tpu.memory_space<vmem>>) attributes {dimension_semantics = [#tpu.dimension_semantics<parallel>], iteration_bounds = array<i64: 1>, scalar_prefetch = 0 : i64, scratch_operands = 0 : i64, tpu.core_type = #tpu.core_type<tc>, window_params = [{pipeline_mode = #tpu.pipeline_mode<synchronous>, transform_indices = @transform_0, window_bounds = array<i64: 32, 640>}, {transform_indices = @transform_1, window_bounds = array<i64: 640, 128>}, {transform_indices = @transform_2, window_bounds = array<i64: 1, 128>}, {transform_indices = @transform_3, window_bounds = array<i64: 1, 128>}, {transform_indices = @transform_4, window_bounds = array<i64: 32, 128>}]} {
    %c0 = arith.constant 0 : index
    %c0_0 = arith.constant 0 : index
    %0 = vector.load %arg1[%c0, %c0_0] : memref<32x640xbf16, #tpu.memory_space<vmem>>, vector<32x640xbf16>
    %c0_1 = arith.constant 0 : index
    %c0_2 = arith.constant 0 : index
    %1 = vector.load %arg2[%c0_1, %c0_2] : memref<640x128xbf16, #tpu.memory_space<vmem>>, vector<640x128xbf16>
    %cst = arith.constant dense<0.000000e+00> : vector<32x128xf32>
    %2 = tpu.matmul %0, %1, %cst {dimension_numbers = #tpu.dot_dimension_numbers<[1], [0], [0], [1], [0, 0, 1, 1], [], []>} : vector<32x640xbf16>, vector<640x128xbf16>, vector<32x128xf32> -> vector<32x128xf32>
    %cst_3 = arith.constant dense<0.000000e+00> : vector<128xf32>
    %3 = vector.multi_reduction <add>, %2, %cst_3 [0] : vector<32x128xf32> to vector<128xf32>
    %4 = vector.shape_cast %3 : vector<128xf32> to vector<1x128xf32>
    %cst_4 = arith.constant 3.125000e-02 : f32
    %5 = vector.broadcast %cst_4 : f32 to vector<1x128xf32>
    %6 = arith.mulf %4, %5 : vector<1x128xf32>
    %7 = vector.broadcast %6 : vector<1x128xf32> to vector<32x128xf32>
    %8 = arith.subf %2, %7 : vector<32x128xf32>
    %9 = arith.mulf %8, %8 : vector<32x128xf32>
    %cst_5 = arith.constant dense<0.000000e+00> : vector<128xf32>
    %10 = vector.multi_reduction <add>, %9, %cst_5 [0] : vector<32x128xf32> to vector<128xf32>
    %11 = vector.shape_cast %10 : vector<128xf32> to vector<1x128xf32>
    %cst_6 = arith.constant 3.125000e-02 : f32
    %12 = vector.broadcast %cst_6 : f32 to vector<1x128xf32>
    %13 = arith.mulf %11, %12 : vector<1x128xf32>
    %cst_7 = arith.constant 9.99999974E-6 : f32
    %14 = vector.broadcast %cst_7 : f32 to vector<1x128xf32>
    %15 = arith.addf %13, %14 : vector<1x128xf32>
    %16 = math.rsqrt %15 : vector<1x128xf32>
    %17 = vector.broadcast %6 : vector<1x128xf32> to vector<32x128xf32>
    %18 = arith.subf %2, %17 : vector<32x128xf32>
    %c0_8 = arith.constant 0 : index
    %c0_9 = arith.constant 0 : index
    %19 = vector.load %arg3[%c0_8, %c0_9] : memref<1x128xf32, #tpu.memory_space<vmem>>, vector<1x128xf32>
    %20 = arith.mulf %16, %19 : vector<1x128xf32>
    %21 = vector.broadcast %20 : vector<1x128xf32> to vector<32x128xf32>
    %22 = arith.mulf %18, %21 : vector<32x128xf32>
    %c0_10 = arith.constant 0 : index
    %c0_11 = arith.constant 0 : index
    %23 = vector.load %arg4[%c0_10, %c0_11] : memref<1x128xf32, #tpu.memory_space<vmem>>, vector<1x128xf32>
    %24 = vector.broadcast %23 : vector<1x128xf32> to vector<32x128xf32>
    %25 = arith.addf %22, %24 : vector<32x128xf32>
    %cst_12 = arith.constant 0.000000e+00 : f32
    %26 = vector.broadcast %cst_12 : f32 to vector<32x128xf32>
    %27 = arith.maximumf %25, %26 : vector<32x128xf32>
    %28 = arith.truncf %27 : vector<32x128xf32> to vector<32x128xbf16>
    %c0_13 = arith.constant 0 : index
    %c0_14 = arith.constant 0 : index
    %29 = vector.load %arg5[%c0_13, %c0_14] : memref<32x128xbf16, #tpu.memory_space<vmem>>, vector<32x128xbf16>
    tpu.vector_store %arg5[%c0_13, %c0_14], %28 {strides = array<i32>} : memref<32x128xbf16, #tpu.memory_space<vmem>>, vector<32x128xbf16>,
    return
  }
  func.func @transform_0(%arg0: i32) -> (i32, i32) {
    %c0_i32 = arith.constant 0 : i32
    %c0_i32_0 = arith.constant 0 : i32
    %c0_i32_1 = arith.constant 0 : i32
    return %c0_i32, %c0_i32_0 : i32, i32
  }
  func.func @transform_1(%arg0: i32) -> (i32, i32) {
    %c0_i32 = arith.constant 0 : i32
    %c0_i32_0 = arith.constant 0 : i32
    return %c0_i32, %arg0 : i32, i32
  }
  func.func @transform_2(%arg0: i32) -> (i32, i32) {
    %c0_i32 = arith.constant 0 : i32
    %c0_i32_0 = arith.constant 0 : i32
    return %c0_i32, %arg0 : i32, i32
  }
  func.func @transform_3(%arg0: i32) -> (i32, i32) {
    %c0_i32 = arith.constant 0 : i32
    %c0_i32_0 = arith.constant 0 : i32
    return %c0_i32, %arg0 : i32, i32
  }
  func.func @transform_4(%arg0: i32) -> (i32, i32) {
    %c0_i32 = arith.constant 0 : i32
    %c0_i32_0 = arith.constant 0 : i32
    return %c0_i32, %arg0 : i32, i32
  }
}

module attributes {stable_mosaic.version = 11 : i64} {
  func.func @_conv_bn_kernel(%arg0: i32, %arg1: memref<32x256xbf16, #tpu.memory_space<vmem>>, %arg2: memref<256x128xbf16, #tpu.memory_space<vmem>>, %arg3: memref<1x128xf32, #tpu.memory_space<vmem>>, %arg4: memref<1x128xf32, #tpu.memory_space<vmem>>, %arg5: memref<32x128xbf16, #tpu.memory_space<vmem>>) attributes {dimension_semantics = [#tpu.dimension_semantics<parallel>], iteration_bounds = array<i64: 1>, scalar_prefetch = 0 : i64, scratch_operands = 0 : i64, tpu.core_type = #tpu.core_type<tc>, window_params = [{pipeline_mode = #tpu.pipeline_mode<synchronous>, transform_indices = @transform_0, window_bounds = array<i64: 32, 256>}, {transform_indices = @transform_1, window_bounds = array<i64: 256, 128>}, {transform_indices = @transform_2, window_bounds = array<i64: 1, 128>}, {transform_indices = @transform_3, window_bounds = array<i64: 1, 128>}, {transform_indices = @transform_4, window_bounds = array<i64: 32, 128>}]} {
    %c0 = arith.constant 0 : index
    %c0_0 = arith.constant 0 : index
    %0 = vector.load %arg1[%c0, %c0_0] : memref<32x256xbf16, #tpu.memory_space<vmem>>, vector<32x256xbf16>
    %c0_1 = arith.constant 0 : index
    %c0_2 = arith.constant 0 : index
    %1 = vector.load %arg2[%c0_1, %c0_2] : memref<256x128xbf16, #tpu.memory_space<vmem>>, vector<256x128xbf16>
    %cst = arith.constant dense<0.000000e+00> : vector<32x128xf32>
    %2 = tpu.matmul %0, %1, %cst {dimension_numbers = #tpu.dot_dimension_numbers<[1], [0], [0], [1], [0, 0, 1, 1], [], []>} : vector<32x256xbf16>, vector<256x128xbf16>, vector<32x128xf32> -> vector<32x128xf32>
    %cst_3 = arith.constant dense<0.000000e+00> : vector<128xf32>
    %3 = vector.multi_reduction <add>, %2, %cst_3 [0] : vector<32x128xf32> to vector<128xf32>
    %4 = vector.shape_cast %3 : vector<128xf32> to vector<1x128xf32>
    %cst_4 = arith.constant 3.125000e-02 : f32
    %5 = vector.broadcast %cst_4 : f32 to vector<1x128xf32>
    %6 = arith.mulf %4, %5 : vector<1x128xf32>
    %7 = vector.broadcast %6 : vector<1x128xf32> to vector<32x128xf32>
    %8 = arith.subf %2, %7 : vector<32x128xf32>
    %9 = arith.mulf %8, %8 : vector<32x128xf32>
    %cst_5 = arith.constant dense<0.000000e+00> : vector<128xf32>
    %10 = vector.multi_reduction <add>, %9, %cst_5 [0] : vector<32x128xf32> to vector<128xf32>
    %11 = vector.shape_cast %10 : vector<128xf32> to vector<1x128xf32>
    %cst_6 = arith.constant 3.125000e-02 : f32
    %12 = vector.broadcast %cst_6 : f32 to vector<1x128xf32>
    %13 = arith.mulf %11, %12 : vector<1x128xf32>
    %cst_7 = arith.constant 9.99999974E-6 : f32
    %14 = vector.broadcast %cst_7 : f32 to vector<1x128xf32>
    %15 = arith.addf %13, %14 : vector<1x128xf32>
    %16 = math.rsqrt %15 : vector<1x128xf32>
    %17 = vector.broadcast %6 : vector<1x128xf32> to vector<32x128xf32>
    %18 = arith.subf %2, %17 : vector<32x128xf32>
    %c0_8 = arith.constant 0 : index
    %c0_9 = arith.constant 0 : index
    %19 = vector.load %arg3[%c0_8, %c0_9] : memref<1x128xf32, #tpu.memory_space<vmem>>, vector<1x128xf32>
    %20 = arith.mulf %16, %19 : vector<1x128xf32>
    %21 = vector.broadcast %20 : vector<1x128xf32> to vector<32x128xf32>
    %22 = arith.mulf %18, %21 : vector<32x128xf32>
    %c0_10 = arith.constant 0 : index
    %c0_11 = arith.constant 0 : index
    %23 = vector.load %arg4[%c0_10, %c0_11] : memref<1x128xf32, #tpu.memory_space<vmem>>, vector<1x128xf32>
    %24 = vector.broadcast %23 : vector<1x128xf32> to vector<32x128xf32>
    %25 = arith.addf %22, %24 : vector<32x128xf32>
    %cst_12 = arith.constant 0.000000e+00 : f32
    %26 = vector.broadcast %cst_12 : f32 to vector<32x128xf32>
    %27 = arith.maximumf %25, %26 : vector<32x128xf32>
    %28 = arith.truncf %27 : vector<32x128xf32> to vector<32x128xbf16>
    %c0_13 = arith.constant 0 : index
    %c0_14 = arith.constant 0 : index
    %29 = vector.load %arg5[%c0_13, %c0_14] : memref<32x128xbf16, #tpu.memory_space<vmem>>, vector<32x128xbf16>
    tpu.vector_store %arg5[%c0_13, %c0_14], %28 {strides = array<i32>} : memref<32x128xbf16, #tpu.memory_space<vmem>>, vector<32x128xbf16>,
    return
  }
  func.func @transform_0(%arg0: i32) -> (i32, i32) {
    %c0_i32 = arith.constant 0 : i32
    %c0_i32_0 = arith.constant 0 : i32
    %c0_i32_1 = arith.constant 0 : i32
    return %c0_i32, %c0_i32_0 : i32, i32
  }
  func.func @transform_1(%arg0: i32) -> (i32, i32) {
    %c0_i32 = arith.constant 0 : i32
    %c0_i32_0 = arith.constant 0 : i32
    return %c0_i32, %arg0 : i32, i32
  }
  func.func @transform_2(%arg0: i32) -> (i32, i32) {
    %c0_i32 = arith.constant 0 : i32
    %c0_i32_0 = arith.constant 0 : i32
    return %c0_i32, %arg0 : i32, i32
  }
  func.func @transform_3(%arg0: i32) -> (i32, i32) {
    %c0_i32 = arith.constant 0 : i32
    %c0_i32_0 = arith.constant 0 : i32
    return %c0_i32, %arg0 : i32, i32
  }
  func.func @transform_4(%arg0: i32) -> (i32, i32) {
    %c0_i32 = arith.constant 0 : i32
    %c0_i32_0 = arith.constant 0 : i32
    return %c0_i32, %arg0 : i32, i32
  }
}

module attributes {stable_mosaic.version = 11 : i64} {
  func.func @_conv_bn_kernel(%arg0: i32, %arg1: memref<8x1152xbf16, #tpu.memory_space<vmem>>, %arg2: memref<1152x128xbf16, #tpu.memory_space<vmem>>, %arg3: memref<1x128xf32, #tpu.memory_space<vmem>>, %arg4: memref<1x128xf32, #tpu.memory_space<vmem>>, %arg5: memref<8x128xbf16, #tpu.memory_space<vmem>>) attributes {dimension_semantics = [#tpu.dimension_semantics<parallel>], iteration_bounds = array<i64: 1>, scalar_prefetch = 0 : i64, scratch_operands = 0 : i64, tpu.core_type = #tpu.core_type<tc>, window_params = [{pipeline_mode = #tpu.pipeline_mode<synchronous>, transform_indices = @transform_0, window_bounds = array<i64: 8, 1152>}, {transform_indices = @transform_1, window_bounds = array<i64: 1152, 128>}, {transform_indices = @transform_2, window_bounds = array<i64: 1, 128>}, {transform_indices = @transform_3, window_bounds = array<i64: 1, 128>}, {transform_indices = @transform_4, window_bounds = array<i64: 8, 128>}]} {
    %c0 = arith.constant 0 : index
    %c0_0 = arith.constant 0 : index
    %0 = vector.load %arg1[%c0, %c0_0] : memref<8x1152xbf16, #tpu.memory_space<vmem>>, vector<8x1152xbf16>
    %c0_1 = arith.constant 0 : index
    %c0_2 = arith.constant 0 : index
    %1 = vector.load %arg2[%c0_1, %c0_2] : memref<1152x128xbf16, #tpu.memory_space<vmem>>, vector<1152x128xbf16>
    %cst = arith.constant dense<0.000000e+00> : vector<8x128xf32>
    %2 = tpu.matmul %0, %1, %cst {dimension_numbers = #tpu.dot_dimension_numbers<[1], [0], [0], [1], [0, 0, 1, 1], [], []>} : vector<8x1152xbf16>, vector<1152x128xbf16>, vector<8x128xf32> -> vector<8x128xf32>
    %cst_3 = arith.constant dense<0.000000e+00> : vector<128xf32>
    %3 = vector.multi_reduction <add>, %2, %cst_3 [0] : vector<8x128xf32> to vector<128xf32>
    %4 = vector.shape_cast %3 : vector<128xf32> to vector<1x128xf32>
    %cst_4 = arith.constant 1.250000e-01 : f32
    %5 = vector.broadcast %cst_4 : f32 to vector<1x128xf32>
    %6 = arith.mulf %4, %5 : vector<1x128xf32>
    %7 = vector.broadcast %6 : vector<1x128xf32> to vector<8x128xf32>
    %8 = arith.subf %2, %7 : vector<8x128xf32>
    %9 = arith.mulf %8, %8 : vector<8x128xf32>
    %cst_5 = arith.constant dense<0.000000e+00> : vector<128xf32>
    %10 = vector.multi_reduction <add>, %9, %cst_5 [0] : vector<8x128xf32> to vector<128xf32>
    %11 = vector.shape_cast %10 : vector<128xf32> to vector<1x128xf32>
    %cst_6 = arith.constant 1.250000e-01 : f32
    %12 = vector.broadcast %cst_6 : f32 to vector<1x128xf32>
    %13 = arith.mulf %11, %12 : vector<1x128xf32>
    %cst_7 = arith.constant 9.99999974E-6 : f32
    %14 = vector.broadcast %cst_7 : f32 to vector<1x128xf32>
    %15 = arith.addf %13, %14 : vector<1x128xf32>
    %16 = math.rsqrt %15 : vector<1x128xf32>
    %17 = vector.broadcast %6 : vector<1x128xf32> to vector<8x128xf32>
    %18 = arith.subf %2, %17 : vector<8x128xf32>
    %c0_8 = arith.constant 0 : index
    %c0_9 = arith.constant 0 : index
    %19 = vector.load %arg3[%c0_8, %c0_9] : memref<1x128xf32, #tpu.memory_space<vmem>>, vector<1x128xf32>
    %20 = arith.mulf %16, %19 : vector<1x128xf32>
    %21 = vector.broadcast %20 : vector<1x128xf32> to vector<8x128xf32>
    %22 = arith.mulf %18, %21 : vector<8x128xf32>
    %c0_10 = arith.constant 0 : index
    %c0_11 = arith.constant 0 : index
    %23 = vector.load %arg4[%c0_10, %c0_11] : memref<1x128xf32, #tpu.memory_space<vmem>>, vector<1x128xf32>
    %24 = vector.broadcast %23 : vector<1x128xf32> to vector<8x128xf32>
    %25 = arith.addf %22, %24 : vector<8x128xf32>
    %cst_12 = arith.constant 0.000000e+00 : f32
    %26 = vector.broadcast %cst_12 : f32 to vector<8x128xf32>
    %27 = arith.maximumf %25, %26 : vector<8x128xf32>
    %28 = arith.truncf %27 : vector<8x128xf32> to vector<8x128xbf16>
    %c0_13 = arith.constant 0 : index
    %c0_14 = arith.constant 0 : index
    %29 = vector.load %arg5[%c0_13, %c0_14] : memref<8x128xbf16, #tpu.memory_space<vmem>>, vector<8x128xbf16>
    tpu.vector_store %arg5[%c0_13, %c0_14], %28 {strides = array<i32>} : memref<8x128xbf16, #tpu.memory_space<vmem>>, vector<8x128xbf16>,
    return
  }
  func.func @transform_0(%arg0: i32) -> (i32, i32) {
    %c0_i32 = arith.constant 0 : i32
    %c0_i32_0 = arith.constant 0 : i32
    %c0_i32_1 = arith.constant 0 : i32
    return %c0_i32, %c0_i32_0 : i32, i32
  }
  func.func @transform_1(%arg0: i32) -> (i32, i32) {
    %c0_i32 = arith.constant 0 : i32
    %c0_i32_0 = arith.constant 0 : i32
    return %c0_i32, %arg0 : i32, i32
  }
  func.func @transform_2(%arg0: i32) -> (i32, i32) {
    %c0_i32 = arith.constant 0 : i32
    %c0_i32_0 = arith.constant 0 : i32
    return %c0_i32, %arg0 : i32, i32
  }
  func.func @transform_3(%arg0: i32) -> (i32, i32) {
    %c0_i32 = arith.constant 0 : i32
    %c0_i32_0 = arith.constant 0 : i32
    return %c0_i32, %arg0 : i32, i32
  }
  func.func @transform_4(%arg0: i32) -> (i32, i32) {
    %c0_i32 = arith.constant 0 : i32
    %c0_i32_0 = arith.constant 0 : i32
    return %c0_i32, %arg0 : i32, i32
  }
}

module attributes {stable_mosaic.version = 11 : i64} {
  func.func @_conv_bn_kernel(%arg0: i32, %arg1: memref<8x256xbf16, #tpu.memory_space<vmem>>, %arg2: memref<256x128xbf16, #tpu.memory_space<vmem>>, %arg3: memref<1x128xf32, #tpu.memory_space<vmem>>, %arg4: memref<1x128xf32, #tpu.memory_space<vmem>>, %arg5: memref<8x128xbf16, #tpu.memory_space<vmem>>) attributes {dimension_semantics = [#tpu.dimension_semantics<parallel>], iteration_bounds = array<i64: 4>, scalar_prefetch = 0 : i64, scratch_operands = 0 : i64, tpu.core_type = #tpu.core_type<tc>, window_params = [{pipeline_mode = #tpu.pipeline_mode<synchronous>, transform_indices = @transform_0, window_bounds = array<i64: 8, 256>}, {transform_indices = @transform_1, window_bounds = array<i64: 256, 128>}, {transform_indices = @transform_2, window_bounds = array<i64: 1, 128>}, {transform_indices = @transform_3, window_bounds = array<i64: 1, 128>}, {transform_indices = @transform_4, window_bounds = array<i64: 8, 128>}]} {
    %c0 = arith.constant 0 : index
    %c0_0 = arith.constant 0 : index
    %0 = vector.load %arg1[%c0, %c0_0] : memref<8x256xbf16, #tpu.memory_space<vmem>>, vector<8x256xbf16>
    %c0_1 = arith.constant 0 : index
    %c0_2 = arith.constant 0 : index
    %1 = vector.load %arg2[%c0_1, %c0_2] : memref<256x128xbf16, #tpu.memory_space<vmem>>, vector<256x128xbf16>
    %cst = arith.constant dense<0.000000e+00> : vector<8x128xf32>
    %2 = tpu.matmul %0, %1, %cst {dimension_numbers = #tpu.dot_dimension_numbers<[1], [0], [0], [1], [0, 0, 1, 1], [], []>} : vector<8x256xbf16>, vector<256x128xbf16>, vector<8x128xf32> -> vector<8x128xf32>
    %cst_3 = arith.constant dense<0.000000e+00> : vector<128xf32>
    %3 = vector.multi_reduction <add>, %2, %cst_3 [0] : vector<8x128xf32> to vector<128xf32>
    %4 = vector.shape_cast %3 : vector<128xf32> to vector<1x128xf32>
    %cst_4 = arith.constant 1.250000e-01 : f32
    %5 = vector.broadcast %cst_4 : f32 to vector<1x128xf32>
    %6 = arith.mulf %4, %5 : vector<1x128xf32>
    %7 = vector.broadcast %6 : vector<1x128xf32> to vector<8x128xf32>
    %8 = arith.subf %2, %7 : vector<8x128xf32>
    %9 = arith.mulf %8, %8 : vector<8x128xf32>
    %cst_5 = arith.constant dense<0.000000e+00> : vector<128xf32>
    %10 = vector.multi_reduction <add>, %9, %cst_5 [0] : vector<8x128xf32> to vector<128xf32>
    %11 = vector.shape_cast %10 : vector<128xf32> to vector<1x128xf32>
    %cst_6 = arith.constant 1.250000e-01 : f32
    %12 = vector.broadcast %cst_6 : f32 to vector<1x128xf32>
    %13 = arith.mulf %11, %12 : vector<1x128xf32>
    %cst_7 = arith.constant 9.99999974E-6 : f32
    %14 = vector.broadcast %cst_7 : f32 to vector<1x128xf32>
    %15 = arith.addf %13, %14 : vector<1x128xf32>
    %16 = math.rsqrt %15 : vector<1x128xf32>
    %17 = vector.broadcast %6 : vector<1x128xf32> to vector<8x128xf32>
    %18 = arith.subf %2, %17 : vector<8x128xf32>
    %c0_8 = arith.constant 0 : index
    %c0_9 = arith.constant 0 : index
    %19 = vector.load %arg3[%c0_8, %c0_9] : memref<1x128xf32, #tpu.memory_space<vmem>>, vector<1x128xf32>
    %20 = arith.mulf %16, %19 : vector<1x128xf32>
    %21 = vector.broadcast %20 : vector<1x128xf32> to vector<8x128xf32>
    %22 = arith.mulf %18, %21 : vector<8x128xf32>
    %c0_10 = arith.constant 0 : index
    %c0_11 = arith.constant 0 : index
    %23 = vector.load %arg4[%c0_10, %c0_11] : memref<1x128xf32, #tpu.memory_space<vmem>>, vector<1x128xf32>
    %24 = vector.broadcast %23 : vector<1x128xf32> to vector<8x128xf32>
    %25 = arith.addf %22, %24 : vector<8x128xf32>
    %26 = arith.truncf %25 : vector<8x128xf32> to vector<8x128xbf16>
    %c0_12 = arith.constant 0 : index
    %c0_13 = arith.constant 0 : index
    %27 = vector.load %arg5[%c0_12, %c0_13] : memref<8x128xbf16, #tpu.memory_space<vmem>>, vector<8x128xbf16>
    tpu.vector_store %arg5[%c0_12, %c0_13], %26 {strides = array<i32>} : memref<8x128xbf16, #tpu.memory_space<vmem>>, vector<8x128xbf16>,
    return
  }
  func.func @transform_0(%arg0: i32) -> (i32, i32) {
    %c0_i32 = arith.constant 0 : i32
    %c0_i32_0 = arith.constant 0 : i32
    %c0_i32_1 = arith.constant 0 : i32
    return %c0_i32, %c0_i32_0 : i32, i32
  }
  func.func @transform_1(%arg0: i32) -> (i32, i32) {
    %c0_i32 = arith.constant 0 : i32
    %c0_i32_0 = arith.constant 0 : i32
    return %c0_i32, %arg0 : i32, i32
  }
  func.func @transform_2(%arg0: i32) -> (i32, i32) {
    %c0_i32 = arith.constant 0 : i32
    %c0_i32_0 = arith.constant 0 : i32
    return %c0_i32, %arg0 : i32, i32
  }
  func.func @transform_3(%arg0: i32) -> (i32, i32) {
    %c0_i32 = arith.constant 0 : i32
    %c0_i32_0 = arith.constant 0 : i32
    return %c0_i32, %arg0 : i32, i32
  }
  func.func @transform_4(%arg0: i32) -> (i32, i32) {
    %c0_i32 = arith.constant 0 : i32
    %c0_i32_0 = arith.constant 0 : i32
    return %c0_i32, %arg0 : i32, i32
  }
}

module attributes {stable_mosaic.version = 11 : i64} {
  func.func @_conv_bn_kernel(%arg0: i32, %arg1: memref<8x128xbf16, #tpu.memory_space<vmem>>, %arg2: memref<128x128xbf16, #tpu.memory_space<vmem>>, %arg3: memref<1x128xf32, #tpu.memory_space<vmem>>, %arg4: memref<1x128xf32, #tpu.memory_space<vmem>>, %arg5: memref<8x128xbf16, #tpu.memory_space<vmem>>, %arg6: memref<8x128xbf16, #tpu.memory_space<vmem>>) attributes {dimension_semantics = [#tpu.dimension_semantics<parallel>], iteration_bounds = array<i64: 4>, scalar_prefetch = 0 : i64, scratch_operands = 0 : i64, tpu.core_type = #tpu.core_type<tc>, window_params = [{pipeline_mode = #tpu.pipeline_mode<synchronous>, transform_indices = @transform_0, window_bounds = array<i64: 8, 128>}, {transform_indices = @transform_1, window_bounds = array<i64: 128, 128>}, {transform_indices = @transform_2, window_bounds = array<i64: 1, 128>}, {transform_indices = @transform_3, window_bounds = array<i64: 1, 128>}, {transform_indices = @transform_4, window_bounds = array<i64: 8, 128>}, {transform_indices = @transform_5, window_bounds = array<i64: 8, 128>}]} {
    %c0 = arith.constant 0 : index
    %c0_0 = arith.constant 0 : index
    %0 = vector.load %arg1[%c0, %c0_0] : memref<8x128xbf16, #tpu.memory_space<vmem>>, vector<8x128xbf16>
    %c0_1 = arith.constant 0 : index
    %c0_2 = arith.constant 0 : index
    %1 = vector.load %arg2[%c0_1, %c0_2] : memref<128x128xbf16, #tpu.memory_space<vmem>>, vector<128x128xbf16>
    %cst = arith.constant dense<0.000000e+00> : vector<8x128xf32>
    %2 = tpu.matmul %0, %1, %cst {dimension_numbers = #tpu.dot_dimension_numbers<[1], [0], [0], [1], [0, 0, 1, 1], [], []>} : vector<8x128xbf16>, vector<128x128xbf16>, vector<8x128xf32> -> vector<8x128xf32>
    %cst_3 = arith.constant dense<0.000000e+00> : vector<128xf32>
    %3 = vector.multi_reduction <add>, %2, %cst_3 [0] : vector<8x128xf32> to vector<128xf32>
    %4 = vector.shape_cast %3 : vector<128xf32> to vector<1x128xf32>
    %cst_4 = arith.constant 1.250000e-01 : f32
    %5 = vector.broadcast %cst_4 : f32 to vector<1x128xf32>
    %6 = arith.mulf %4, %5 : vector<1x128xf32>
    %7 = vector.broadcast %6 : vector<1x128xf32> to vector<8x128xf32>
    %8 = arith.subf %2, %7 : vector<8x128xf32>
    %9 = arith.mulf %8, %8 : vector<8x128xf32>
    %cst_5 = arith.constant dense<0.000000e+00> : vector<128xf32>
    %10 = vector.multi_reduction <add>, %9, %cst_5 [0] : vector<8x128xf32> to vector<128xf32>
    %11 = vector.shape_cast %10 : vector<128xf32> to vector<1x128xf32>
    %cst_6 = arith.constant 1.250000e-01 : f32
    %12 = vector.broadcast %cst_6 : f32 to vector<1x128xf32>
    %13 = arith.mulf %11, %12 : vector<1x128xf32>
    %cst_7 = arith.constant 9.99999974E-6 : f32
    %14 = vector.broadcast %cst_7 : f32 to vector<1x128xf32>
    %15 = arith.addf %13, %14 : vector<1x128xf32>
    %16 = math.rsqrt %15 : vector<1x128xf32>
    %17 = vector.broadcast %6 : vector<1x128xf32> to vector<8x128xf32>
    %18 = arith.subf %2, %17 : vector<8x128xf32>
    %c0_8 = arith.constant 0 : index
    %c0_9 = arith.constant 0 : index
    %19 = vector.load %arg3[%c0_8, %c0_9] : memref<1x128xf32, #tpu.memory_space<vmem>>, vector<1x128xf32>
    %20 = arith.mulf %16, %19 : vector<1x128xf32>
    %21 = vector.broadcast %20 : vector<1x128xf32> to vector<8x128xf32>
    %22 = arith.mulf %18, %21 : vector<8x128xf32>
    %c0_10 = arith.constant 0 : index
    %c0_11 = arith.constant 0 : index
    %23 = vector.load %arg4[%c0_10, %c0_11] : memref<1x128xf32, #tpu.memory_space<vmem>>, vector<1x128xf32>
    %24 = vector.broadcast %23 : vector<1x128xf32> to vector<8x128xf32>
    %25 = arith.addf %22, %24 : vector<8x128xf32>
    %c0_12 = arith.constant 0 : index
    %c0_13 = arith.constant 0 : index
    %26 = vector.load %arg5[%c0_12, %c0_13] : memref<8x128xbf16, #tpu.memory_space<vmem>>, vector<8x128xbf16>
    %27 = arith.extf %26 : vector<8x128xbf16> to vector<8x128xf32>
    %28 = arith.addf %25, %27 : vector<8x128xf32>
    %cst_14 = arith.constant 0.000000e+00 : f32
    %29 = vector.broadcast %cst_14 : f32 to vector<8x128xf32>
    %30 = arith.maximumf %28, %29 : vector<8x128xf32>
    %31 = arith.truncf %30 : vector<8x128xf32> to vector<8x128xbf16>
    %c0_15 = arith.constant 0 : index
    %c0_16 = arith.constant 0 : index
    %32 = vector.load %arg6[%c0_15, %c0_16] : memref<8x128xbf16, #tpu.memory_space<vmem>>, vector<8x128xbf16>
    tpu.vector_store %arg6[%c0_15, %c0_16], %31 {strides = array<i32>} : memref<8x128xbf16, #tpu.memory_space<vmem>>, vector<8x128xbf16>,
    return
  }
  func.func @transform_0(%arg0: i32) -> (i32, i32) {
    %c0_i32 = arith.constant 0 : i32
    %c0_i32_0 = arith.constant 0 : i32
    %c0_i32_1 = arith.constant 0 : i32
    return %c0_i32, %c0_i32_0 : i32, i32
  }
  func.func @transform_1(%arg0: i32) -> (i32, i32) {
    %c0_i32 = arith.constant 0 : i32
    %c0_i32_0 = arith.constant 0 : i32
    return %c0_i32, %arg0 : i32, i32
  }
  func.func @transform_2(%arg0: i32) -> (i32, i32) {
    %c0_i32 = arith.constant 0 : i32
    %c0_i32_0 = arith.constant 0 : i32
    return %c0_i32, %arg0 : i32, i32
  }
  func.func @transform_3(%arg0: i32) -> (i32, i32) {
    %c0_i32 = arith.constant 0 : i32
    %c0_i32_0 = arith.constant 0 : i32
    return %c0_i32, %arg0 : i32, i32
  }
  func.func @transform_4(%arg0: i32) -> (i32, i32) {
    %c0_i32 = arith.constant 0 : i32
    %c0_i32_0 = arith.constant 0 : i32
    return %c0_i32, %arg0 : i32, i32
  }
  func.func @transform_5(%arg0: i32) -> (i32, i32) {
    %c0_i32 = arith.constant 0 : i32
    %c0_i32_0 = arith.constant 0 : i32
    return %c0_i32, %arg0 : i32, i32
  }
}

module attributes {stable_mosaic.version = 11 : i64} {
  func.func @_conv_bn_kernel(%arg0: i32, %arg1: memref<8x512xbf16, #tpu.memory_space<vmem>>, %arg2: memref<512x128xbf16, #tpu.memory_space<vmem>>, %arg3: memref<1x128xf32, #tpu.memory_space<vmem>>, %arg4: memref<1x128xf32, #tpu.memory_space<vmem>>, %arg5: memref<8x128xbf16, #tpu.memory_space<vmem>>) attributes {dimension_semantics = [#tpu.dimension_semantics<parallel>], iteration_bounds = array<i64: 1>, scalar_prefetch = 0 : i64, scratch_operands = 0 : i64, tpu.core_type = #tpu.core_type<tc>, window_params = [{pipeline_mode = #tpu.pipeline_mode<synchronous>, transform_indices = @transform_0, window_bounds = array<i64: 8, 512>}, {transform_indices = @transform_1, window_bounds = array<i64: 512, 128>}, {transform_indices = @transform_2, window_bounds = array<i64: 1, 128>}, {transform_indices = @transform_3, window_bounds = array<i64: 1, 128>}, {transform_indices = @transform_4, window_bounds = array<i64: 8, 128>}]} {
    %c0 = arith.constant 0 : index
    %c0_0 = arith.constant 0 : index
    %0 = vector.load %arg1[%c0, %c0_0] : memref<8x512xbf16, #tpu.memory_space<vmem>>, vector<8x512xbf16>
    %c0_1 = arith.constant 0 : index
    %c0_2 = arith.constant 0 : index
    %1 = vector.load %arg2[%c0_1, %c0_2] : memref<512x128xbf16, #tpu.memory_space<vmem>>, vector<512x128xbf16>
    %cst = arith.constant dense<0.000000e+00> : vector<8x128xf32>
    %2 = tpu.matmul %0, %1, %cst {dimension_numbers = #tpu.dot_dimension_numbers<[1], [0], [0], [1], [0, 0, 1, 1], [], []>} : vector<8x512xbf16>, vector<512x128xbf16>, vector<8x128xf32> -> vector<8x128xf32>
    %cst_3 = arith.constant dense<0.000000e+00> : vector<128xf32>
    %3 = vector.multi_reduction <add>, %2, %cst_3 [0] : vector<8x128xf32> to vector<128xf32>
    %4 = vector.shape_cast %3 : vector<128xf32> to vector<1x128xf32>
    %cst_4 = arith.constant 1.250000e-01 : f32
    %5 = vector.broadcast %cst_4 : f32 to vector<1x128xf32>
    %6 = arith.mulf %4, %5 : vector<1x128xf32>
    %7 = vector.broadcast %6 : vector<1x128xf32> to vector<8x128xf32>
    %8 = arith.subf %2, %7 : vector<8x128xf32>
    %9 = arith.mulf %8, %8 : vector<8x128xf32>
    %cst_5 = arith.constant dense<0.000000e+00> : vector<128xf32>
    %10 = vector.multi_reduction <add>, %9, %cst_5 [0] : vector<8x128xf32> to vector<128xf32>
    %11 = vector.shape_cast %10 : vector<128xf32> to vector<1x128xf32>
    %cst_6 = arith.constant 1.250000e-01 : f32
    %12 = vector.broadcast %cst_6 : f32 to vector<1x128xf32>
    %13 = arith.mulf %11, %12 : vector<1x128xf32>
    %cst_7 = arith.constant 9.99999974E-6 : f32
    %14 = vector.broadcast %cst_7 : f32 to vector<1x128xf32>
    %15 = arith.addf %13, %14 : vector<1x128xf32>
    %16 = math.rsqrt %15 : vector<1x128xf32>
    %17 = vector.broadcast %6 : vector<1x128xf32> to vector<8x128xf32>
    %18 = arith.subf %2, %17 : vector<8x128xf32>
    %c0_8 = arith.constant 0 : index
    %c0_9 = arith.constant 0 : index
    %19 = vector.load %arg3[%c0_8, %c0_9] : memref<1x128xf32, #tpu.memory_space<vmem>>, vector<1x128xf32>
    %20 = arith.mulf %16, %19 : vector<1x128xf32>
    %21 = vector.broadcast %20 : vector<1x128xf32> to vector<8x128xf32>
    %22 = arith.mulf %18, %21 : vector<8x128xf32>
    %c0_10 = arith.constant 0 : index
    %c0_11 = arith.constant 0 : index
    %23 = vector.load %arg4[%c0_10, %c0_11] : memref<1x128xf32, #tpu.memory_space<vmem>>, vector<1x128xf32>
    %24 = vector.broadcast %23 : vector<1x128xf32> to vector<8x128xf32>
    %25 = arith.addf %22, %24 : vector<8x128xf32>
    %cst_12 = arith.constant 0.000000e+00 : f32
    %26 = vector.broadcast %cst_12 : f32 to vector<8x128xf32>
    %27 = arith.maximumf %25, %26 : vector<8x128xf32>
    %28 = arith.truncf %27 : vector<8x128xf32> to vector<8x128xbf16>
    %c0_13 = arith.constant 0 : index
    %c0_14 = arith.constant 0 : index
    %29 = vector.load %arg5[%c0_13, %c0_14] : memref<8x128xbf16, #tpu.memory_space<vmem>>, vector<8x128xbf16>
    tpu.vector_store %arg5[%c0_13, %c0_14], %28 {strides = array<i32>} : memref<8x128xbf16, #tpu.memory_space<vmem>>, vector<8x128xbf16>,
    return
  }
  func.func @transform_0(%arg0: i32) -> (i32, i32) {
    %c0_i32 = arith.constant 0 : i32
    %c0_i32_0 = arith.constant 0 : i32
    %c0_i32_1 = arith.constant 0 : i32
    return %c0_i32, %c0_i32_0 : i32, i32
  }
  func.func @transform_1(%arg0: i32) -> (i32, i32) {
    %c0_i32 = arith.constant 0 : i32
    %c0_i32_0 = arith.constant 0 : i32
    return %c0_i32, %arg0 : i32, i32
  }
  func.func @transform_2(%arg0: i32) -> (i32, i32) {
    %c0_i32 = arith.constant 0 : i32
    %c0_i32_0 = arith.constant 0 : i32
    return %c0_i32, %arg0 : i32, i32
  }
  func.func @transform_3(%arg0: i32) -> (i32, i32) {
    %c0_i32 = arith.constant 0 : i32
    %c0_i32_0 = arith.constant 0 : i32
    return %c0_i32, %arg0 : i32, i32
  }
  func.func @transform_4(%arg0: i32) -> (i32, i32) {
    %c0_i32 = arith.constant 0 : i32
    %c0_i32_0 = arith.constant 0 : i32
    return %c0_i32, %arg0 : i32, i32
  }
}

</mosaic_0001>

<bundles_post_ra>
// kernel: _lambda_.26
= control target key start
LH: loop header
LB: loop body
LE: loop exit
PB: predicated region body
PF: predicated region fallthrough
CT: control target
= control target key end

     0   :  { %s285_s0 = inlined_call_operand.vmem [shape: bf16[32,128], index: 0, kind: input, shape index: {}]   ;;  %s286_s1 = inlined_call_operand.vmem [shape: bf16[32,128], index: 1, kind: input, shape index: {}]   ;;  %s287_s2 = inlined_call_operand.vmem [shape: bf16[32,128], index: 2, kind: input, shape index: {}]   ;;  %s288_s3 = inlined_call_operand.vmem [shape: bf16[32,128], index: 3, kind: input, shape index: {}]   ;;  %s289_s4 = inlined_call_operand.vmem [shape: bf16[32,128], index: 4, kind: input, shape index: {}]   ;;  %s290_s5 = inlined_call_operand.vmem [shape: bf16[32,128], index: 5, kind: input, shape index: {}]   ;;  %s291_s6 = inlined_call_operand.vmem [shape: bf16[32,128], index: 6, kind: input, shape index: {}]   ;;  %s292_s7 = inlined_call_operand.vmem [shape: bf16[32,128], index: 7, kind: input, shape index: {}]   ;;  %s293_s8 = inlined_call_operand.vmem [shape: bf16[32,128], index: 8, kind: input, shape index: {}]   ;;  %s294_s9 = inlined_call_operand.vmem [shape: bf16[32,128], index: 9, kind: output, shape index: {}]  }
   0x1   :  { %v32_v0 = vld [vmem:[%s285_s0] sm:$0xf]  ;;  %v33_v1 = vld [vmem:[%s285_s0 + $0x4] sm:$0xf]  ;;  %v34_v18 = vld [vmem:[%s285_s0 + $0x8] sm:$0xf] }
   0x2   :  { %v36_v2 = vld [vmem:[%s286_s1] sm:$0xf]  ;;  %v37_v3 = vld [vmem:[%s286_s1 + $0x4] sm:$0xf]  ;;  %v35_v19 = vld [vmem:[%s285_s0 + $0xc] sm:$0xf] }
   0x3   :  { %v40_v4 = vmax.bf16 %v36_v2, %v32_v0  ;;  %v44_v5 = vld [vmem:[%s287_s2] sm:$0xf]  ;;  %v45_v6 = vld [vmem:[%s287_s2 + $0x4] sm:$0xf]  ;;  %v41_v7 = vmax.bf16 %v37_v3, %v33_v1  ;;  %v38_v20 = vld [vmem:[%s286_s1 + $0x8] sm:$0xf] }
   0x4   :  { %v52_v8 = vld [vmem:[%s288_s3] sm:$0xf]  ;;  %v53_v10 = vld [vmem:[%s288_s3 + $0x4] sm:$0xf]  ;;  %v39_v22 = vld [vmem:[%s286_s1 + $0xc] sm:$0xf]  ;;  %v42_v23 = vmax.bf16 %v38_v20, %v34_v18 }
   0x5   :  { %v48_v9 = vmax.bf16 %v44_v5, %v40_v4  ;;  %v49_v11 = vmax.bf16 %v45_v6, %v41_v7  ;;  %v60_v12 = vld [vmem:[%s289_s4] sm:$0xf]  ;;  %v61_v14 = vld [vmem:[%s289_s4 + $0x4] sm:$0xf]  ;;  %v46_v24 = vld [vmem:[%s287_s2 + $0x8] sm:$0xf]  ;;  %v43_v28 = vmax.bf16 %v39_v22, %v35_v19 }
   0x6   :  { %v68_v15 = vld [vmem:[%s290_s5] sm:$0xf]  ;;  %v69_v16 = vld [vmem:[%s290_s5 + $0x4] sm:$0xf]  ;;  %v47_v25 = vld [vmem:[%s287_s2 + $0xc] sm:$0xf]  ;;  %v50_v32 = vmax.bf16 %v46_v24, %v42_v23 }
   0x7   :  { %v56_v13 = vmax.bf16 %v52_v8, %v48_v9  ;;  %v57_v17 = vmax.bf16 %v53_v10, %v49_v11  ;;  %v76_v27 = vld [vmem:[%s291_s6] sm:$0xf]  ;;  %v54_v29 = vld [vmem:[%s288_s3 + $0x8] sm:$0xf]  ;;  %v77_v31 = vld [vmem:[%s291_s6 + $0x4] sm:$0xf]  ;;  %v51_v36 = vmax.bf16 %v47_v25, %v43_v28 }
   0x8   :  { %v55_v33 = vld [vmem:[%s288_s3 + $0xc] sm:$0xf]  ;;  %v84_v35 = vld [vmem:[%s292_s7] sm:$0xf]  ;;  %v62_v37 = vld [vmem:[%s289_s4 + $0x8] sm:$0xf]  ;;  %v58_v40 = vmax.bf16 %v54_v29, %v50_v32 }
   0x9   :  { %v64_v21 = vmax.bf16 %v60_v12, %v56_v13  ;;  %v65_v26 = vmax.bf16 %v61_v14, %v57_v17  ;;  %v85_v39 = vld [vmem:[%s292_s7 + $0x4] sm:$0xf]  ;;  %v63_v41 = vld [vmem:[%s289_s4 + $0xc] sm:$0xf]  ;;  %v92_v43 = vld [vmem:[%s293_s8] sm:$0xf]  ;;  %v59_v44 = vmax.bf16 %v55_v33, %v51_v36 }
   0xa   :  { %v70_v45 = vld [vmem:[%s290_s5 + $0x8] sm:$0xf]  ;;  %v93_v47 = vld [vmem:[%s293_s8 + $0x4] sm:$0xf]  ;;  %v66_v48 = vmax.bf16 %v62_v37, %v58_v40  ;;  %v71_v49 = vld [vmem:[%s290_s5 + $0xc] sm:$0xf] }
   0xb   :  { %v72_v30 = vmax.bf16 %v68_v15, %v64_v21  ;;  %v73_v34 = vmax.bf16 %v69_v16, %v65_v26  ;;  %v67_v51 = vmax.bf16 %v63_v41, %v59_v44  ;;  %v78_v52 = vld [vmem:[%s291_s6 + $0x8] sm:$0xf]  ;;  %v79_v55 = vld [vmem:[%s291_s6 + $0xc] sm:$0xf] }
   0xc   :  { %v74_v54 = vmax.bf16 %v70_v45, %v66_v48  ;;  %v86_v58 = vld [vmem:[%s292_s7 + $0x8] sm:$0xf]  ;;  %v87_v60 = vld [vmem:[%s292_s7 + $0xc] sm:$0xf] }
   0xd   :  { %v80_v38 = vmax.bf16 %v76_v27, %v72_v30  ;;  %v81_v42 = vmax.bf16 %v77_v31, %v73_v34  ;;  %v75_v57 = vmax.bf16 %v71_v49, %v67_v51  ;;  %v94_v63 = vld [vmem:[%s293_s8 + $0x8] sm:$0xf]  ;;  %v95_v1 = vld [vmem:[%s293_s8 + $0xc] sm:$0xf] }
   0xe   :  { %v82_v59 = vmax.bf16 %v78_v52, %v74_v54 }
   0xf   :  { %v88_v46 = vmax.bf16 %v84_v35, %v80_v38  ;;  %v89_v50 = vmax.bf16 %v85_v39, %v81_v42  ;;  %v83_v62 = vmax.bf16 %v79_v55, %v75_v57 }
  0x10   :  { %v90_v0 = vmax.bf16 %v86_v58, %v82_v59 }
  0x11   :  { %v96_v53 = vmax.bf16 %v92_v43, %v88_v46  ;;  %v97_v56 = vmax.bf16 %v93_v47, %v89_v50  ;;  %v91_v2 = vmax.bf16 %v87_v60, %v83_v62 }
  0x12   :  { %v98_v3 = vmax.bf16 %v94_v63, %v90_v0 }
  0x13   :  { %v118_v61 = vcombine.low %v96_v53, %v97_v56  ;;  %v99_v4 = vmax.bf16 %v95_v1, %v91_v2 }
  0x15   :  { %112 = vst [vmem:[%s294_s9] sm:$0xff] %v118_v61   ;;  %v119_v5 = vcombine.low %v98_v3, %v99_v4 }
  0x17   :  { %120 = vst [vmem:[%s294_s9 + $0x8] sm:$0xff] %v119_v5  }

// kernel: _lambda_.25
= control target key start
LH: loop header
LB: loop body
LE: loop exit
PB: predicated region body
PF: predicated region fallthrough
CT: control target
= control target key end

     0   :  { %s972_s1 = inlined_call_operand.vmem [shape: bf16[256,128], index: 1, kind: input, shape index: {}]   ;;  %s973_s0 = inlined_call_operand.vmem [shape: bf16[128,256], index: 0, kind: input, shape index: {}]   ;;  %s974_s2 = inlined_call_operand.vmem [shape: f32[1,128], index: 2, kind: input, shape index: {}]   ;;  %s975_s3 = inlined_call_operand.vmem [shape: f32[1,128], index: 3, kind: input, shape index: {}]   ;;  %s976_s4 = inlined_call_operand.vmem [shape: bf16[128,128], index: 4, kind: output, shape index: {}]  }
   0x1   :  { %v754_v0 = vld [vmem:[%s972_s1 + $0x78] sm:$0xff]   ;;  %v756_v2 = vld [vmem:[%s972_s1 + $0x70] sm:$0xff]   ;;  %v758_v4 = vld [vmem:[%s972_s1 + $0x68] sm:$0xff]  }
   0x2   :  { %v755_v1 = vld [vmem:[%s972_s1 + $0x38] sm:$0xff]   ;;  %674 = vmatprep.subr.bf16.mxu0 %v754_v0  ;;  %738 = vmatprep.subr.bf16.mxu1 %v754_v0  ;;  %v757_v3 = vld [vmem:[%s972_s1 + $0x30] sm:$0xff]   ;;  %v759_v5 = vld [vmem:[%s972_s1 + $0x28] sm:$0xff]  }
   0x3   :  { %675 = vmatpush3.bf16.msra.mxu0 %v755_v1  ;;  %746 = vmatpush3.bf16.msra.mxu1 %v755_v1  ;;  %v760_v6 = vld [vmem:[%s972_s1 + $0x60] sm:$0xff]   ;;  %v762_v8 = vld [vmem:[%s972_s1 + $0x58] sm:$0xff]   ;;  %v764_v10 = vld [vmem:[%s972_s1 + $0x50] sm:$0xff]  }
   0x4   :  { %676 = vmatprep.subr.bf16.mxu0 %v756_v2  ;;  %739 = vmatprep.subr.bf16.mxu1 %v756_v2  ;;  %v761_v7 = vld [vmem:[%s972_s1 + $0x20] sm:$0xff]   ;;  %v763_v9 = vld [vmem:[%s972_s1 + $0x18] sm:$0xff]   ;;  %v765_v12 = vld [vmem:[%s972_s1 + $0x10] sm:$0xff]  }
   0x5   :  { %v772_v11 = vld [vmem:[%s973_s0 + $0x4] ss:$8 sps:$4 sm:$0xff]   ;;  %v770_v18 = vld [vmem:[%s973_s0] ss:$8 sps:$4 sm:$0xff]   ;;  %v773_v20 = vld [vmem:[%s973_s0 + $0x14] ss:$8 sps:$4 sm:$0xff]  }
   0x6   :  { %v778_v13 = vld [vmem:[%s973_s0 + $0x44] ss:$8 sps:$4 sm:$0xff]   ;;  %274 = vmatprep.mubr.bf16.mxu0 %v772_v11  ;;  %v776_v19 = vld [vmem:[%s973_s0 + $0x40] ss:$8 sps:$4 sm:$0xff]   ;;  %v782_v21 = vld [vmem:[%s973_s0 + $0x54] ss:$8 sps:$4 sm:$0xff]  }
   0x7   :  { %677 = vmatpush3.bf16.msra.mxu0 %v757_v3  ;;  %747 = vmatpush3.bf16.msra.mxu1 %v757_v3  ;;  %v766_v14 = vld [vmem:[%s972_s1 + $0x48] sm:$0xff]   ;;  %v768_v16 = vld [vmem:[%s972_s1 + $0x40] sm:$0xff]   ;;  %v775_v22 = vld [vmem:[%s973_s0 + $0x10] ss:$8 sps:$4 sm:$0xff]  }
   0x8   :  { %678 = vmatprep.subr.bf16.mxu0 %v758_v4  ;;  %740 = vmatprep.subr.bf16.mxu1 %v758_v4  ;;  %v767_v15 = vld [vmem:[%s972_s1 + $0x8] sm:$0xff]   ;;  %v769_v17 = vld [vmem:[%s972_s1] sm:$0xff]   ;;  %v784_v23 = vld [vmem:[%s973_s0 + $0x50] ss:$8 sps:$4 sm:$0xff]  }
   0x9   :  { %306 = vmatprep.mubr.bf16.mxu1 %v778_v13  ;;  %v779_v24 = vld [vmem:[%s973_s0 + $0x24] ss:$8 sps:$4 sm:$0xff]   ;;  %v781_v26 = vld [vmem:[%s973_s0 + $0x20] ss:$8 sps:$4 sm:$0xff]   ;;  %v785_v28 = vld [vmem:[%s973_s0 + $0x34] ss:$8 sps:$4 sm:$0xff]  }
   0xa   :  { %v788_v25 = vld [vmem:[%s973_s0 + $0x64] ss:$8 sps:$4 sm:$0xff]   ;;  %v790_v27 = vld [vmem:[%s973_s0 + $0x60] ss:$8 sps:$4 sm:$0xff]   ;;  %v791_v29 = vld [vmem:[%s973_s0 + $0x74] ss:$8 sps:$4 sm:$0xff]  }
   0xb   :  { %679 = vmatpush3.bf16.msra.mxu0 %v759_v5  ;;  %748 = vmatpush3.bf16.msra.mxu1 %v759_v5  ;;  %v787_v30 = vld [vmem:[%s973_s0 + $0x30] ss:$8 sps:$4 sm:$0xff]  }
   0xc   :  { %680 = vmatprep.subr.bf16.mxu0 %v760_v6  ;;  %741 = vmatprep.subr.bf16.mxu1 %v760_v6  ;;  %v793_v31 = vld [vmem:[%s973_s0 + $0x70] ss:$8 sps:$4 sm:$0xff]  }
   0xf   :  { %681 = vmatpush3.bf16.msra.mxu0 %v761_v7  ;;  %749 = vmatpush3.bf16.msra.mxu1 %v761_v7 }
  0x10   :  { %682 = vmatprep.subr.bf16.mxu0 %v762_v8  ;;  %742 = vmatprep.subr.bf16.mxu1 %v762_v8 }
  0x13   :  { %683 = vmatpush3.bf16.msra.mxu0 %v763_v9  ;;  %750 = vmatpush3.bf16.msra.mxu1 %v763_v9 }
  0x14   :  { %684 = vmatprep.subr.bf16.mxu0 %v764_v10  ;;  %743 = vmatprep.subr.bf16.mxu1 %v764_v10 }
  0x17   :  { %685 = vmatpush3.bf16.msra.mxu0 %v765_v12  ;;  %751 = vmatpush3.bf16.msra.mxu1 %v765_v12 }
  0x18   :  { %686 = vmatprep.subr.bf16.mxu0 %v766_v14  ;;  %744 = vmatprep.subr.bf16.mxu1 %v766_v14 }
  0x1b   :  { %687 = vmatpush3.bf16.msra.mxu0 %v767_v15  ;;  %752 = vmatpush3.bf16.msra.mxu1 %v767_v15 }
  0x1c   :  { %688 = vmatprep.subr.bf16.mxu0 %v768_v16  ;;  %745 = vmatprep.subr.bf16.mxu1 %v768_v16 }
  0x1f   :  { %689 = vmatpush3.bf16.msra.mxu0 %v769_v17  ;;  %753 = vmatpush3.bf16.msra.mxu1 %v769_v17 }
  0x22   :  { %275 = vmatmul.mubr.bf16.vlgmr.msra.gmra.mxu0 %v770_v18  ;;  %307 = vmatmul.mubr.bf16.vlgmr.msra.gmra.mxu1 %v776_v19 }
  0x23   :  { %282 = vmatprep.mubr.bf16.mxu0 %v773_v20  ;;  %314 = vmatprep.mubr.bf16.mxu1 %v782_v21 }
  0x2a   :  { %283 = vmatmul.mubr.bf16.gmra.mxu0 %v775_v22  ;;  %315 = vmatmul.mubr.bf16.gmra.mxu1 %v784_v23 }
  0x2b   :  { %290 = vmatprep.mubr.bf16.mxu0 %v779_v24  ;;  %322 = vmatprep.mubr.bf16.mxu1 %v788_v25 }
  0x32   :  { %291 = vmatmul.mubr.bf16.gmra.mxu0 %v781_v26  ;;  %323 = vmatmul.mubr.bf16.gmra.mxu1 %v790_v27 }
  0x33   :  { %298 = vmatprep.mubr.bf16.mxu0 %v785_v28  ;;  %330 = vmatprep.mubr.bf16.mxu1 %v791_v29 }
  0x3a   :  { %299 = vmatmul.mubr.bf16.gmra.mxu0 %v787_v30  ;;  %331 = vmatmul.mubr.bf16.gmra.mxu1 %v793_v31 }
  0xe2   :  { %v690_v32 = vpop.f32.mrf.mxu0  ;;  %v714_v33 = vpop.f32.mrf.mxu1 }
  0xe4   :  { %v691_v34 = vpop.f32.mrf.mxu0  ;;  %v715_v35 = vpop.f32.mrf.mxu1 }
  0xe5   :  { %v692_v52 = vadd.f32 %v691_v34, %v690_v32  ;;  %v716_v11 = vadd.f32 %v715_v35, %v714_v33 }
  0xe6   :  { %v693_v36 = vpop.f32.mrf.mxu0  ;;  %v717_v37 = vpop.f32.mrf.mxu1 }
  0xe8   :  { %v694_v38 = vpop.f32.mrf.mxu0  ;;  %v718_v39 = vpop.f32.mrf.mxu1 }
  0xe9   :  { %v695_v50 = vadd.f32 %v694_v38, %v693_v36  ;;  %v719_v13 = vadd.f32 %v718_v39, %v717_v37 }
  0xea   :  { %v696_v40 = vpop.f32.mrf.mxu0  ;;  %v720_v41 = vpop.f32.mrf.mxu1 }
  0xeb   :  { %v339_v56 = vadd.f32 %v695_v50, %v692_v52 }
  0xec   :  { %v697_v42 = vpop.f32.mrf.mxu0  ;;  %v721_v43 = vpop.f32.mrf.mxu1 }
  0xed   :  { %v698_v53 = vadd.f32 %v697_v42, %v696_v40  ;;  %v722_v16 = vadd.f32 %v721_v43, %v720_v41 }
  0xee   :  { %v699_v44 = vpop.f32.mrf.mxu0  ;;  %v723_v45 = vpop.f32.mrf.mxu1 }
  0xef   :  { %v340_v59 = vadd.f32 %v698_v53, %v339_v56 }
  0xf0   :  { %v700_v46 = vpop.f32.mrf.mxu0  ;;  %v724_v47 = vpop.f32.mrf.mxu1 }
  0xf1   :  { %v701_v57 = vadd.f32 %v700_v46, %v699_v44  ;;  %v725_v18 = vadd.f32 %v724_v47, %v723_v45 }
  0xf2   :  { %v702_v48 = vpop.f32.mrf.mxu0  ;;  %v726_v49 = vpop.f32.mrf.mxu1 }
  0xf3   :  { %v341_v63 = vadd.f32 %v701_v57, %v340_v59 }
  0xf4   :  { %v703_v51 = vpop.f32.mrf.mxu0  ;;  %v727_v55 = vpop.f32.mrf.mxu1 }
  0xf5   :  { %v704_v60 = vadd.f32 %v703_v51, %v702_v48  ;;  %v728_v21 = vadd.f32 %v727_v55, %v726_v49 }
  0xf6   :  { %v705_v54 = vpop.f32.mrf.mxu0  ;;  %v729_v62 = vpop.f32.mrf.mxu1 }
  0xf7   :  { %v342_v2 = vadd.f32 %v704_v60, %v341_v63 }
  0xf8   :  { %v706_v58 = vpop.f32.mrf.mxu0  ;;  %v730_v5 = vpop.f32.mrf.mxu1 }
  0xf9   :  { %v707_v0 = vadd.f32 %v706_v58, %v705_v54  ;;  %v731_v23 = vadd.f32 %v730_v5, %v729_v62 }
  0xfa   :  { %v708_v61 = vpop.f32.mrf.mxu0  ;;  %v732_v10 = vpop.f32.mrf.mxu1 }
  0xfb   :  { %v343_v6 = vadd.f32 %v707_v0, %v342_v2 }
  0xfc   :  { %v709_v1 = vpop.f32.mrf.mxu0  ;;  %v733_v15 = vpop.f32.mrf.mxu1 }
  0xfd   :  { %v710_v3 = vadd.f32 %v709_v1, %v708_v61  ;;  %v734_v27 = vadd.f32 %v733_v15, %v732_v10 }
  0xfe   :  { %v711_v4 = vpop.f32.mrf.mxu0  ;;  %v735_v20 = vpop.f32.mrf.mxu1 }
  0xff   :  { %v344_v8 = vadd.f32 %v710_v3, %v343_v6 }
 0x100   :  { %v712_v7 = vpop.f32.mrf.mxu0  ;;  %v736_v25 = vpop.f32.mrf.mxu1 }
 0x101   :  { %v713_v9 = vadd.f32 %v712_v7, %v711_v4  ;;  %v737_v29 = vadd.f32 %v736_v25, %v735_v20 }
 0x103   :  { %v345_v12 = vadd.f32 %v713_v9, %v344_v8 }
 0x105   :  { %v346_v14 = vadd.f32 %v716_v11, %v345_v12 }
 0x107   :  { %v347_v17 = vadd.f32 %v719_v13, %v346_v14 }
 0x109   :  { %v348_v19 = vadd.f32 %v722_v16, %v347_v17 }
 0x10b   :  { %v349_v22 = vadd.f32 %v725_v18, %v348_v19 }
 0x10d   :  { %v350_v24 = vadd.f32 %v728_v21, %v349_v22 }
 0x10f   :  { %v351_v26 = vadd.f32 %v731_v23, %v350_v24 }
 0x111   :  { %v352_v28 = vadd.f32 %v734_v27, %v351_v26 }
 0x113   :  { %v353_v30 = vadd.f32 %v737_v29, %v352_v28 }
 0x115   :  { %v354_v31 = vrot.slane %v353_v30, 4 }
 0x117   :  { %v355_v32 = vadd.f32 %v354_v31, %v353_v30 }
 0x119   :  { %v356_v33 = vrot.slane %v355_v32, 2 }
 0x11b   :  { %v357_v34 = vadd.f32 %v356_v33, %v355_v32 }
 0x11d   :  { %v358_v35 = vrot.slane %v357_v34, 1 }
 0x11f   :  { %v359_v36 = vadd.f32 %v358_v35, %v357_v34 }
 0x121   :  { %v360_v37 = vmul.f32 0.0078125, %v359_v36 }
 0x123   :  { %v917_v38 = vsub.f32 %v692_v52, %v360_v37  ;;  %v919_v39 = vsub.f32 %v695_v50, %v360_v37  ;;  %v921_v40 = vsub.f32 %v698_v53, %v360_v37  ;;  %v927_v43 = vsub.f32 %v701_v57, %v360_v37 }
 0x124   :  { %v929_v44 = vsub.f32 %v704_v60, %v360_v37  ;;  %v366_v47 = vsub.f32 %v707_v0, %v360_v37  ;;  %v367_v50 = vsub.f32 %v710_v3, %v360_v37  ;;  %v368_v53 = vsub.f32 %v713_v9, %v360_v37 }
 0x125   :  { %v377_v41 = vmul.f32 %v917_v38, %v917_v38  ;;  %v378_v42 = vmul.f32 %v919_v39, %v919_v39  ;;  %v379_v45 = vmul.f32 %v921_v40, %v921_v40  ;;  %v380_v48 = vmul.f32 %v927_v43, %v927_v43 }
 0x126   :  { %v381_v51 = vmul.f32 %v929_v44, %v929_v44  ;;  %v382_v54 = vmul.f32 %v366_v47, %v366_v47  ;;  %v369_v56 = vsub.f32 %v716_v11, %v360_v37  ;;  %v383_v57 = vmul.f32 %v367_v50, %v367_v50 }
 0x127   :  { %v393_v46 = vadd.f32 %v378_v42, %v377_v41  ;;  %v370_v59 = vsub.f32 %v719_v13, %v360_v37  ;;  %v384_v60 = vmul.f32 %v368_v53, %v368_v53  ;;  %v371_v62 = vsub.f32 %v722_v16, %v360_v37 }
 0x128   :  { %v385_v63 = vmul.f32 %v369_v56, %v369_v56  ;;  %v372_v1 = vsub.f32 %v725_v18, %v360_v37  ;;  %v373_v3 = vsub.f32 %v728_v21, %v360_v37  ;;  %v374_v7 = vsub.f32 %v731_v23, %v360_v37 }
 0x129   :  { %v394_v49 = vadd.f32 %v393_v46, %v379_v45  ;;  %v386_v2 = vmul.f32 %v370_v59, %v370_v59  ;;  %v387_v5 = vmul.f32 %v371_v62, %v371_v62  ;;  %v375_v10 = vsub.f32 %v734_v27, %v360_v37 }
 0x12a   :  { %v388_v8 = vmul.f32 %v372_v1, %v372_v1  ;;  %v389_v12 = vmul.f32 %v373_v3, %v373_v3  ;;  %v376_v14 = vsub.f32 %v737_v29, %v360_v37  ;;  %v390_v15 = vmul.f32 %v374_v7, %v374_v7  ;;  %v417_v29 = vld [vmem:[%s974_s2] sm:$0x1] }
 0x12b   :  { %v395_v52 = vadd.f32 %v394_v49, %v380_v48  ;;  %v391_v17 = vmul.f32 %v375_v10, %v375_v10  ;;  %v419_v27 = vlaneseq }
 0x12c   :  { %v392_v16 = vmul.f32 %v376_v14, %v376_v14 }
 0x12d   :  { %v396_v55 = vadd.f32 %v395_v52, %v381_v51  ;;  %v420_v31 = vshrl.u32 %v419_v27, 7  ;;  %v594_v51 = vld [vmem:[%s975_s3] ss:$0 sm:$0xff] }
 0x12f   :  { %v397_v58 = vadd.f32 %v396_v55, %v382_v54  ;;  %v421_v32 = vsub.s32 0, %v420_v31 }
 0x131   :  { %v398_v61 = vadd.f32 %v397_v58, %v383_v57 }
 0x133   :  { %v399_v0 = vadd.f32 %v398_v61, %v384_v60 }
 0x135   :  { %v400_v4 = vadd.f32 %v399_v0, %v385_v63 }
 0x137   :  { %v401_v6 = vadd.f32 %v400_v4, %v386_v2 }
 0x139   :  { %v402_v9 = vadd.f32 %v401_v6, %v387_v5 }
 0x13b   :  { %v403_v11 = vadd.f32 %v402_v9, %v388_v8 }
 0x13d   :  { %v404_v13 = vadd.f32 %v403_v11, %v389_v12 }
 0x13f   :  { %v405_v19 = vadd.f32 %v404_v13, %v390_v15 }
 0x141   :  { %v406_v20 = vadd.f32 %v405_v19, %v391_v17 }
 0x143   :  { %v407_v22 = vadd.f32 %v406_v20, %v392_v16 }
 0x145   :  { %v408_v18 = vrot.slane %v407_v22, 4 }
 0x147   :  { %v409_v24 = vadd.f32 %v408_v18, %v407_v22 }
 0x149   :  { %v410_v25 = vrot.slane %v409_v24, 2 }
 0x14b   :  { %v411_v21 = vadd.f32 %v410_v25, %v409_v24 }
 0x14d   :  { %v412_v26 = vrot.slane %v411_v21, 1 }
 0x14f   :  { %v413_v28 = vadd.f32 %v412_v26, %v411_v21 }
 0x151   :  { %v414_v23 = vmul.f32 0.0078125, %v413_v28 }
 0x153   :  { %v415_v30 = vadd.f32 1e-05, %v414_v23 }
 0x155   :  { %794 = vrsqrt.f32 %v415_v30 }
 0x162   :  { %v795_v33 = vpop.eup %794 }
 0x163   :  { %v418_v34 = vmul.f32 %v795_v33, %v417_v29 }
 0x165   :  { %v422_v35 = vrot.slane %v418_v34, %v421_v32 }
 0x167   :  { %v423_v36 = vmul.f32 %v422_v35, %v917_v38  ;;  %v424_v37 = vmul.f32 %v422_v35, %v919_v39  ;;  %v425_v41 = vmul.f32 %v422_v35, %v921_v40  ;;  %v426_v42 = vmul.f32 %v422_v35, %v927_v43 }
 0x168   :  { %v427_v45 = vmul.f32 %v422_v35, %v929_v44  ;;  %v428_v46 = vmul.f32 %v422_v35, %v366_v47  ;;  %v429_v48 = vmul.f32 %v422_v35, %v367_v50  ;;  %v430_v49 = vmul.f32 %v422_v35, %v368_v53 }
 0x169   :  { %v431_v52 = vmul.f32 %v422_v35, %v369_v56  ;;  %v432_v54 = vmul.f32 %v422_v35, %v370_v59  ;;  %v433_v55 = vmul.f32 %v422_v35, %v371_v62  ;;  %v434_v57 = vmul.f32 %v422_v35, %v372_v1 }
 0x16a   :  { %v435_v38 = vmul.f32 %v422_v35, %v373_v3  ;;  %v436_v58 = vmul.f32 %v422_v35, %v374_v7  ;;  %v437_v39 = vmul.f32 %v422_v35, %v375_v10  ;;  %v438_v60 = vmul.f32 %v422_v35, %v376_v14 }
 0x16b   :  { %v446_v40 = vadd.f32 %v594_v51, %v423_v36  ;;  %v447_v61 = vadd.f32 %v594_v51, %v424_v37  ;;  %v448_v43 = vadd.f32 %v594_v51, %v425_v41  ;;  %v449_v63 = vadd.f32 %v594_v51, %v426_v42 }
 0x16c   :  { %v450_v44 = vadd.f32 %v594_v51, %v427_v45  ;;  %v451_v47 = vadd.f32 %v594_v51, %v428_v46  ;;  %v452_v50 = vadd.f32 %v594_v51, %v429_v48  ;;  %v453_v53 = vadd.f32 %v594_v51, %v430_v49 }
 0x16d   :  { %v454_v0 = vadd.f32 %v594_v51, %v431_v52  ;;  %v455_v2 = vadd.f32 %v594_v51, %v432_v54  ;;  %v456_v4 = vadd.f32 %v594_v51, %v433_v55  ;;  %v457_v5 = vadd.f32 %v594_v51, %v434_v57 }
 0x16e   :  { %v458_v56 = vadd.f32 %v594_v51, %v435_v38  ;;  %v459_v59 = vadd.f32 %v594_v51, %v436_v58  ;;  %v460_v62 = vadd.f32 %v594_v51, %v437_v39  ;;  %v461_v1 = vadd.f32 %v594_v51, %v438_v60 }
 0x16f   :  { %v462_v3 = vmax.f32 %v446_v40, 0.0  ;;  %v463_v6 = vmax.f32 %v447_v61, 0.0  ;;  %v464_v7 = vmax.f32 %v448_v43, 0.0  ;;  %v465_v8 = vmax.f32 %v449_v63, 0.0 }
 0x170   :  { %v466_v9 = vmax.f32 %v450_v44, 0.0  ;;  %v467_v10 = vmax.f32 %v451_v47, 0.0  ;;  %v468_v12 = vmax.f32 %v452_v50, 0.0  ;;  %v469_v11 = vmax.f32 %v453_v53, 0.0 }
 0x171   :  { %v470_v14 = vmax.f32 %v454_v0, 0.0  ;;  %v471_v15 = vmax.f32 %v455_v2, 0.0  ;;  %v472_v13 = vmax.f32 %v456_v4, 0.0  ;;  %v473_v17 = vmax.f32 %v457_v5, 0.0 }
 0x172   :  { %v474_v19 = vmax.f32 %v458_v56, 0.0  ;;  %v475_v16 = vmax.f32 %v459_v59, 0.0  ;;  %v476_v20 = vmax.f32 %v460_v62, 0.0  ;;  %v477_v22 = vmax.f32 %v461_v1, 0.0 }
 0x173   :  { %v630_v18 = vpack.c.bf16 %v463_v6, %v462_v3  ;;  %v635_v24 = vpack.c.bf16 %v465_v8, %v464_v7  ;;  %v640_v25 = vpack.c.bf16 %v467_v10, %v466_v9  ;;  %v645_v21 = vpack.c.bf16 %v469_v11, %v468_v12 }
 0x174   :  { %v650_v26 = vpack.c.bf16 %v471_v15, %v470_v14  ;;  %v655_v28 = vpack.c.bf16 %v473_v17, %v472_v13  ;;  %v660_v23 = vpack.c.bf16 %v475_v16, %v474_v19  ;;  %v665_v30 = vpack.c.bf16 %v477_v22, %v476_v20 }
 0x175   :  { %631 = vst [vmem:[%s976_s4] sm:$0xff] %v630_v18   ;;  %667 = vst [vmem:[%s976_s4 + $0x8] sm:$0xff] %v635_v24  }
 0x176   :  { %668 = vst [vmem:[%s976_s4 + $0x10] sm:$0xff] %v640_v25   ;;  %669 = vst [vmem:[%s976_s4 + $0x18] sm:$0xff] %v645_v21  }
 0x177   :  { %670 = vst [vmem:[%s976_s4 + $0x20] sm:$0xff] %v650_v26   ;;  %671 = vst [vmem:[%s976_s4 + $0x28] sm:$0xff] %v655_v28  }
 0x178   :  { %672 = vst [vmem:[%s976_s4 + $0x30] sm:$0xff] %v660_v23   ;;  %673 = vst [vmem:[%s976_s4 + $0x38] sm:$0xff] %v665_v30  }

// kernel: _lambda_.27
= control target key start
LH: loop header
LB: loop body
LE: loop exit
PB: predicated region body
PF: predicated region fallthrough
CT: control target
= control target key end

     0   :  { %v179_v43 = vlaneseq  ;;  %s365_s1 = inlined_call_operand.vmem [shape: bf16[128,128], index: 1, kind: input, shape index: {}]   ;;  %s366_s0 = inlined_call_operand.vmem [shape: bf16[32,128], index: 0, kind: input, shape index: {}]   ;;  %s367_s2 = inlined_call_operand.vmem [shape: f32[1,128], index: 2, kind: input, shape index: {}]   ;;  %s368_s3 = inlined_call_operand.vmem [shape: f32[1,128], index: 3, kind: input, shape index: {}]   ;;  %s369_s4 = inlined_call_operand.vmem [shape: bf16[32,128], index: 4, kind: output, shape index: {}]  }
   0x1   :  { %v286_v0 = vld [vmem:[%s365_s1 + $0x38] sm:$0xff]   ;;  %v287_v1 = vld [vmem:[%s365_s1 + $0x30] sm:$0xff]   ;;  %v288_v2 = vld [vmem:[%s365_s1 + $0x28] sm:$0xff]  }
   0x2   :  { %266 = vmatprep.subr.bf16.mxu0 %v286_v0  ;;  %v289_v3 = vld [vmem:[%s365_s1 + $0x20] sm:$0xff]   ;;  %v290_v5 = vld [vmem:[%s365_s1 + $0x18] sm:$0xff]   ;;  %v291_v6 = vld [vmem:[%s365_s1 + $0x10] sm:$0xff]   ;;  %v180_v44 = vshrl.u32 %v179_v43, 7 }
   0x3   :  { %267 = vmatpush3.bf16.msra.mxu0 %v286_v0  ;;  %v294_v4 = vld [vmem:[%s366_s0] sm:$0xff]   ;;  %v292_v7 = vld [vmem:[%s365_s1 + $0x8] sm:$0xff]  }
   0x4   :  { %268 = vmatprep.subr.bf16.mxu0 %v287_v1  ;;  %282 = vmatprep.mubr.bf16.mxu0 %v294_v4  ;;  %v293_v8 = vld [vmem:[%s365_s1] sm:$0xff]   ;;  %v295_v9 = vld [vmem:[%s366_s0 + $0x8] sm:$0xff]   ;;  %v181_v46 = vsub.s32 0, %v180_v44 }
   0x5   :  { %v177_v45 = vld [vmem:[%s367_s2] sm:$0x1] }
   0x6   :  { %v236_v50 = vld [vmem:[%s368_s3] ss:$0 sm:$0xff] }
   0x7   :  { %269 = vmatpush3.bf16.msra.mxu0 %v287_v1 }
   0x8   :  { %270 = vmatprep.subr.bf16.mxu0 %v288_v2 }
   0xb   :  { %271 = vmatpush3.bf16.msra.mxu0 %v288_v2 }
   0xc   :  { %272 = vmatprep.subr.bf16.mxu0 %v289_v3 }
   0xf   :  { %273 = vmatpush3.bf16.msra.mxu0 %v289_v3 }
  0x10   :  { %274 = vmatprep.subr.bf16.mxu0 %v290_v5 }
  0x13   :  { %275 = vmatpush3.bf16.msra.mxu0 %v290_v5 }
  0x14   :  { %276 = vmatprep.subr.bf16.mxu0 %v291_v6 }
  0x17   :  { %277 = vmatpush3.bf16.msra.mxu0 %v291_v6 }
  0x18   :  { %278 = vmatprep.subr.bf16.mxu0 %v292_v7 }
  0x1b   :  { %279 = vmatpush3.bf16.msra.mxu0 %v292_v7 }
  0x1c   :  { %280 = vmatprep.subr.bf16.mxu0 %v293_v8 }
  0x1f   :  { %281 = vmatpush3.bf16.msra.mxu0 %v293_v8 }
  0x22   :  { %283 = vmatmul.mubr.bf16.vlgmr.msra.gmra.mxu0 %v295_v9 }
  0xe2   :  { %v284_v10 = vpop.f32.mrf.mxu0 }
  0xe4   :  { %v132_v11 = vpop.f32.mrf.mxu0 }
  0xe6   :  { %v285_v12 = vpop.f32.mrf.mxu0 }
  0xe8   :  { %v135_v13 = vpop.f32.mrf.mxu0 }
  0xe9   :  { %v147_v14 = vadd.f32 %v135_v13, %v132_v11 }
  0xeb   :  { %v148_v15 = vadd.f32 %v284_v10, %v147_v14 }
  0xed   :  { %v149_v16 = vadd.f32 %v285_v12, %v148_v15 }
  0xef   :  { %v150_v17 = vrot.slane %v149_v16, 4 }
  0xf1   :  { %v151_v18 = vadd.f32 %v150_v17, %v149_v16 }
  0xf3   :  { %v152_v19 = vrot.slane %v151_v18, 2 }
  0xf5   :  { %v153_v20 = vadd.f32 %v152_v19, %v151_v18 }
  0xf7   :  { %v154_v21 = vrot.slane %v153_v20, 1 }
  0xf9   :  { %v155_v22 = vadd.f32 %v154_v21, %v153_v20 }
  0xfb   :  { %v156_v23 = vmul.f32 0.03125, %v155_v22 }
  0xfd   :  { %v157_v24 = vsub.f32 %v132_v11, %v156_v23  ;;  %v158_v25 = vsub.f32 %v135_v13, %v156_v23  ;;  %v159_v26 = vsub.f32 %v284_v10, %v156_v23  ;;  %v160_v27 = vsub.f32 %v285_v12, %v156_v23 }
  0xff   :  { %v161_v28 = vmul.f32 %v157_v24, %v157_v24  ;;  %v162_v29 = vmul.f32 %v158_v25, %v158_v25  ;;  %v163_v30 = vmul.f32 %v159_v26, %v159_v26  ;;  %v164_v32 = vmul.f32 %v160_v27, %v160_v27 }
 0x101   :  { %v165_v31 = vadd.f32 %v162_v29, %v161_v28 }
 0x103   :  { %v166_v33 = vadd.f32 %v165_v31, %v163_v30 }
 0x105   :  { %v167_v34 = vadd.f32 %v166_v33, %v164_v32 }
 0x107   :  { %v168_v35 = vrot.slane %v167_v34, 4 }
 0x109   :  { %v169_v36 = vadd.f32 %v168_v35, %v167_v34 }
 0x10b   :  { %v170_v37 = vrot.slane %v169_v36, 2 }
 0x10d   :  { %v171_v38 = vadd.f32 %v170_v37, %v169_v36 }
 0x10f   :  { %v172_v39 = vrot.slane %v171_v38, 1 }
 0x111   :  { %v173_v40 = vadd.f32 %v172_v39, %v171_v38 }
 0x113   :  { %v174_v41 = vmul.f32 0.03125, %v173_v40 }
 0x115   :  { %v175_v42 = vadd.f32 1e-05, %v174_v41 }
 0x117   :  { %296 = vrsqrt.f32 %v175_v42 }
 0x124   :  { %v297_v47 = vpop.eup %296 }
 0x125   :  { %v178_v48 = vmul.f32 %v297_v47, %v177_v45 }
 0x127   :  { %v182_v49 = vrot.slane %v178_v48, %v181_v46 }
 0x129   :  { %v183_v51 = vmul.f32 %v182_v49, %v157_v24  ;;  %v184_v52 = vmul.f32 %v182_v49, %v158_v25  ;;  %v185_v53 = vmul.f32 %v182_v49, %v159_v26  ;;  %v186_v54 = vmul.f32 %v182_v49, %v160_v27 }
 0x12b   :  { %v194_v55 = vadd.f32 %v236_v50, %v183_v51  ;;  %v195_v56 = vadd.f32 %v236_v50, %v184_v52  ;;  %v196_v57 = vadd.f32 %v236_v50, %v185_v53  ;;  %v197_v58 = vadd.f32 %v236_v50, %v186_v54 }
 0x12d   :  { %v198_v59 = vmax.f32 %v194_v55, 0.0  ;;  %v199_v60 = vmax.f32 %v195_v56, 0.0  ;;  %v200_v61 = vmax.f32 %v196_v57, 0.0  ;;  %v201_v62 = vmax.f32 %v197_v58, 0.0 }
 0x12f   :  { %v248_v63 = vpack.c.bf16 %v199_v60, %v198_v59  ;;  %v253_v0 = vpack.c.bf16 %v201_v62, %v200_v61 }
 0x131   :  { %249 = vst [vmem:[%s369_s4] sm:$0xff] %v248_v63   ;;  %255 = vst [vmem:[%s369_s4 + $0x8] sm:$0xff] %v253_v0  }

// kernel: _lambda_.30
= control target key start
LH: loop header
LB: loop body
LE: loop exit
PB: predicated region body
PF: predicated region fallthrough
CT: control target
= control target key end

     0   :  { %s971_s18 = smov 0   ;;  %s973_s19 = smov 0   ;;  %s1084_s0 = inlined_call_operand.vmem [shape: bf16[32,128], index: 0, kind: input, shape index: {}]   ;;  %s1085_s1 = inlined_call_operand.vmem [shape: bf16[128,256], index: 1, kind: input, shape index: {}]   ;;  %s1086_s2 = inlined_call_operand.vmem [shape: f32[1,256], index: 2, kind: input, shape index: {}]   ;;  %s1087_s3 = inlined_call_operand.vmem [shape: f32[1,256], index: 3, kind: input, shape index: {}]   ;;  %s1088_s4 = inlined_call_operand.vmem [shape: bf16[32,256], index: 4, kind: input, shape index: {}]   ;;  %s1089_s5 = inlined_call_operand.vmem [shape: bf16[32,256], index: 5, kind: output, shape index: {}]  }
   0x1   :  { %s975_s20 = smov 0  }
   0x2 LB: > { %s987_s21 = sadd.s32 4294967295, %s939_s20   ;;  %s990_s22 = sadd.s32 1, %s939_s20   ;;  %s939_s20 = sphi %s975_s20, %s1094_s20   ;;  %s935_s19 = sphi %s973_s19, %s1093_s19   ;;  %s931_s18 = sphi %s971_s18, %s1092_s18  }
   0x3   : > { %s40_s23 = ssub.s32 %s939_s20, %s990_s22  ;;  %s43_s24 = sadd.s32 1, %s935_s19 }
   0x4   : > { %p41_p0 = scmp.eq.s32.totalorder %s40_s23, 0  ;;  %p50_p1 = scmp.ne.s32.totalorder %s935_s19, %s931_s18 }
   0x5   : > { %p51_p2 = scmp.eq.s32.totalorder %s939_s20, 0  ;;  %p158_p3 = scmp.eq.s32.totalorder %s987_s21, 1 }
   0x6   : > { %s1000_s25 = scalar_select %p41_p0, %s935_s19, %s43_s24  }
   0x7   : > { %p1002_p4 = por %p51_p2, %p50_p1  ;;  %p1006_p5 = por %p158_p3, %p50_p1 }
   0x8   : > { %p799_p6 = scmp.ge.s32.totalorder %s939_s20, 2 }
   0xa   : > { %183 = sbr.rel (%p799_p6) target bundleno = 35 (0x23), region = 20 }
   0xf   : > { %186 = sbr.rel (!%p1002_p4) target bundleno = 29 (0x1d), region = 24  ;;  %s188_s28 = sand.u32 (%p1002_p4), 1, %s935_s19  }
  0x10   : > { %s801_s29 = sshll.u32 (%p1002_p4), %s939_s20, 2  ;;  %s800_s30 = sshll.u32 (%p1002_p4), %s188_s28, 6 }
  0x11   : > { %s1018_s8 = scalar_lea.vmem (%p1002_p4), %s1085_s1, %s801_s29  ;;  %s190_s9 = scalar_lea.vmem (%p1002_p4), [#allocation2], %s800_s30 }
  0x12   : > { %v209_v0 = vld [vmem:[%s1018_s8] sm:$0xf] (%p1002_p4)  ;;  %v211_v1 = vld [vmem:[%s1018_s8 + $0x8] sm:$0xf] (%p1002_p4)  ;;  %v213_v2 = vld [vmem:[%s1018_s8 + $0x10] sm:$0xf] (%p1002_p4) }
  0x13   : > { %210 = vst [vmem:[%s190_s9] sm:$0xf] (%p1002_p4), %v209_v0  ;;  %212 = vst [vmem:[%s190_s9 + $0x4] sm:$0xf] (%p1002_p4), %v211_v1  ;;  %v215_v3 = vld [vmem:[%s1018_s8 + $0x18] sm:$0xf] (%p1002_p4) }
  0x14   : > { %v217_v4 = vld [vmem:[%s1018_s8 + $0x20] sm:$0xf]  ;;  %214 = vst [vmem:[%s190_s9 + $0x8] sm:$0xf] %v213_v2  ;;  %216 = vst [vmem:[%s190_s9 + $0xc] sm:$0xf] %v215_v3 }
  0x15   : > { %218 = vst [vmem:[%s190_s9 + $0x10] sm:$0xf] %v217_v4  ;;  %v219_v5 = vld [vmem:[%s1018_s8 + $0x28] sm:$0xf]  ;;  %v221_v6 = vld [vmem:[%s1018_s8 + $0x30] sm:$0xf] }
  0x16   : > { %v223_v7 = vld [vmem:[%s1018_s8 + $0x38] sm:$0xf]  ;;  %220 = vst [vmem:[%s190_s9 + $0x14] sm:$0xf] %v219_v5  ;;  %222 = vst [vmem:[%s190_s9 + $0x18] sm:$0xf] %v221_v6 }
  0x17   : > { %224 = vst [vmem:[%s190_s9 + $0x1c] sm:$0xf] %v223_v7  ;;  %v225_v8 = vld [vmem:[%s1018_s8 + $0x40] sm:$0xf]  ;;  %v227_v9 = vld [vmem:[%s1018_s8 + $0x48] sm:$0xf] }
  0x18   : > { %v229_v10 = vld [vmem:[%s1018_s8 + $0x50] sm:$0xf]  ;;  %226 = vst [vmem:[%s190_s9 + $0x20] sm:$0xf] %v225_v8  ;;  %228 = vst [vmem:[%s190_s9 + $0x24] sm:$0xf] %v227_v9 }
  0x19   : > { %230 = vst [vmem:[%s190_s9 + $0x28] sm:$0xf] %v229_v10  ;;  %v231_v11 = vld [vmem:[%s1018_s8 + $0x58] sm:$0xf]  ;;  %v233_v12 = vld [vmem:[%s1018_s8 + $0x60] sm:$0xf] }
  0x1a   : > { %v235_v13 = vld [vmem:[%s1018_s8 + $0x68] sm:$0xf]  ;;  %232 = vst [vmem:[%s190_s9 + $0x2c] sm:$0xf] %v231_v11  ;;  %234 = vst [vmem:[%s190_s9 + $0x30] sm:$0xf] %v233_v12 }
  0x1b   : > { %236 = vst [vmem:[%s190_s9 + $0x34] sm:$0xf] %v235_v13  ;;  %v237_v14 = vld [vmem:[%s1018_s8 + $0x70] sm:$0xf]  ;;  %v239_v15 = vld [vmem:[%s1018_s8 + $0x78] sm:$0xf] }
  0x1c   : > { %238 = vst [vmem:[%s190_s9 + $0x38] sm:$0xf] %v237_v14  ;;  %240 = vst [vmem:[%s190_s9 + $0x3c] sm:$0xf] %v239_v15 }
  0x1d PF: > { %308 = sbr.rel (!%p1002_p4) target bundleno = 35 (0x23), region = 73  ;;  %s310_s10 = sand.u32 (%p1002_p4), 1, %s935_s19  }
  0x1e   : > { %s803_s11 = sshll.u32 (%p1002_p4), %s939_s20, 2  ;;  %s802_s12 = sshll.u32 (%p1002_p4), %s310_s10, 4 }
  0x1f   : > { %s314_s15 = scalar_lea.vmem (%p1002_p4), %s1088_s4, %s803_s11  ;;  %s312_s16 = scalar_lea.vmem (%p1002_p4), [#allocation3], %s802_s12 }
  0x20   : > { %v331_v16 = vld [vmem:[%s314_s15] sm:$0xf] (%p1002_p4)  ;;  %v333_v17 = vld [vmem:[%s314_s15 + $0x8] sm:$0xf] (%p1002_p4)  ;;  %v335_v18 = vld [vmem:[%s314_s15 + $0x10] sm:$0xf] (%p1002_p4) }
  0x21   : > { %332 = vst [vmem:[%s312_s16] sm:$0xf] (%p1002_p4), %v331_v16  ;;  %334 = vst [vmem:[%s312_s16 + $0x4] sm:$0xf] (%p1002_p4), %v333_v17  ;;  %v337_v19 = vld [vmem:[%s314_s15 + $0x18] sm:$0xf] (%p1002_p4) }
  0x22   : > { %336 = vst [vmem:[%s312_s16 + $0x8] sm:$0xf] %v335_v18  ;;  %338 = vst [vmem:[%s312_s16 + $0xc] sm:$0xf] %v337_v19 }
  0x23 PF: > { %p804_p7 = scmp.ge.s32.totalorder %s939_s20, 1  ;;  %p369_p8 = scmp.lt.s32.totalorder %s939_s20, 3 }
  0x25   : > { %p370_p9 = pnand %p804_p7, %p369_p8 }
  0x26   : > { %s376_s17 = sand.u32 (!%p370_p9), 1, %s931_s18   ;;  %p419_p10 = scmp.lt.s32.totalorder (!%p370_p9), %s987_s21, 1 }
  0x27   : > { %373 = sbr.rel (%p370_p9) target bundleno = 360 (0x168), region = 114  ;;  %s805_s26 = sshll.u32 (!%p370_p9), %s376_s17, 6 }
  0x28   : > { %s378_s28 = scalar_lea.vmem (!%p370_p9), [#allocation2], %s805_s26  ;;  %s1058_s6 = sshll.u32 (!%p370_p9), %s376_s17, 4 }
  0x29   : > { %s385_s13 = scalar_lea.vmem (!%p370_p9), [#allocation3], %s1058_s6  ;;  %s418_s18 = scalar_lea.vmem (!%p370_p9), [#allocation4], %s1058_s6 }
  0x2c   : > { %v913_v20 = vld [vmem:[%s1084_s0] sm:$0xff]   ;;  %v905_v21 = vld [vmem:[%s378_s28 + $0x38] sm:$0xff]   ;;  %v906_v22 = vld [vmem:[%s378_s28 + $0x30] sm:$0xff]   ;;  %s420_s30 = scalar_select %p419_p10, %s987_s21, 1  ;;  %v587_v63 = vlaneseq }
  0x2d   : > { %877 = vmatprep.mubr.bf16.mxu0 %v913_v20  ;;  %861 = vmatprep.subr.bf16.mxu0 %v905_v21  ;;  %v907_v23 = vld [vmem:[%s378_s28 + $0x28] sm:$0xff]   ;;  %v908_v24 = vld [vmem:[%s378_s28 + $0x20] sm:$0xff]   ;;  %v909_v25 = vld [vmem:[%s378_s28 + $0x18] sm:$0xff]   ;;  %s824_s14 = sshll.u32 (%p1006_p5), %s987_s21, 2 }
  0x2e   : > { %862 = vmatpush3.bf16.msra.mxu0 %v905_v21  ;;  %v910_v26 = vld [vmem:[%s378_s28 + $0x10] sm:$0xff]   ;;  %v911_v27 = vld [vmem:[%s378_s28 + $0x8] sm:$0xff]   ;;  %v912_v28 = vld [vmem:[%s378_s28] sm:$0xff]   ;;  %s421_s9 = scalar_lea.vmem %s1086_s2, %s420_s30  ;;  %v588_v0 = vshrl.u32 %v587_v63, 7  ;;  %s424_s12 = scalar_lea.vmem %s1087_s3, %s420_s30 }
  0x2f   : > { %863 = vmatprep.subr.bf16.mxu0 %v906_v22  ;;  %v914_v29 = vld [vmem:[%s1084_s0 + $0x8] sm:$0xff]   ;;  %v585_v1 = vld [vmem:[%s421_s9] sm:$0x1]  ;;  %s650_s17 = scalar_lea.vmem (%p1006_p5), %s1089_s5, %s824_s14 }
  0x30   : > { %v589_v2 = vsub.s32 0, %v588_v0  ;;  %v832_v5 = vld [vmem:[%s385_s13] sm:$0xff]   ;;  %v849_v6 = vld [vmem:[%s385_s13 + $0x8] sm:$0xff]  }
  0x31   : > { %v818_v8 = vld [vmem:[%s424_s12] ss:$0 sm:$0xff]  ;;  %v833_v9 = vunpack.c.l.bf16 %v832_v5  ;;  %v834_v10 = vunpack.c.h.bf16 %v832_v5  ;;  %v837_v11 = vunpack.c.l.bf16 %v849_v6  ;;  %v838_v12 = vunpack.c.h.bf16 %v849_v6 }
  0x32   : > { %864 = vmatpush3.bf16.msra.mxu0 %v906_v22 }
  0x33   : > { %865 = vmatprep.subr.bf16.mxu0 %v907_v23 }
  0x36   : > { %866 = vmatpush3.bf16.msra.mxu0 %v907_v23 }
  0x37   : > { %867 = vmatprep.subr.bf16.mxu0 %v908_v24 }
  0x3a   : > { %868 = vmatpush3.bf16.msra.mxu0 %v908_v24 }
  0x3b   : > { %869 = vmatprep.subr.bf16.mxu0 %v909_v25 }
  0x3e   : > { %870 = vmatpush3.bf16.msra.mxu0 %v909_v25 }
  0x3f   : > { %871 = vmatprep.subr.bf16.mxu0 %v910_v26 }
  0x42   : > { %872 = vmatpush3.bf16.msra.mxu0 %v910_v26 }
  0x43   : > { %873 = vmatprep.subr.bf16.mxu0 %v911_v27 }
  0x46   : > { %874 = vmatpush3.bf16.msra.mxu0 %v911_v27 }
  0x47   : > { %875 = vmatprep.subr.bf16.mxu0 %v912_v28 }
  0x4a   : > { %876 = vmatpush3.bf16.msra.mxu0 %v912_v28 }
  0x4d   : > { %878 = vmatmul.mubr.bf16.vlgmr.msra.gmra.mxu0 %v914_v29 }
 0x10d   : > { %v879_v30 = vpop.f32.mrf.mxu0 }
 0x10f   : > { %v540_v31 = vpop.f32.mrf.mxu0 }
 0x111   : > { %v880_v32 = vpop.f32.mrf.mxu0 }
 0x113   : > { %v543_v33 = vpop.f32.mrf.mxu0 }
 0x114   : > { %v555_v34 = vadd.f32 %v543_v33, %v540_v31 }
 0x116   : > { %v556_v35 = vadd.f32 %v879_v30, %v555_v34 }
 0x118   : > { %v557_v36 = vadd.f32 %v880_v32, %v556_v35 }
 0x11a   : > { %v558_v37 = vrot.slane %v557_v36, 4 }
 0x11c   : > { %v559_v38 = vadd.f32 %v558_v37, %v557_v36 }
 0x11e   : > { %v560_v39 = vrot.slane %v559_v38, 2 }
 0x120   : > { %v561_v40 = vadd.f32 %v560_v39, %v559_v38 }
 0x122   : > { %v562_v41 = vrot.slane %v561_v40, 1 }
 0x124   : > { %v563_v42 = vadd.f32 %v562_v41, %v561_v40 }
 0x126   : > { %v564_v43 = vmul.f32 0.03125, %v563_v42 }
 0x128   : > { %v565_v44 = vsub.f32 %v540_v31, %v564_v43  ;;  %v566_v45 = vsub.f32 %v543_v33, %v564_v43  ;;  %v567_v46 = vsub.f32 %v879_v30, %v564_v43  ;;  %v568_v47 = vsub.f32 %v880_v32, %v564_v43 }
 0x12a   : > { %v569_v48 = vmul.f32 %v565_v44, %v565_v44  ;;  %v570_v49 = vmul.f32 %v566_v45, %v566_v45  ;;  %v571_v50 = vmul.f32 %v567_v46, %v567_v46  ;;  %v572_v52 = vmul.f32 %v568_v47, %v568_v47 }
 0x12c   : > { %v573_v51 = vadd.f32 %v570_v49, %v569_v48 }
 0x12e   : > { %v574_v53 = vadd.f32 %v573_v51, %v571_v50 }
 0x130   : > { %v575_v54 = vadd.f32 %v574_v53, %v572_v52 }
 0x132   : > { %v576_v55 = vrot.slane %v575_v54, 4 }
 0x134   : > { %v577_v56 = vadd.f32 %v576_v55, %v575_v54 }
 0x136   : > { %v578_v57 = vrot.slane %v577_v56, 2 }
 0x138   : > { %v579_v58 = vadd.f32 %v578_v57, %v577_v56 }
 0x13a   : > { %v580_v59 = vrot.slane %v579_v58, 1 }
 0x13c   : > { %v581_v60 = vadd.f32 %v580_v59, %v579_v58 }
 0x13e   : > { %v582_v61 = vmul.f32 0.03125, %v581_v60 }
 0x140   : > { %v583_v62 = vadd.f32 1e-05, %v582_v61 }
 0x142   : > { %915 = vrsqrt.f32 %v583_v62 }
 0x14f   : > { %v916_v3 = vpop.eup %915 }
 0x150   : > { %v586_v4 = vmul.f32 %v916_v3, %v585_v1 }
 0x152   : > { %v590_v7 = vrot.slane %v586_v4, %v589_v2 }
 0x154   : > { %v591_v13 = vmul.f32 %v590_v7, %v565_v44  ;;  %v592_v14 = vmul.f32 %v590_v7, %v566_v45  ;;  %v593_v15 = vmul.f32 %v590_v7, %v567_v46  ;;  %v594_v16 = vmul.f32 %v590_v7, %v568_v47 }
 0x156   : > { %v602_v17 = vadd.f32 %v818_v8, %v591_v13  ;;  %v603_v18 = vadd.f32 %v818_v8, %v592_v14  ;;  %v604_v19 = vadd.f32 %v818_v8, %v593_v15  ;;  %v605_v20 = vadd.f32 %v818_v8, %v594_v16 }
 0x158   : > { %v614_v21 = vadd.f32 %v833_v9, %v602_v17  ;;  %v615_v22 = vadd.f32 %v834_v10, %v603_v18  ;;  %v616_v23 = vadd.f32 %v837_v11, %v604_v19  ;;  %v617_v24 = vadd.f32 %v838_v12, %v605_v20 }
 0x15a   : > { %v618_v25 = vmax.f32 %v614_v21, 0.0  ;;  %v619_v26 = vmax.f32 %v615_v22, 0.0  ;;  %v620_v27 = vmax.f32 %v616_v23, 0.0  ;;  %v621_v28 = vmax.f32 %v617_v24, 0.0  ;;  %648 = sbr.rel (!%p1006_p5) target bundleno = 360 (0x168), region = 126 }
 0x15c   : > { %v842_v29 = vpack.c.bf16 %v619_v26, %v618_v25  ;;  %v847_v30 = vpack.c.bf16 %v621_v28, %v620_v27 }
 0x15e   : > { %843 = vst [vmem:[%s418_s18] sm:$0xff] %v842_v29   ;;  %850 = vst [vmem:[%s418_s18 + $0x8] sm:$0xff] %v847_v30  }
 0x165   : > { %v667_v31 = vld [vmem:[%s418_s18] sm:$0xf]  ;;  %v669_v32 = vld [vmem:[%s418_s18 + $0x4] sm:$0xf]  ;;  %v671_v33 = vld [vmem:[%s418_s18 + $0x8] sm:$0xf] }
 0x166   : > { %v673_v34 = vld [vmem:[%s418_s18 + $0xc] sm:$0xf]  ;;  %668 = vst [vmem:[%s650_s17] sm:$0xf] %v667_v31  ;;  %670 = vst [vmem:[%s650_s17 + $0x8] sm:$0xf] %v669_v32 }
 0x167   : > { %672 = vst [vmem:[%s650_s17 + $0x10] sm:$0xf] %v671_v33  ;;  %674 = vst [vmem:[%s650_s17 + $0x18] sm:$0xf] %v673_v34 }
 0x168 PF: > { %p12_p11 = scmp.ge.s32.totalorder %s990_s22, 4   ;;  %s1092_s18 = smov %s935_s19 }
 0x169   : > { %s1093_s19 = smov %s1000_s25  ;;  %s1094_s20 = smov %s990_s22 }
 0x16a   :  { %14 = sbr.rel (!%p12_p11) target bundleno = 2 (0x2), region = 212 }

// kernel: _lambda_.29
= control target key start
LH: loop header
LB: loop body
LE: loop exit
PB: predicated region body
PF: predicated region fallthrough
CT: control target
= control target key end

     0   :  { %s818_s15 = smov 0   ;;  %s820_s16 = smov 0   ;;  %s914_s0 = inlined_call_operand.vmem [shape: bf16[32,128], index: 0, kind: input, shape index: {}]   ;;  %s915_s1 = inlined_call_operand.vmem [shape: bf16[128,256], index: 1, kind: input, shape index: {}]   ;;  %s916_s2 = inlined_call_operand.vmem [shape: f32[1,256], index: 2, kind: input, shape index: {}]   ;;  %s917_s3 = inlined_call_operand.vmem [shape: f32[1,256], index: 3, kind: input, shape index: {}]   ;;  %s918_s4 = inlined_call_operand.vmem [shape: bf16[32,256], index: 4, kind: output, shape index: {}]  }
   0x1   :  { %s822_s17 = smov 0  }
   0x2 LB: > { %s834_s18 = sadd.s32 4294967295, %s791_s17   ;;  %s837_s19 = sadd.s32 1, %s791_s17   ;;  %s791_s17 = sphi %s822_s17, %s922_s17   ;;  %s787_s16 = sphi %s820_s16, %s921_s16   ;;  %s783_s15 = sphi %s818_s15, %s920_s15  }
   0x3   : > { %s39_s20 = ssub.s32 %s791_s17, %s837_s19  ;;  %s42_s21 = sadd.s32 1, %s787_s16 }
   0x4   : > { %p40_p0 = scmp.eq.s32.totalorder %s39_s20, 0  ;;  %p49_p1 = scmp.ne.s32.totalorder %s787_s16, %s783_s15 }
   0x5   : > { %p50_p2 = scmp.eq.s32.totalorder %s791_s17, 0  ;;  %p131_p3 = scmp.eq.s32.totalorder %s834_s18, 1 }
   0x6   : > { %s847_s22 = scalar_select %p40_p0, %s787_s16, %s42_s21  }
   0x7   : > { %p51_p4 = por %p50_p2, %p49_p1  ;;  %p849_p5 = por %p131_p3, %p49_p1 }
   0x8   : > { %p663_p6 = scmp.ge.s32.totalorder %s791_s17, 2 }
   0xa   : > { %156 = sbr.rel (%p663_p6) target bundleno = 29 (0x1d), region = 20 }
   0xf   : > { %159 = sbr.rel (!%p51_p4) target bundleno = 29 (0x1d), region = 24  ;;  %s161_s24 = sand.u32 (%p51_p4), 1, %s787_s16  }
  0x10   : > { %s665_s25 = sshll.u32 (%p51_p4), %s791_s17, 2  ;;  %s664_s26 = sshll.u32 (%p51_p4), %s161_s24, 6 }
  0x11   : > { %s859_s29 = scalar_lea.vmem (%p51_p4), %s915_s1, %s665_s25  ;;  %s163_s30 = scalar_lea.vmem (%p51_p4), [#allocation2], %s664_s26 }
  0x12   : > { %v182_v0 = vld [vmem:[%s859_s29] sm:$0xf] (%p51_p4)  ;;  %v184_v1 = vld [vmem:[%s859_s29 + $0x8] sm:$0xf] (%p51_p4)  ;;  %v186_v2 = vld [vmem:[%s859_s29 + $0x10] sm:$0xf] (%p51_p4) }
  0x13   : > { %183 = vst [vmem:[%s163_s30] sm:$0xf] (%p51_p4), %v182_v0  ;;  %185 = vst [vmem:[%s163_s30 + $0x4] sm:$0xf] (%p51_p4), %v184_v1  ;;  %v188_v3 = vld [vmem:[%s859_s29 + $0x18] sm:$0xf] (%p51_p4) }
  0x14   : > { %v190_v4 = vld [vmem:[%s859_s29 + $0x20] sm:$0xf]  ;;  %187 = vst [vmem:[%s163_s30 + $0x8] sm:$0xf] %v186_v2  ;;  %189 = vst [vmem:[%s163_s30 + $0xc] sm:$0xf] %v188_v3 }
  0x15   : > { %191 = vst [vmem:[%s163_s30 + $0x10] sm:$0xf] %v190_v4  ;;  %v192_v5 = vld [vmem:[%s859_s29 + $0x28] sm:$0xf]  ;;  %v194_v6 = vld [vmem:[%s859_s29 + $0x30] sm:$0xf] }
  0x16   : > { %v196_v7 = vld [vmem:[%s859_s29 + $0x38] sm:$0xf]  ;;  %193 = vst [vmem:[%s163_s30 + $0x14] sm:$0xf] %v192_v5  ;;  %195 = vst [vmem:[%s163_s30 + $0x18] sm:$0xf] %v194_v6 }
  0x17   : > { %197 = vst [vmem:[%s163_s30 + $0x1c] sm:$0xf] %v196_v7  ;;  %v198_v8 = vld [vmem:[%s859_s29 + $0x40] sm:$0xf]  ;;  %v200_v9 = vld [vmem:[%s859_s29 + $0x48] sm:$0xf] }
  0x18   : > { %v202_v10 = vld [vmem:[%s859_s29 + $0x50] sm:$0xf]  ;;  %199 = vst [vmem:[%s163_s30 + $0x20] sm:$0xf] %v198_v8  ;;  %201 = vst [vmem:[%s163_s30 + $0x24] sm:$0xf] %v200_v9 }
  0x19   : > { %203 = vst [vmem:[%s163_s30 + $0x28] sm:$0xf] %v202_v10  ;;  %v204_v11 = vld [vmem:[%s859_s29 + $0x58] sm:$0xf]  ;;  %v206_v12 = vld [vmem:[%s859_s29 + $0x60] sm:$0xf] }
  0x1a   : > { %v208_v13 = vld [vmem:[%s859_s29 + $0x68] sm:$0xf]  ;;  %205 = vst [vmem:[%s163_s30 + $0x2c] sm:$0xf] %v204_v11  ;;  %207 = vst [vmem:[%s163_s30 + $0x30] sm:$0xf] %v206_v12 }
  0x1b   : > { %209 = vst [vmem:[%s163_s30 + $0x34] sm:$0xf] %v208_v13  ;;  %v210_v14 = vld [vmem:[%s859_s29 + $0x70] sm:$0xf]  ;;  %v212_v15 = vld [vmem:[%s859_s29 + $0x78] sm:$0xf] }
  0x1c   : > { %211 = vst [vmem:[%s163_s30 + $0x38] sm:$0xf] %v210_v14  ;;  %213 = vst [vmem:[%s163_s30 + $0x3c] sm:$0xf] %v212_v15 }
  0x1d PF: > { %p666_p7 = scmp.ge.s32.totalorder %s791_s17, 1  ;;  %p280_p8 = scmp.lt.s32.totalorder %s791_s17, 3 }
  0x1f   : > { %p281_p9 = pnand %p666_p7, %p280_p8 }
  0x20   : > { %s287_s5 = sand.u32 (!%p281_p9), 1, %s783_s15   ;;  %p317_p10 = scmp.lt.s32.totalorder (!%p281_p9), %s834_s18, 1 }
  0x21   : > { %284 = sbr.rel (%p281_p9) target bundleno = 350 (0x15e), region = 73  ;;  %s667_s8 = sshll.u32 (!%p281_p9), %s287_s5, 6 }
  0x22   : > { %s289_s9 = scalar_lea.vmem (!%p281_p9), [#allocation2], %s667_s8  ;;  %s668_s25 = sshll.u32 (!%p281_p9), %s287_s5, 4 }
  0x23   : > { %s316_s26 = scalar_lea.vmem (!%p281_p9), [#allocation3], %s668_s25 }
  0x26   : > { %v765_v16 = vld [vmem:[%s914_s0] sm:$0xff]   ;;  %v757_v17 = vld [vmem:[%s289_s9 + $0x38] sm:$0xff]   ;;  %v758_v18 = vld [vmem:[%s289_s9 + $0x30] sm:$0xff]   ;;  %s318_s12 = scalar_select %p317_p10, %s834_s18, 1  ;;  %v485_v59 = vlaneseq }
  0x27   : > { %729 = vmatprep.mubr.bf16.mxu0 %v765_v16  ;;  %713 = vmatprep.subr.bf16.mxu0 %v757_v17  ;;  %v759_v19 = vld [vmem:[%s289_s9 + $0x28] sm:$0xff]   ;;  %v760_v20 = vld [vmem:[%s289_s9 + $0x20] sm:$0xff]   ;;  %v761_v21 = vld [vmem:[%s289_s9 + $0x18] sm:$0xff]   ;;  %s685_s27 = sshll.u32 (%p849_p5), %s834_s18, 2 }
  0x28   : > { %714 = vmatpush3.bf16.msra.mxu0 %v757_v17  ;;  %v762_v22 = vld [vmem:[%s289_s9 + $0x10] sm:$0xff]   ;;  %v763_v23 = vld [vmem:[%s289_s9 + $0x8] sm:$0xff]   ;;  %v764_v24 = vld [vmem:[%s289_s9] sm:$0xff]   ;;  %s319_s17 = scalar_lea.vmem %s916_s2, %s318_s12  ;;  %v486_v60 = vshrl.u32 %v485_v59, 7  ;;  %s322_s24 = scalar_lea.vmem %s917_s3, %s318_s12 }
  0x29   : > { %715 = vmatprep.subr.bf16.mxu0 %v758_v18  ;;  %v766_v25 = vld [vmem:[%s914_s0 + $0x8] sm:$0xff]   ;;  %v483_v61 = vld [vmem:[%s319_s17] sm:$0x1]  ;;  %s532_s29 = scalar_lea.vmem (%p849_p5), %s918_s4, %s685_s27 }
  0x2a   : > { %v487_v62 = vsub.s32 0, %v486_v60  ;;  %v679_v2 = vld [vmem:[%s322_s24] ss:$0 sm:$0xff] }
  0x2c   : > { %716 = vmatpush3.bf16.msra.mxu0 %v758_v18 }
  0x2d   : > { %717 = vmatprep.subr.bf16.mxu0 %v759_v19 }
  0x30   : > { %718 = vmatpush3.bf16.msra.mxu0 %v759_v19 }
  0x31   : > { %719 = vmatprep.subr.bf16.mxu0 %v760_v20 }
  0x34   : > { %720 = vmatpush3.bf16.msra.mxu0 %v760_v20 }
  0x35   : > { %721 = vmatprep.subr.bf16.mxu0 %v761_v21 }
  0x38   : > { %722 = vmatpush3.bf16.msra.mxu0 %v761_v21 }
  0x39   : > { %723 = vmatprep.subr.bf16.mxu0 %v762_v22 }
  0x3c   : > { %724 = vmatpush3.bf16.msra.mxu0 %v762_v22 }
  0x3d   : > { %725 = vmatprep.subr.bf16.mxu0 %v763_v23 }
  0x40   : > { %726 = vmatpush3.bf16.msra.mxu0 %v763_v23 }
  0x41   : > { %727 = vmatprep.subr.bf16.mxu0 %v764_v24 }
  0x44   : > { %728 = vmatpush3.bf16.msra.mxu0 %v764_v24 }
  0x47   : > { %730 = vmatmul.mubr.bf16.vlgmr.msra.gmra.mxu0 %v766_v25 }
 0x107   : > { %v731_v26 = vpop.f32.mrf.mxu0 }
 0x109   : > { %v438_v27 = vpop.f32.mrf.mxu0 }
 0x10b   : > { %v732_v28 = vpop.f32.mrf.mxu0 }
 0x10d   : > { %v441_v29 = vpop.f32.mrf.mxu0 }
 0x10e   : > { %v453_v30 = vadd.f32 %v441_v29, %v438_v27 }
 0x110   : > { %v454_v31 = vadd.f32 %v731_v26, %v453_v30 }
 0x112   : > { %v455_v32 = vadd.f32 %v732_v28, %v454_v31 }
 0x114   : > { %v456_v33 = vrot.slane %v455_v32, 4 }
 0x116   : > { %v457_v34 = vadd.f32 %v456_v33, %v455_v32 }
 0x118   : > { %v458_v35 = vrot.slane %v457_v34, 2 }
 0x11a   : > { %v459_v36 = vadd.f32 %v458_v35, %v457_v34 }
 0x11c   : > { %v460_v37 = vrot.slane %v459_v36, 1 }
 0x11e   : > { %v461_v38 = vadd.f32 %v460_v37, %v459_v36 }
 0x120   : > { %v462_v39 = vmul.f32 0.03125, %v461_v38 }
 0x122   : > { %v463_v40 = vsub.f32 %v438_v27, %v462_v39  ;;  %v464_v41 = vsub.f32 %v441_v29, %v462_v39  ;;  %v465_v42 = vsub.f32 %v731_v26, %v462_v39  ;;  %v466_v43 = vsub.f32 %v732_v28, %v462_v39 }
 0x124   : > { %v467_v44 = vmul.f32 %v463_v40, %v463_v40  ;;  %v468_v45 = vmul.f32 %v464_v41, %v464_v41  ;;  %v469_v46 = vmul.f32 %v465_v42, %v465_v42  ;;  %v470_v48 = vmul.f32 %v466_v43, %v466_v43 }
 0x126   : > { %v471_v47 = vadd.f32 %v468_v45, %v467_v44 }
 0x128   : > { %v472_v49 = vadd.f32 %v471_v47, %v469_v46 }
 0x12a   : > { %v473_v50 = vadd.f32 %v472_v49, %v470_v48 }
 0x12c   : > { %v474_v51 = vrot.slane %v473_v50, 4 }
 0x12e   : > { %v475_v52 = vadd.f32 %v474_v51, %v473_v50 }
 0x130   : > { %v476_v53 = vrot.slane %v475_v52, 2 }
 0x132   : > { %v477_v54 = vadd.f32 %v476_v53, %v475_v52 }
 0x134   : > { %v478_v55 = vrot.slane %v477_v54, 1 }
 0x136   : > { %v479_v56 = vadd.f32 %v478_v55, %v477_v54 }
 0x138   : > { %v480_v57 = vmul.f32 0.03125, %v479_v56 }
 0x13a   : > { %v481_v58 = vadd.f32 1e-05, %v480_v57 }
 0x13c   : > { %767 = vrsqrt.f32 %v481_v58 }
 0x149   : > { %v768_v63 = vpop.eup %767 }
 0x14a   : > { %v484_v0 = vmul.f32 %v768_v63, %v483_v61 }
 0x14c   : > { %v488_v1 = vrot.slane %v484_v0, %v487_v62 }
 0x14e   : > { %v489_v3 = vmul.f32 %v488_v1, %v463_v40  ;;  %v490_v4 = vmul.f32 %v488_v1, %v464_v41  ;;  %v491_v5 = vmul.f32 %v488_v1, %v465_v42  ;;  %v492_v6 = vmul.f32 %v488_v1, %v466_v43 }
 0x150   : > { %v500_v7 = vadd.f32 %v679_v2, %v489_v3  ;;  %v501_v8 = vadd.f32 %v679_v2, %v490_v4  ;;  %v502_v9 = vadd.f32 %v679_v2, %v491_v5  ;;  %v503_v10 = vadd.f32 %v679_v2, %v492_v6  ;;  %530 = sbr.rel (!%p849_p5) target bundleno = 350 (0x15e), region = 81 }
 0x152   : > { %v695_v11 = vpack.c.bf16 %v501_v8, %v500_v7  ;;  %v700_v12 = vpack.c.bf16 %v503_v10, %v502_v9 }
 0x154   : > { %696 = vst [vmem:[%s316_s26] sm:$0xff] %v695_v11   ;;  %702 = vst [vmem:[%s316_s26 + $0x8] sm:$0xff] %v700_v12  }
 0x15b   : > { %v549_v13 = vld [vmem:[%s316_s26] sm:$0xf]  ;;  %v551_v14 = vld [vmem:[%s316_s26 + $0x4] sm:$0xf]  ;;  %v553_v15 = vld [vmem:[%s316_s26 + $0x8] sm:$0xf] }
 0x15c   : > { %v555_v16 = vld [vmem:[%s316_s26 + $0xc] sm:$0xf]  ;;  %550 = vst [vmem:[%s532_s29] sm:$0xf] %v549_v13  ;;  %552 = vst [vmem:[%s532_s29 + $0x8] sm:$0xf] %v551_v14 }
 0x15d   : > { %554 = vst [vmem:[%s532_s29 + $0x10] sm:$0xf] %v553_v15  ;;  %556 = vst [vmem:[%s532_s29 + $0x18] sm:$0xf] %v555_v16 }
 0x15e PF: > { %p11_p11 = scmp.ge.s32.totalorder %s837_s19, 4   ;;  %s920_s15 = smov %s787_s16 }
 0x15f   : > { %s921_s16 = smov %s847_s22  ;;  %s922_s17 = smov %s837_s19 }
 0x160   :  { %13 = sbr.rel (!%p11_p11) target bundleno = 2 (0x2), region = 159 }

// kernel: _lambda_.31
= control target key start
LH: loop header
LB: loop body
LE: loop exit
PB: predicated region body
PF: predicated region fallthrough
CT: control target
= control target key end

     0   :  { %v251_v61 = vlaneseq  ;;  %s503_s1 = inlined_call_operand.vmem [shape: bf16[256,128], index: 1, kind: input, shape index: {}]   ;;  %s504_s0 = inlined_call_operand.vmem [shape: bf16[32,256], index: 0, kind: input, shape index: {}]   ;;  %s505_s2 = inlined_call_operand.vmem [shape: f32[1,128], index: 2, kind: input, shape index: {}]   ;;  %s506_s3 = inlined_call_operand.vmem [shape: f32[1,128], index: 3, kind: input, shape index: {}]   ;;  %s507_s4 = inlined_call_operand.vmem [shape: bf16[32,128], index: 4, kind: output, shape index: {}]  }
   0x1   :  { %v382_v0 = vld [vmem:[%s503_s1 + $0x78] sm:$0xff]   ;;  %v384_v2 = vld [vmem:[%s503_s1 + $0x70] sm:$0xff]   ;;  %v386_v4 = vld [vmem:[%s503_s1 + $0x68] sm:$0xff]  }
   0x2   :  { %v383_v1 = vld [vmem:[%s503_s1 + $0x38] sm:$0xff]   ;;  %338 = vmatprep.subr.bf16.mxu0 %v382_v0  ;;  %366 = vmatprep.subr.bf16.mxu1 %v382_v0  ;;  %v385_v3 = vld [vmem:[%s503_s1 + $0x30] sm:$0xff]   ;;  %v387_v5 = vld [vmem:[%s503_s1 + $0x28] sm:$0xff]   ;;  %v252_v62 = vshrl.u32 %v251_v61, 7 }
   0x3   :  { %339 = vmatpush3.bf16.msra.mxu0 %v383_v1  ;;  %374 = vmatpush3.bf16.msra.mxu1 %v383_v1  ;;  %v388_v6 = vld [vmem:[%s503_s1 + $0x60] sm:$0xff]   ;;  %v390_v8 = vld [vmem:[%s503_s1 + $0x58] sm:$0xff]   ;;  %v392_v10 = vld [vmem:[%s503_s1 + $0x50] sm:$0xff]  }
   0x4   :  { %340 = vmatprep.subr.bf16.mxu0 %v384_v2  ;;  %367 = vmatprep.subr.bf16.mxu1 %v384_v2  ;;  %v389_v7 = vld [vmem:[%s503_s1 + $0x20] sm:$0xff]   ;;  %v391_v9 = vld [vmem:[%s503_s1 + $0x18] sm:$0xff]   ;;  %v393_v13 = vld [vmem:[%s503_s1 + $0x10] sm:$0xff]   ;;  %v253_v0 = vsub.s32 0, %v252_v62 }
   0x5   :  { %v400_v11 = vld [vmem:[%s504_s0 + $0x4] ss:$8 sps:$4 sm:$0xff]   ;;  %v403_v12 = vld [vmem:[%s504_s0 + $0x14] ss:$8 sps:$4 sm:$0xff]   ;;  %v398_v18 = vld [vmem:[%s504_s0] ss:$8 sps:$4 sm:$0xff]  }
   0x6   :  { %v394_v14 = vld [vmem:[%s503_s1 + $0x48] sm:$0xff]   ;;  %202 = vmatprep.mubr.bf16.mxu0 %v400_v11  ;;  %210 = vmatprep.mubr.bf16.mxu1 %v403_v12  ;;  %v396_v16 = vld [vmem:[%s503_s1 + $0x40] sm:$0xff]   ;;  %v401_v19 = vld [vmem:[%s504_s0 + $0x10] ss:$8 sps:$4 sm:$0xff]  }
   0x7   :  { %341 = vmatpush3.bf16.msra.mxu0 %v385_v3  ;;  %375 = vmatpush3.bf16.msra.mxu1 %v385_v3  ;;  %v395_v15 = vld [vmem:[%s503_s1 + $0x8] sm:$0xff]   ;;  %v397_v17 = vld [vmem:[%s503_s1] sm:$0xff]  }
   0x8   :  { %342 = vmatprep.subr.bf16.mxu0 %v386_v4  ;;  %368 = vmatprep.subr.bf16.mxu1 %v386_v4  ;;  %v249_v63 = vld [vmem:[%s505_s2] sm:$0x1] }
   0x9   :  { %v318_v4 = vld [vmem:[%s506_s3] ss:$0 sm:$0xff] }
   0xb   :  { %343 = vmatpush3.bf16.msra.mxu0 %v387_v5  ;;  %376 = vmatpush3.bf16.msra.mxu1 %v387_v5 }
   0xc   :  { %344 = vmatprep.subr.bf16.mxu0 %v388_v6  ;;  %369 = vmatprep.subr.bf16.mxu1 %v388_v6 }
   0xf   :  { %345 = vmatpush3.bf16.msra.mxu0 %v389_v7  ;;  %377 = vmatpush3.bf16.msra.mxu1 %v389_v7 }
  0x10   :  { %346 = vmatprep.subr.bf16.mxu0 %v390_v8  ;;  %370 = vmatprep.subr.bf16.mxu1 %v390_v8 }
  0x13   :  { %347 = vmatpush3.bf16.msra.mxu0 %v391_v9  ;;  %378 = vmatpush3.bf16.msra.mxu1 %v391_v9 }
  0x14   :  { %348 = vmatprep.subr.bf16.mxu0 %v392_v10  ;;  %371 = vmatprep.subr.bf16.mxu1 %v392_v10 }
  0x17   :  { %349 = vmatpush3.bf16.msra.mxu0 %v393_v13  ;;  %379 = vmatpush3.bf16.msra.mxu1 %v393_v13 }
  0x18   :  { %350 = vmatprep.subr.bf16.mxu0 %v394_v14  ;;  %372 = vmatprep.subr.bf16.mxu1 %v394_v14 }
  0x1b   :  { %351 = vmatpush3.bf16.msra.mxu0 %v395_v15  ;;  %380 = vmatpush3.bf16.msra.mxu1 %v395_v15 }
  0x1c   :  { %352 = vmatprep.subr.bf16.mxu0 %v396_v16  ;;  %373 = vmatprep.subr.bf16.mxu1 %v396_v16 }
  0x1f   :  { %353 = vmatpush3.bf16.msra.mxu0 %v397_v17  ;;  %381 = vmatpush3.bf16.msra.mxu1 %v397_v17 }
  0x22   :  { %203 = vmatmul.mubr.bf16.vlgmr.msra.gmra.mxu0 %v398_v18  ;;  %211 = vmatmul.mubr.bf16.vlgmr.msra.gmra.mxu1 %v401_v19 }
  0xe2   :  { %v354_v20 = vpop.f32.mrf.mxu0  ;;  %v360_v21 = vpop.f32.mrf.mxu1 }
  0xe4   :  { %v355_v22 = vpop.f32.mrf.mxu0  ;;  %v361_v23 = vpop.f32.mrf.mxu1 }
  0xe5   :  { %v356_v27 = vadd.f32 %v355_v22, %v354_v20  ;;  %v362_v30 = vadd.f32 %v361_v23, %v360_v21 }
  0xe6   :  { %v357_v24 = vpop.f32.mrf.mxu0  ;;  %v363_v25 = vpop.f32.mrf.mxu1 }
  0xe8   :  { %v358_v26 = vpop.f32.mrf.mxu0  ;;  %v364_v29 = vpop.f32.mrf.mxu1 }
  0xe9   :  { %v359_v28 = vadd.f32 %v358_v26, %v357_v24  ;;  %v365_v32 = vadd.f32 %v364_v29, %v363_v25 }
  0xeb   :  { %v219_v31 = vadd.f32 %v359_v28, %v356_v27 }
  0xed   :  { %v220_v33 = vadd.f32 %v362_v30, %v219_v31 }
  0xef   :  { %v221_v34 = vadd.f32 %v365_v32, %v220_v33 }
  0xf1   :  { %v222_v35 = vrot.slane %v221_v34, 4 }
  0xf3   :  { %v223_v36 = vadd.f32 %v222_v35, %v221_v34 }
  0xf5   :  { %v224_v37 = vrot.slane %v223_v36, 2 }
  0xf7   :  { %v225_v38 = vadd.f32 %v224_v37, %v223_v36 }
  0xf9   :  { %v226_v39 = vrot.slane %v225_v38, 1 }
  0xfb   :  { %v227_v40 = vadd.f32 %v226_v39, %v225_v38 }
  0xfd   :  { %v228_v41 = vmul.f32 0.03125, %v227_v40 }
  0xff   :  { %v229_v42 = vsub.f32 %v356_v27, %v228_v41  ;;  %v230_v43 = vsub.f32 %v359_v28, %v228_v41  ;;  %v231_v44 = vsub.f32 %v362_v30, %v228_v41  ;;  %v232_v45 = vsub.f32 %v365_v32, %v228_v41 }
 0x101   :  { %v233_v46 = vmul.f32 %v229_v42, %v229_v42  ;;  %v234_v47 = vmul.f32 %v230_v43, %v230_v43  ;;  %v235_v48 = vmul.f32 %v231_v44, %v231_v44  ;;  %v236_v50 = vmul.f32 %v232_v45, %v232_v45 }
 0x103   :  { %v237_v49 = vadd.f32 %v234_v47, %v233_v46 }
 0x105   :  { %v238_v51 = vadd.f32 %v237_v49, %v235_v48 }
 0x107   :  { %v239_v52 = vadd.f32 %v238_v51, %v236_v50 }
 0x109   :  { %v240_v53 = vrot.slane %v239_v52, 4 }
 0x10b   :  { %v241_v54 = vadd.f32 %v240_v53, %v239_v52 }
 0x10d   :  { %v242_v55 = vrot.slane %v241_v54, 2 }
 0x10f   :  { %v243_v56 = vadd.f32 %v242_v55, %v241_v54 }
 0x111   :  { %v244_v57 = vrot.slane %v243_v56, 1 }
 0x113   :  { %v245_v58 = vadd.f32 %v244_v57, %v243_v56 }
 0x115   :  { %v246_v59 = vmul.f32 0.03125, %v245_v58 }
 0x117   :  { %v247_v60 = vadd.f32 1e-05, %v246_v59 }
 0x119   :  { %404 = vrsqrt.f32 %v247_v60 }
 0x126   :  { %v405_v1 = vpop.eup %404 }
 0x127   :  { %v250_v2 = vmul.f32 %v405_v1, %v249_v63 }
 0x129   :  { %v254_v3 = vrot.slane %v250_v2, %v253_v0 }
 0x12b   :  { %v255_v5 = vmul.f32 %v254_v3, %v229_v42  ;;  %v256_v6 = vmul.f32 %v254_v3, %v230_v43  ;;  %v257_v7 = vmul.f32 %v254_v3, %v231_v44  ;;  %v258_v8 = vmul.f32 %v254_v3, %v232_v45 }
 0x12d   :  { %v266_v9 = vadd.f32 %v318_v4, %v255_v5  ;;  %v267_v10 = vadd.f32 %v318_v4, %v256_v6  ;;  %v268_v11 = vadd.f32 %v318_v4, %v257_v7  ;;  %v269_v12 = vadd.f32 %v318_v4, %v258_v8 }
 0x12f   :  { %v270_v13 = vmax.f32 %v266_v9, 0.0  ;;  %v271_v14 = vmax.f32 %v267_v10, 0.0  ;;  %v272_v15 = vmax.f32 %v268_v11, 0.0  ;;  %v273_v16 = vmax.f32 %v269_v12, 0.0 }
 0x131   :  { %v330_v17 = vpack.c.bf16 %v271_v14, %v270_v13  ;;  %v335_v18 = vpack.c.bf16 %v273_v16, %v272_v15 }
 0x133   :  { %331 = vst [vmem:[%s507_s4] sm:$0xff] %v330_v17   ;;  %337 = vst [vmem:[%s507_s4 + $0x8] sm:$0xff] %v335_v18  }

// kernel: _lambda_.28
= control target key start
LH: loop header
LB: loop body
LE: loop exit
PB: predicated region body
PF: predicated region fallthrough
CT: control target
= control target key end

     0   :  { %s1027_s1 = inlined_call_operand.vmem [shape: bf16[640,128], index: 1, kind: input, shape index: {}]   ;;  %s1028_s0 = inlined_call_operand.vmem [shape: bf16[32,640], index: 0, kind: input, shape index: {}]   ;;  %s1029_s2 = inlined_call_operand.vmem [shape: f32[1,128], index: 2, kind: input, shape index: {}]   ;;  %s1030_s3 = inlined_call_operand.vmem [shape: f32[1,128], index: 3, kind: input, shape index: {}]   ;;  %s1031_s4 = inlined_call_operand.vmem [shape: bf16[32,128], index: 4, kind: output, shape index: {}]  }
   0x1   :  { %v784_v0 = vld [vmem:[%s1027_s1 + $0x78] sm:$0xff]   ;;  %v788_v4 = vld [vmem:[%s1027_s1 + $0x70] sm:$0xff]   ;;  %v792_v8 = vld [vmem:[%s1027_s1 + $0x68] sm:$0xff]  }
   0x2   :  { %v785_v1 = vld [vmem:[%s1027_s1 + $0xf8] sm:$0xff]   ;;  %698 = vmatprep.subr.bf16.mxu0 %v784_v0  ;;  %v789_v5 = vld [vmem:[%s1027_s1 + $0xf0] sm:$0xff]   ;;  %v793_v9 = vld [vmem:[%s1027_s1 + $0xe8] sm:$0xff]  }
   0x3   :  { %v786_v2 = vld [vmem:[%s1027_s1 + $0x38] sm:$0xff]   ;;  %726 = vmatprep.subr.bf16.mxu1 %v785_v1  ;;  %v790_v6 = vld [vmem:[%s1027_s1 + $0x30] sm:$0xff]   ;;  %v794_v10 = vld [vmem:[%s1027_s1 + $0x28] sm:$0xff]  }
   0x4   :  { %v787_v3 = vld [vmem:[%s1027_s1 + $0xb8] sm:$0xff]   ;;  %699 = vmatpush3.bf16.msra.mxu0 %v786_v2  ;;  %v791_v7 = vld [vmem:[%s1027_s1 + $0xb0] sm:$0xff]   ;;  %v795_v11 = vld [vmem:[%s1027_s1 + $0xa8] sm:$0xff]  }
   0x5   :  { %727 = vmatpush3.bf16.msra.mxu1 %v787_v3  ;;  %700 = vmatprep.subr.bf16.mxu0 %v788_v4  ;;  %v796_v12 = vld [vmem:[%s1027_s1 + $0x60] sm:$0xff]   ;;  %v800_v16 = vld [vmem:[%s1027_s1 + $0x58] sm:$0xff]   ;;  %v804_v20 = vld [vmem:[%s1027_s1 + $0x50] sm:$0xff]  }
   0x6   :  { %728 = vmatprep.subr.bf16.mxu1 %v789_v5  ;;  %v797_v13 = vld [vmem:[%s1027_s1 + $0xe0] sm:$0xff]   ;;  %v801_v17 = vld [vmem:[%s1027_s1 + $0xd8] sm:$0xff]   ;;  %v805_v21 = vld [vmem:[%s1027_s1 + $0xd0] sm:$0xff]  }
   0x7   :  { %v798_v14 = vld [vmem:[%s1027_s1 + $0x20] sm:$0xff]   ;;  %v802_v18 = vld [vmem:[%s1027_s1 + $0x18] sm:$0xff]   ;;  %v806_v22 = vld [vmem:[%s1027_s1 + $0x10] sm:$0xff]  }
   0x8   :  { %701 = vmatpush3.bf16.msra.mxu0 %v790_v6  ;;  %v799_v15 = vld [vmem:[%s1027_s1 + $0xa0] sm:$0xff]   ;;  %v803_v19 = vld [vmem:[%s1027_s1 + $0x98] sm:$0xff]   ;;  %v807_v23 = vld [vmem:[%s1027_s1 + $0x90] sm:$0xff]  }
   0x9   :  { %729 = vmatpush3.bf16.msra.mxu1 %v791_v7  ;;  %702 = vmatprep.subr.bf16.mxu0 %v792_v8  ;;  %v808_v24 = vld [vmem:[%s1027_s1 + $0x48] sm:$0xff]   ;;  %v812_v28 = vld [vmem:[%s1027_s1 + $0x40] sm:$0xff]   ;;  %v822_v36 = vld [vmem:[%s1027_s1 + $0x138] sm:$0xff]  }
   0xa   :  { %730 = vmatprep.subr.bf16.mxu1 %v793_v9  ;;  %v809_v25 = vld [vmem:[%s1027_s1 + $0xc8] sm:$0xff]   ;;  %v813_v29 = vld [vmem:[%s1027_s1 + $0xc0] sm:$0xff]   ;;  %v823_v37 = vld [vmem:[%s1027_s1 + $0x130] sm:$0xff]  }
   0xb   :  { %v810_v26 = vld [vmem:[%s1027_s1 + $0x8] sm:$0xff]   ;;  %v814_v30 = vld [vmem:[%s1027_s1] sm:$0xff]   ;;  %v826_v45 = vld [vmem:[%s1027_s1 + $0x118] sm:$0xff]  }
   0xc   :  { %703 = vmatpush3.bf16.msra.mxu0 %v794_v10  ;;  %v811_v27 = vld [vmem:[%s1027_s1 + $0x88] sm:$0xff]   ;;  %v815_v31 = vld [vmem:[%s1027_s1 + $0x80] sm:$0xff]   ;;  %v833_v46 = vld [vmem:[%s1027_s1 + $0x110] sm:$0xff]  }
   0xd   :  { %731 = vmatpush3.bf16.msra.mxu1 %v795_v11  ;;  %704 = vmatprep.subr.bf16.mxu0 %v796_v12  ;;  %v816_v32 = vld [vmem:[%s1028_s0] ss:$20 sps:$4 sm:$0xff]   ;;  %v818_v33 = vld [vmem:[%s1028_s0 + $0x4] ss:$20 sps:$4 sm:$0xff]   ;;  %v819_v34 = vld [vmem:[%s1028_s0 + $0x8] ss:$20 sps:$4 sm:$0xff]  }
   0xe   :  { %732 = vmatprep.subr.bf16.mxu1 %v797_v13  ;;  %v821_v35 = vld [vmem:[%s1028_s0 + $0xc] ss:$20 sps:$4 sm:$0xff]   ;;  %434 = vmatprep.mubr.bf16.mxu0 %v818_v33  ;;  %v829_v40 = vld [vmem:[%s1028_s0 + $0x34] ss:$20 sps:$4 sm:$0xff]   ;;  %v832_v42 = vld [vmem:[%s1028_s0 + $0x30] ss:$20 sps:$4 sm:$0xff]  }
   0xf   :  { %483 = vmatprep.mubr.bf16.mxu1 %v821_v35  ;;  %v824_v38 = vld [vmem:[%s1027_s1 + $0x128] sm:$0xff]   ;;  %v825_v43 = vld [vmem:[%s1027_s1 + $0x120] sm:$0xff]  }
  0x10   :  { %705 = vmatpush3.bf16.msra.mxu0 %v798_v14  ;;  %v827_v39 = vld [vmem:[%s1028_s0 + $0x2c] ss:$20 sps:$4 sm:$0xff]   ;;  %v831_v41 = vld [vmem:[%s1028_s0 + $0x28] ss:$20 sps:$4 sm:$0xff]   ;;  %v836_v44 = vld [vmem:[%s1028_s0 + $0x10] ss:$20 sps:$4 sm:$0xff]  }
  0x11   :  { %733 = vmatpush3.bf16.msra.mxu1 %v799_v15  ;;  %706 = vmatprep.subr.bf16.mxu0 %v800_v16  ;;  %v834_v47 = vld [vmem:[%s1027_s1 + $0x108] sm:$0xff]   ;;  %v835_v48 = vld [vmem:[%s1027_s1 + $0x100] sm:$0xff]  }
  0x12   :  { %734 = vmatprep.subr.bf16.mxu1 %v801_v17  ;;  %v837_v49 = vld [vmem:[%s1028_s0 + $0x38] ss:$20 sps:$4 sm:$0xff]  }
  0x14   :  { %707 = vmatpush3.bf16.msra.mxu0 %v802_v18 }
  0x15   :  { %735 = vmatpush3.bf16.msra.mxu1 %v803_v19  ;;  %708 = vmatprep.subr.bf16.mxu0 %v804_v20 }
  0x16   :  { %736 = vmatprep.subr.bf16.mxu1 %v805_v21 }
  0x18   :  { %709 = vmatpush3.bf16.msra.mxu0 %v806_v22 }
  0x19   :  { %737 = vmatpush3.bf16.msra.mxu1 %v807_v23  ;;  %710 = vmatprep.subr.bf16.mxu0 %v808_v24 }
  0x1a   :  { %738 = vmatprep.subr.bf16.mxu1 %v809_v25 }
  0x1c   :  { %711 = vmatpush3.bf16.msra.mxu0 %v810_v26 }
  0x1d   :  { %739 = vmatpush3.bf16.msra.mxu1 %v811_v27  ;;  %712 = vmatprep.subr.bf16.mxu0 %v812_v28 }
  0x1e   :  { %740 = vmatprep.subr.bf16.mxu1 %v813_v29 }
  0x20   :  { %713 = vmatpush3.bf16.msra.mxu0 %v814_v30 }
  0x21   :  { %741 = vmatpush3.bf16.msra.mxu1 %v815_v31  ;;  %764 = vmatprep.subr.bf16.mxu0 %v822_v36 }
  0x23   :  { %435 = vmatmul.mubr.bf16.vlgmr.msra.gmra.mxu0 %v816_v32 }
  0x24   :  { %484 = vmatmul.mubr.bf16.vlgmr.msra.gmra.mxu1 %v819_v34  ;;  %765 = vmatpush3.bf16.msra.mxu0 %v822_v36 }
  0x25   :  { %766 = vmatprep.subr.bf16.mxu0 %v823_v37  ;;  %442 = vmatprep.mubr.bf16.mxu0 %v827_v39 }
  0x26   :  { %491 = vmatprep.mubr.bf16.mxu1 %v829_v40 }
  0x28   :  { %767 = vmatpush3.bf16.msra.mxu0 %v823_v37 }
  0x29   :  { %768 = vmatprep.subr.bf16.mxu0 %v824_v38 }
  0x2b   :  { %443 = vmatmul.mubr.bf16.gmra.mxu0 %v831_v41 }
  0x2c   :  { %492 = vmatmul.mubr.bf16.gmra.mxu1 %v832_v42  ;;  %769 = vmatpush3.bf16.msra.mxu0 %v824_v38 }
  0x2d   :  { %770 = vmatprep.subr.bf16.mxu0 %v825_v43  ;;  %780 = vmatprep.mubr.bf16.mxu0 %v836_v44 }
  0x30   :  { %771 = vmatpush3.bf16.msra.mxu0 %v825_v43 }
  0x31   :  { %772 = vmatprep.subr.bf16.mxu0 %v826_v45 }
  0x34   :  { %773 = vmatpush3.bf16.msra.mxu0 %v826_v45 }
  0x35   :  { %774 = vmatprep.subr.bf16.mxu0 %v833_v46 }
  0x38   :  { %775 = vmatpush3.bf16.msra.mxu0 %v833_v46 }
  0x39   :  { %776 = vmatprep.subr.bf16.mxu0 %v834_v47 }
  0x3c   :  { %777 = vmatpush3.bf16.msra.mxu0 %v834_v47 }
  0x3d   :  { %778 = vmatprep.subr.bf16.mxu0 %v835_v48 }
  0x40   :  { %779 = vmatpush3.bf16.msra.mxu0 %v835_v48 }
  0x43   :  { %781 = vmatmul.mubr.bf16.vlgmr.msra.gmra.mxu0 %v837_v49 }
  0xe3   :  { %v714_v50 = vpop.f32.mrf.mxu0 }
  0xe4   :  { %v742_v51 = vpop.f32.mrf.mxu1 }
  0xe5   :  { %v715_v52 = vpop.f32.mrf.mxu0 }
  0xe6   :  { %v743_v53 = vpop.f32.mrf.mxu1  ;;  %v716_v2 = vadd.f32 %v715_v52, %v714_v50 }
  0xe7   :  { %v717_v54 = vpop.f32.mrf.mxu0  ;;  %v744_v3 = vadd.f32 %v743_v53, %v742_v51  ;;  %v581_v51 = vlaneseq  ;;  %v579_v53 = vld [vmem:[%s1029_s2] sm:$0x1] }
  0xe8   :  { %v745_v55 = vpop.f32.mrf.mxu1 }
  0xe9   :  { %v718_v56 = vpop.f32.mrf.mxu0  ;;  %v486_v13 = vadd.f32 %v744_v3, %v716_v2  ;;  %v582_v52 = vshrl.u32 %v581_v51, 7 }
  0xea   :  { %v746_v58 = vpop.f32.mrf.mxu1  ;;  %v719_v4 = vadd.f32 %v718_v56, %v717_v54 }
  0xeb   :  { %v720_v57 = vpop.f32.mrf.mxu0  ;;  %v747_v5 = vadd.f32 %v746_v58, %v745_v55  ;;  %v583_v54 = vsub.s32 0, %v582_v52  ;;  %v678_v58 = vld [vmem:[%s1030_s3] ss:$0 sm:$0xff] }
  0xec   :  { %v748_v59 = vpop.f32.mrf.mxu1 }
  0xed   :  { %v721_v60 = vpop.f32.mrf.mxu0  ;;  %v489_v14 = vadd.f32 %v747_v5, %v719_v4 }
  0xee   :  { %v749_v61 = vpop.f32.mrf.mxu1  ;;  %v722_v8 = vadd.f32 %v721_v60, %v720_v57 }
  0xef   :  { %v723_v62 = vpop.f32.mrf.mxu0  ;;  %v750_v9 = vadd.f32 %v749_v61, %v748_v59 }
  0xf0   :  { %v751_v63 = vpop.f32.mrf.mxu1 }
  0xf1   :  { %v724_v0 = vpop.f32.mrf.mxu0  ;;  %v494_v16 = vadd.f32 %v750_v9, %v722_v8 }
  0xf2   :  { %v752_v6 = vpop.f32.mrf.mxu1  ;;  %v725_v11 = vadd.f32 %v724_v0, %v723_v62 }
  0xf3   :  { %v753_v12 = vadd.f32 %v752_v6, %v751_v63 }
  0xf5   :  { %v497_v20 = vadd.f32 %v753_v12, %v725_v11 }
 0x103   :  { %v782_v1 = vpop.f32.mrf.mxu0 }
 0x104   :  { %v543_v19 = vadd.f32 %v782_v1, %v494_v16 }
 0x105   :  { %v534_v7 = vpop.f32.mrf.mxu0 }
 0x106   :  { %v535_v17 = vadd.f32 %v534_v7, %v486_v13 }
 0x107   :  { %v783_v10 = vpop.f32.mrf.mxu0 }
 0x108   :  { %v546_v22 = vadd.f32 %v783_v10, %v497_v20 }
 0x109   :  { %v537_v15 = vpop.f32.mrf.mxu0 }
 0x10a   :  { %v538_v18 = vadd.f32 %v537_v15, %v489_v14 }
 0x10c   :  { %v549_v21 = vadd.f32 %v538_v18, %v535_v17 }
 0x10e   :  { %v550_v23 = vadd.f32 %v549_v21, %v543_v19 }
 0x110   :  { %v551_v24 = vadd.f32 %v550_v23, %v546_v22 }
 0x112   :  { %v552_v25 = vrot.slane %v551_v24, 4 }
 0x114   :  { %v553_v26 = vadd.f32 %v552_v25, %v551_v24 }
 0x116   :  { %v554_v27 = vrot.slane %v553_v26, 2 }
 0x118   :  { %v555_v28 = vadd.f32 %v554_v27, %v553_v26 }
 0x11a   :  { %v556_v29 = vrot.slane %v555_v28, 1 }
 0x11c   :  { %v557_v30 = vadd.f32 %v556_v29, %v555_v28 }
 0x11e   :  { %v558_v31 = vmul.f32 0.03125, %v557_v30 }
 0x120   :  { %v559_v32 = vsub.f32 %v535_v17, %v558_v31  ;;  %v560_v33 = vsub.f32 %v538_v18, %v558_v31  ;;  %v561_v34 = vsub.f32 %v543_v19, %v558_v31  ;;  %v562_v35 = vsub.f32 %v546_v22, %v558_v31 }
 0x122   :  { %v563_v36 = vmul.f32 %v559_v32, %v559_v32  ;;  %v564_v37 = vmul.f32 %v560_v33, %v560_v33  ;;  %v565_v38 = vmul.f32 %v561_v34, %v561_v34  ;;  %v566_v40 = vmul.f32 %v562_v35, %v562_v35 }
 0x124   :  { %v567_v39 = vadd.f32 %v564_v37, %v563_v36 }
 0x126   :  { %v568_v41 = vadd.f32 %v567_v39, %v565_v38 }
 0x128   :  { %v569_v42 = vadd.f32 %v568_v41, %v566_v40 }
 0x12a   :  { %v570_v43 = vrot.slane %v569_v42, 4 }
 0x12c   :  { %v571_v44 = vadd.f32 %v570_v43, %v569_v42 }
 0x12e   :  { %v572_v45 = vrot.slane %v571_v44, 2 }
 0x130   :  { %v573_v46 = vadd.f32 %v572_v45, %v571_v44 }
 0x132   :  { %v574_v47 = vrot.slane %v573_v46, 1 }
 0x134   :  { %v575_v48 = vadd.f32 %v574_v47, %v573_v46 }
 0x136   :  { %v576_v49 = vmul.f32 0.03125, %v575_v48 }
 0x138   :  { %v577_v50 = vadd.f32 1e-05, %v576_v49 }
 0x13a   :  { %838 = vrsqrt.f32 %v577_v50 }
 0x147   :  { %v839_v55 = vpop.eup %838 }
 0x148   :  { %v580_v56 = vmul.f32 %v839_v55, %v579_v53 }
 0x14a   :  { %v584_v57 = vrot.slane %v580_v56, %v583_v54 }
 0x14c   :  { %v585_v59 = vmul.f32 %v584_v57, %v559_v32  ;;  %v586_v60 = vmul.f32 %v584_v57, %v560_v33  ;;  %v587_v61 = vmul.f32 %v584_v57, %v561_v34  ;;  %v588_v62 = vmul.f32 %v584_v57, %v562_v35 }
 0x14e   :  { %v596_v63 = vadd.f32 %v678_v58, %v585_v59  ;;  %v597_v0 = vadd.f32 %v678_v58, %v586_v60  ;;  %v598_v1 = vadd.f32 %v678_v58, %v587_v61  ;;  %v599_v2 = vadd.f32 %v678_v58, %v588_v62 }
 0x150   :  { %v600_v3 = vmax.f32 %v596_v63, 0.0  ;;  %v601_v4 = vmax.f32 %v597_v0, 0.0  ;;  %v602_v5 = vmax.f32 %v598_v1, 0.0  ;;  %v603_v6 = vmax.f32 %v599_v2, 0.0 }
 0x152   :  { %v690_v7 = vpack.c.bf16 %v601_v4, %v600_v3  ;;  %v695_v8 = vpack.c.bf16 %v603_v6, %v602_v5 }
 0x154   :  { %691 = vst [vmem:[%s1031_s4] sm:$0xff] %v690_v7   ;;  %697 = vst [vmem:[%s1031_s4 + $0x8] sm:$0xff] %v695_v8  }

// kernel: _lambda_.40
= control target key start
LH: loop header
LB: loop body
LE: loop exit
PB: predicated region body
PF: predicated region fallthrough
CT: control target
= control target key end

     0   :  { %s747_s18 = smov 0   ;;  %s749_s19 = smov 0   ;;  %s831_s0 = inlined_call_operand.vmem [shape: bf16[8,128], index: 0, kind: input, shape index: {}]   ;;  %s832_s1 = inlined_call_operand.vmem [shape: bf16[128,512], index: 1, kind: input, shape index: {}]   ;;  %s833_s2 = inlined_call_operand.vmem [shape: f32[1,512], index: 2, kind: input, shape index: {}]   ;;  %s834_s3 = inlined_call_operand.vmem [shape: f32[1,512], index: 3, kind: input, shape index: {}]   ;;  %s835_s4 = inlined_call_operand.vmem [shape: bf16[8,512], index: 4, kind: input, shape index: {}]   ;;  %s836_s5 = inlined_call_operand.vmem [shape: bf16[8,512], index: 5, kind: output, shape index: {}]  }
   0x1   :  { %s751_s20 = smov 0  }
   0x2 LB: > { %s605_s21 = sadd.s32 4294967295, %s713_s20   ;;  %s764_s22 = sadd.s32 1, %s713_s20   ;;  %s713_s20 = sphi %s751_s20, %s839_s20   ;;  %s709_s19 = sphi %s749_s19, %s838_s19   ;;  %s705_s18 = sphi %s747_s18, %s837_s18  }
   0x3   : > { %s40_s23 = ssub.s32 %s713_s20, %s764_s22  ;;  %s43_s24 = sadd.s32 1, %s709_s19 }
   0x4   : > { %p41_p0 = scmp.eq.s32.totalorder %s40_s23, 0  ;;  %p50_p1 = scmp.ne.s32.totalorder %s709_s19, %s705_s18 }
   0x5   : > { %p51_p2 = scmp.eq.s32.totalorder %s713_s20, 0  ;;  %p608_p4 = scmp.ge.s32.totalorder %s713_s20, 4 }
   0x6   : > { %s773_s25 = scalar_select %p41_p0, %s709_s19, %s43_s24  }
   0x7   : > { %p52_p3 = por %p51_p2, %p50_p1  ;;  %183 = sbr.rel (%p608_p4) target bundleno = 27 (0x1b), region = 20 }
   0xc   : > { %186 = sbr.rel (!%p52_p3) target bundleno = 27 (0x1b), region = 24  ;;  %s188_s26 = sand.u32 (%p52_p3), 1, %s709_s19  }
   0xd   : > { %s610_s27 = sshll.u32 (%p52_p3), %s713_s20, 2  ;;  %s609_s28 = sshll.u32 (%p52_p3), %s188_s26, 6 }
   0xe   : > { %s781_s6 = scalar_lea.vmem (%p52_p3), %s832_s1, %s610_s27  ;;  %s190_s7 = scalar_lea.vmem (%p52_p3), [#allocation2], %s609_s28 }
   0xf   : > { %v209_v0 = vld [vmem:[%s781_s6] sm:$0xf] (%p52_p3)  ;;  %v211_v1 = vld [vmem:[%s781_s6 + $0x10] sm:$0xf] (%p52_p3) }
  0x10   : > { %210 = vst [vmem:[%s190_s7] sm:$0xf] (%p52_p3), %v209_v0  ;;  %212 = vst [vmem:[%s190_s7 + $0x4] sm:$0xf] (%p52_p3), %v211_v1  ;;  %v213_v2 = vld [vmem:[%s781_s6 + $0x20] sm:$0xf] (%p52_p3) }
  0x11   : > { %v215_v3 = vld [vmem:[%s781_s6 + $0x30] sm:$0xf]  ;;  %v217_v4 = vld [vmem:[%s781_s6 + $0x40] sm:$0xf]  ;;  %214 = vst [vmem:[%s190_s7 + $0x8] sm:$0xf] %v213_v2 }
  0x12   : > { %216 = vst [vmem:[%s190_s7 + $0xc] sm:$0xf] %v215_v3  ;;  %218 = vst [vmem:[%s190_s7 + $0x10] sm:$0xf] %v217_v4  ;;  %v219_v5 = vld [vmem:[%s781_s6 + $0x50] sm:$0xf] }
  0x13   : > { %v221_v6 = vld [vmem:[%s781_s6 + $0x60] sm:$0xf]  ;;  %v223_v7 = vld [vmem:[%s781_s6 + $0x70] sm:$0xf]  ;;  %220 = vst [vmem:[%s190_s7 + $0x14] sm:$0xf] %v219_v5 }
  0x14   : > { %222 = vst [vmem:[%s190_s7 + $0x18] sm:$0xf] %v221_v6  ;;  %224 = vst [vmem:[%s190_s7 + $0x1c] sm:$0xf] %v223_v7  ;;  %v225_v8 = vld [vmem:[%s781_s6 + $0x80] sm:$0xf] }
  0x15   : > { %v227_v9 = vld [vmem:[%s781_s6 + $0x90] sm:$0xf]  ;;  %v229_v10 = vld [vmem:[%s781_s6 + $0xa0] sm:$0xf]  ;;  %226 = vst [vmem:[%s190_s7 + $0x20] sm:$0xf] %v225_v8 }
  0x16   : > { %228 = vst [vmem:[%s190_s7 + $0x24] sm:$0xf] %v227_v9  ;;  %230 = vst [vmem:[%s190_s7 + $0x28] sm:$0xf] %v229_v10  ;;  %v231_v11 = vld [vmem:[%s781_s6 + $0xb0] sm:$0xf] }
  0x17   : > { %v233_v12 = vld [vmem:[%s781_s6 + $0xc0] sm:$0xf]  ;;  %v235_v13 = vld [vmem:[%s781_s6 + $0xd0] sm:$0xf]  ;;  %232 = vst [vmem:[%s190_s7 + $0x2c] sm:$0xf] %v231_v11 }
  0x18   : > { %234 = vst [vmem:[%s190_s7 + $0x30] sm:$0xf] %v233_v12  ;;  %236 = vst [vmem:[%s190_s7 + $0x34] sm:$0xf] %v235_v13  ;;  %v237_v14 = vld [vmem:[%s781_s6 + $0xe0] sm:$0xf] }
  0x19   : > { %v239_v15 = vld [vmem:[%s781_s6 + $0xf0] sm:$0xf]  ;;  %238 = vst [vmem:[%s190_s7 + $0x38] sm:$0xf] %v237_v14 }
  0x1a   : > { %240 = vst [vmem:[%s190_s7 + $0x3c] sm:$0xf] %v239_v15 }
  0x1b PF: > { %p611_p5 = scmp.ge.s32.totalorder %s713_s20, 1  ;;  %p314_p6 = scmp.lt.s32.totalorder %s713_s20, 5 }
  0x1d   : > { %p315_p7 = pnand %p611_p5, %p314_p6 }
  0x1e   : > { %s321_s8 = sand.u32 (!%p315_p7), 1, %s705_s18   ;;  %p357_p8 = scmp.lt.s32.totalorder (!%p315_p7), %s605_s21, 3 }
  0x1f   : > { %318 = sbr.rel (%p315_p7) target bundleno = 325 (0x145), region = 77  ;;  %s612_s9 = sshll.u32 (!%p315_p7), %s321_s8, 6 }
  0x20   : > { %s323_s10 = scalar_lea.vmem (!%p315_p7), [#allocation2], %s612_s9 }
  0x24   : > { %v715_v16 = vmov 0.0   ;;  %vm716_vm0 = vmmov 0   ;;  %v681_v17 = vld [vmem:[%s323_s10 + $0x38] sm:$0xff]   ;;  %v682_v18 = vld [vmem:[%s323_s10 + $0x30] sm:$0xff]   ;;  %v683_v19 = vld [vmem:[%s323_s10 + $0x28] sm:$0xff]   ;;  %s841_s21 = smov (!%p357_p8, %s605_s21), 3  ;;  %v497_v47 = vlaneseq }
  0x25   : > { %635 = vmatprep.subr.bf16.mxu0 %v715_v16  ;;  %651 = vmatprep.mubr.msk.bf16.mxu0 %vm716_vm0, %v715_v16  ;;  %v684_v20 = vld [vmem:[%s323_s10 + $0x20] sm:$0xff]   ;;  %v685_v21 = vld [vmem:[%s323_s10 + $0x18] sm:$0xff]   ;;  %v686_v22 = vld [vmem:[%s323_s10 + $0x10] sm:$0xff]   ;;  %s359_s15 = scalar_lea.vmem %s833_s2, %s841_s21  ;;  %s613_s16 = sshll.u32 %s841_s21, 2 }
  0x26   : > { %636 = vmatpush3.bf16.msra.mxu0 %v681_v17  ;;  %v687_v23 = vld [vmem:[%s323_s10 + $0x8] sm:$0xff]   ;;  %v688_v24 = vld [vmem:[%s323_s10] sm:$0xff]   ;;  %v498_v48 = vshrl.u32 %v497_v47, 7  ;;  %s366_s23 = scalar_lea.vmem %s835_s4, %s613_s16  ;;  %s362_s27 = scalar_lea.vmem %s834_s3, %s841_s21 }
  0x27   : > { %637 = vmatprep.subr.bf16.mxu0 %v715_v16  ;;  %v372_v25 = vld [vmem:[%s831_s0] sm:$0xf]  ;;  %s370_s29 = scalar_lea.vmem %s836_s5, %s613_s16 }
  0x28   : > { %v495_v49 = vld [vmem:[%s359_s15] sm:$0x1]  ;;  %v499_v50 = vsub.s32 0, %v498_v48 }
  0x29   : > { %v510_v53 = vld [vmem:[%s366_s23] sm:$0xf] }
  0x2a   : > { %638 = vmatpush3.bf16.msra.mxu0 %v682_v18  ;;  %v623_v55 = vld [vmem:[%s362_s27] ss:$0 sm:$0xff]  ;;  %v511_v57 = vunpack.c.l.bf16 %v510_v53 }
  0x2b   : > { %639 = vmatprep.subr.bf16.mxu0 %v715_v16 }
  0x2e   : > { %640 = vmatpush3.bf16.msra.mxu0 %v683_v19 }
  0x2f   : > { %641 = vmatprep.subr.bf16.mxu0 %v715_v16 }
  0x32   : > { %642 = vmatpush3.bf16.msra.mxu0 %v684_v20 }
  0x33   : > { %643 = vmatprep.subr.bf16.mxu0 %v715_v16 }
  0x36   : > { %644 = vmatpush3.bf16.msra.mxu0 %v685_v21 }
  0x37   : > { %645 = vmatprep.subr.bf16.mxu0 %v715_v16 }
  0x3a   : > { %646 = vmatpush3.bf16.msra.mxu0 %v686_v22 }
  0x3b   : > { %647 = vmatprep.subr.bf16.mxu0 %v715_v16 }
  0x3e   : > { %648 = vmatpush3.bf16.msra.mxu0 %v687_v23 }
  0x3f   : > { %649 = vmatprep.subr.bf16.mxu0 %v715_v16 }
  0x42   : > { %650 = vmatpush3.bf16.msra.mxu0 %v688_v24 }
  0x45   : > { %652 = vmatmul.mubr.bf16.vlgmr.msra.gmra.mxu0 %v372_v25 }
 0x105   : > { %v471_v26 = vpop.f32.mrf.mxu0 }
 0x106   : > { %v477_v27 = vrot.slane %v471_v26, 4 }
 0x107   : > { %v653_v28 = vpop.f32.mrf.mxu0 }
 0x108   : > { %v478_v29 = vadd.f32 %v477_v27, %v471_v26 }
 0x109   : > { %v474_v30 = vpop.f32.mrf.mxu0 }
 0x10a   : > { %v479_v31 = vrot.slane %v478_v29, 2 }
 0x10b   : > { %v654_v32 = vpop.f32.mrf.mxu0 }
 0x10c   : > { %v480_v33 = vadd.f32 %v479_v31, %v478_v29 }
 0x10e   : > { %v481_v34 = vrot.slane %v480_v33, 1 }
 0x110   : > { %v482_v35 = vadd.f32 %v481_v34, %v480_v33 }
 0x112   : > { %v483_v36 = vmul.f32 0.125, %v482_v35 }
 0x114   : > { %v484_v37 = vsub.f32 %v471_v26, %v483_v36 }
 0x116   : > { %v485_v38 = vmul.f32 %v484_v37, %v484_v37 }
 0x118   : > { %v486_v39 = vrot.slane %v485_v38, 4 }
 0x11a   : > { %v487_v40 = vadd.f32 %v486_v39, %v485_v38 }
 0x11c   : > { %v488_v41 = vrot.slane %v487_v40, 2 }
 0x11e   : > { %v489_v42 = vadd.f32 %v488_v41, %v487_v40 }
 0x120   : > { %v490_v43 = vrot.slane %v489_v42, 1 }
 0x122   : > { %v491_v44 = vadd.f32 %v490_v43, %v489_v42 }
 0x124   : > { %v492_v45 = vmul.f32 0.125, %v491_v44 }
 0x126   : > { %v493_v46 = vadd.f32 1e-05, %v492_v45 }
 0x128   : > { %689 = vrsqrt.f32 %v493_v46 }
 0x135   : > { %v690_v51 = vpop.eup %689 }
 0x136   : > { %v496_v52 = vmul.f32 %v690_v51, %v495_v49 }
 0x138   : > { %v500_v54 = vrot.slane %v496_v52, %v499_v50 }
 0x13a   : > { %v501_v56 = vmul.f32 %v500_v54, %v484_v37 }
 0x13c   : > { %v509_v58 = vadd.f32 %v623_v55, %v501_v56 }
 0x13e   : > { %v512_v59 = vadd.f32 %v511_v57, %v509_v58 }
 0x140   : > { %v513_v60 = vmax.f32 %v512_v59, 0.0 }
 0x142   : > { %v514_v61 = vpack.c.bf16 %v513_v60, %v513_v60 }
 0x144   : > { %515 = vst [vmem:[%s370_s29] sm:$0xf] %v514_v61 }
 0x145 PF: > { %p12_p9 = scmp.ge.s32.totalorder %s764_s22, 6   ;;  %s837_s18 = smov %s709_s19 }
 0x146   : > { %s838_s19 = smov %s773_s25  ;;  %s839_s20 = smov %s764_s22 }
 0x147   :  { %14 = sbr.rel (!%p12_p9) target bundleno = 2 (0x2), region = 125 }

// kernel: _lambda_.39
= control target key start
LH: loop header
LB: loop body
LE: loop exit
PB: predicated region body
PF: predicated region fallthrough
CT: control target
= control target key end

     0   :  { %s825_s15 = smov 0   ;;  %s827_s16 = smov 0   ;;  %s974_s0 = inlined_call_operand.vmem [shape: bf16[8,256], index: 0, kind: input, shape index: {}]   ;;  %s975_s1 = inlined_call_operand.vmem [shape: bf16[256,512], index: 1, kind: input, shape index: {}]   ;;  %s976_s2 = inlined_call_operand.vmem [shape: f32[1,512], index: 2, kind: input, shape index: {}]   ;;  %s977_s3 = inlined_call_operand.vmem [shape: f32[1,512], index: 3, kind: input, shape index: {}]   ;;  %s978_s4 = inlined_call_operand.vmem [shape: bf16[8,512], index: 4, kind: output, shape index: {}]  }
   0x1   :  { %s829_s17 = smov 0  }
   0x2 LB: > { %s680_s18 = sadd.s32 4294967295, %s798_s17   ;;  %s842_s19 = sadd.s32 1, %s798_s17   ;;  %s798_s17 = sphi %s829_s17, %s981_s17   ;;  %s794_s16 = sphi %s827_s16, %s980_s16   ;;  %s790_s15 = sphi %s825_s15, %s979_s15  }
   0x3   : > { %s39_s20 = ssub.s32 %s798_s17, %s842_s19  ;;  %s42_s21 = sadd.s32 1, %s794_s16 }
   0x4   : > { %p40_p0 = scmp.eq.s32.totalorder %s39_s20, 0  ;;  %p49_p1 = scmp.ne.s32.totalorder %s794_s16, %s790_s15 }
   0x5   : > { %p50_p2 = scmp.eq.s32.totalorder %s798_s17, 0  ;;  %p683_p4 = scmp.ge.s32.totalorder %s798_s17, 4 }
   0x6   : > { %s851_s22 = scalar_select %p40_p0, %s794_s16, %s42_s21  }
   0x7   : > { %p51_p3 = por %p50_p2, %p49_p1  ;;  %156 = sbr.rel (%p683_p4) target bundleno = 37 (0x25), region = 20 }
   0xc   : > { %159 = sbr.rel (!%p51_p3) target bundleno = 37 (0x25), region = 24  ;;  %s161_s23 = sand.u32 (%p51_p3), 1, %s794_s16  }
   0xd   : > { %s685_s24 = sshll.u32 (%p51_p3), %s798_s17, 2  ;;  %s684_s25 = sshll.u32 (%p51_p3), %s161_s23, 7 }
   0xe   : > { %s859_s28 = scalar_lea.vmem (%p51_p3), %s975_s1, %s685_s24  ;;  %s863_s29 = scalar_lea.vmem (%p51_p3), [#allocation2], %s684_s25 }
   0xf   : > { %v182_v0 = vld [vmem:[%s859_s28] sm:$0xf] (%p51_p3)  ;;  %v184_v1 = vld [vmem:[%s859_s28 + $0x10] sm:$0xf] (%p51_p3) }
  0x10   : > { %183 = vst [vmem:[%s863_s29] sm:$0xf] (%p51_p3), %v182_v0  ;;  %185 = vst [vmem:[%s863_s29 + $0x4] sm:$0xf] (%p51_p3), %v184_v1  ;;  %v186_v2 = vld [vmem:[%s859_s28 + $0x20] sm:$0xf] (%p51_p3) }
  0x11   : > { %v188_v3 = vld [vmem:[%s859_s28 + $0x30] sm:$0xf]  ;;  %v190_v4 = vld [vmem:[%s859_s28 + $0x40] sm:$0xf]  ;;  %187 = vst [vmem:[%s863_s29 + $0x8] sm:$0xf] %v186_v2 }
  0x12   : > { %189 = vst [vmem:[%s863_s29 + $0xc] sm:$0xf] %v188_v3  ;;  %191 = vst [vmem:[%s863_s29 + $0x10] sm:$0xf] %v190_v4  ;;  %v192_v5 = vld [vmem:[%s859_s28 + $0x50] sm:$0xf] }
  0x13   : > { %v194_v6 = vld [vmem:[%s859_s28 + $0x60] sm:$0xf]  ;;  %v196_v7 = vld [vmem:[%s859_s28 + $0x70] sm:$0xf]  ;;  %193 = vst [vmem:[%s863_s29 + $0x14] sm:$0xf] %v192_v5 }
  0x14   : > { %195 = vst [vmem:[%s863_s29 + $0x18] sm:$0xf] %v194_v6  ;;  %197 = vst [vmem:[%s863_s29 + $0x1c] sm:$0xf] %v196_v7  ;;  %v198_v8 = vld [vmem:[%s859_s28 + $0x80] sm:$0xf] }
  0x15   : > { %v200_v9 = vld [vmem:[%s859_s28 + $0x90] sm:$0xf]  ;;  %v202_v10 = vld [vmem:[%s859_s28 + $0xa0] sm:$0xf]  ;;  %199 = vst [vmem:[%s863_s29 + $0x20] sm:$0xf] %v198_v8 }
  0x16   : > { %201 = vst [vmem:[%s863_s29 + $0x24] sm:$0xf] %v200_v9  ;;  %203 = vst [vmem:[%s863_s29 + $0x28] sm:$0xf] %v202_v10  ;;  %v204_v11 = vld [vmem:[%s859_s28 + $0xb0] sm:$0xf] }
  0x17   : > { %v206_v12 = vld [vmem:[%s859_s28 + $0xc0] sm:$0xf]  ;;  %v208_v13 = vld [vmem:[%s859_s28 + $0xd0] sm:$0xf]  ;;  %205 = vst [vmem:[%s863_s29 + $0x2c] sm:$0xf] %v204_v11 }
  0x18   : > { %207 = vst [vmem:[%s863_s29 + $0x30] sm:$0xf] %v206_v12  ;;  %209 = vst [vmem:[%s863_s29 + $0x34] sm:$0xf] %v208_v13  ;;  %v210_v14 = vld [vmem:[%s859_s28 + $0xe0] sm:$0xf] }
  0x19   : > { %v212_v15 = vld [vmem:[%s859_s28 + $0xf0] sm:$0xf]  ;;  %v214_v16 = vld [vmem:[%s859_s28 + $0x100] sm:$0xf]  ;;  %211 = vst [vmem:[%s863_s29 + $0x38] sm:$0xf] %v210_v14 }
  0x1a   : > { %213 = vst [vmem:[%s863_s29 + $0x3c] sm:$0xf] %v212_v15  ;;  %215 = vst [vmem:[%s863_s29 + $0x40] sm:$0xf] %v214_v16  ;;  %v216_v17 = vld [vmem:[%s859_s28 + $0x110] sm:$0xf] }
  0x1b   : > { %v218_v18 = vld [vmem:[%s859_s28 + $0x120] sm:$0xf]  ;;  %v220_v19 = vld [vmem:[%s859_s28 + $0x130] sm:$0xf]  ;;  %217 = vst [vmem:[%s863_s29 + $0x44] sm:$0xf] %v216_v17 }
  0x1c   : > { %219 = vst [vmem:[%s863_s29 + $0x48] sm:$0xf] %v218_v18  ;;  %221 = vst [vmem:[%s863_s29 + $0x4c] sm:$0xf] %v220_v19  ;;  %v222_v20 = vld [vmem:[%s859_s28 + $0x140] sm:$0xf] }
  0x1d   : > { %v224_v21 = vld [vmem:[%s859_s28 + $0x150] sm:$0xf]  ;;  %v226_v22 = vld [vmem:[%s859_s28 + $0x160] sm:$0xf]  ;;  %223 = vst [vmem:[%s863_s29 + $0x50] sm:$0xf] %v222_v20 }
  0x1e   : > { %225 = vst [vmem:[%s863_s29 + $0x54] sm:$0xf] %v224_v21  ;;  %227 = vst [vmem:[%s863_s29 + $0x58] sm:$0xf] %v226_v22  ;;  %v228_v23 = vld [vmem:[%s859_s28 + $0x170] sm:$0xf] }
  0x1f   : > { %v230_v24 = vld [vmem:[%s859_s28 + $0x180] sm:$0xf]  ;;  %v232_v25 = vld [vmem:[%s859_s28 + $0x190] sm:$0xf]  ;;  %229 = vst [vmem:[%s863_s29 + $0x5c] sm:$0xf] %v228_v23 }
  0x20   : > { %231 = vst [vmem:[%s863_s29 + $0x60] sm:$0xf] %v230_v24  ;;  %233 = vst [vmem:[%s863_s29 + $0x64] sm:$0xf] %v232_v25  ;;  %v234_v26 = vld [vmem:[%s859_s28 + $0x1a0] sm:$0xf] }
  0x21   : > { %v236_v27 = vld [vmem:[%s859_s28 + $0x1b0] sm:$0xf]  ;;  %v238_v28 = vld [vmem:[%s859_s28 + $0x1c0] sm:$0xf]  ;;  %235 = vst [vmem:[%s863_s29 + $0x68] sm:$0xf] %v234_v26 }
  0x22   : > { %237 = vst [vmem:[%s863_s29 + $0x6c] sm:$0xf] %v236_v27  ;;  %239 = vst [vmem:[%s863_s29 + $0x70] sm:$0xf] %v238_v28  ;;  %v240_v29 = vld [vmem:[%s859_s28 + $0x1d0] sm:$0xf] }
  0x23   : > { %v242_v30 = vld [vmem:[%s859_s28 + $0x1e0] sm:$0xf]  ;;  %v244_v31 = vld [vmem:[%s859_s28 + $0x1f0] sm:$0xf]  ;;  %241 = vst [vmem:[%s863_s29 + $0x74] sm:$0xf] %v240_v29 }
  0x24   : > { %243 = vst [vmem:[%s863_s29 + $0x78] sm:$0xf] %v242_v30  ;;  %245 = vst [vmem:[%s863_s29 + $0x7c] sm:$0xf] %v244_v31 }
  0x25 PF: > { %p686_p5 = scmp.ge.s32.totalorder %s798_s17, 1  ;;  %p344_p6 = scmp.lt.s32.totalorder %s798_s17, 5 }
  0x27   : > { %p345_p7 = pnand %p686_p5, %p344_p6 }
  0x28   : > { %s351_s30 = sand.u32 (!%p345_p7), 1, %s790_s15   ;;  %p381_p8 = scmp.lt.s32.totalorder (!%p345_p7), %s680_s18, 3 }
  0x29   : > { %348 = sbr.rel (%p345_p7) target bundleno = 335 (0x14f), region = 73  ;;  %s687_s7 = sshll.u32 (!%p345_p7), %s351_s30, 7 }
  0x2a   : > { %s933_s8 = scalar_lea.vmem (!%p345_p7), [#allocation2], %s687_s7 }
  0x2e   : > { %v392_v32 = vld [vmem:[%s974_s0] sm:$0xff]  ;;  %v756_v34 = vld [vmem:[%s933_s8 + $0x78] sm:$0xff]   ;;  %v758_v36 = vld [vmem:[%s933_s8 + $0x70] sm:$0xff]   ;;  %s983_s18 = smov (!%p381_p8, %s680_s18), 3  ;;  %v588_v9 = vlaneseq }
  0x2f   : > { %v690_v33 = vcombine.high %v392_v32, %v392_v32  ;;  %v757_v35 = vld [vmem:[%s933_s8 + $0x38] sm:$0xff]   ;;  %710 = vmatprep.subr.bf16.mxu0 %v756_v34  ;;  %v759_v37 = vld [vmem:[%s933_s8 + $0x30] sm:$0xff]   ;;  %v760_v38 = vld [vmem:[%s933_s8 + $0x68] sm:$0xff]   ;;  %v689_v50 = vcombine.low %v392_v32, %v392_v32  ;;  %s383_s11 = scalar_lea.vmem %s976_s2, %s983_s18  ;;  %s386_s14 = scalar_lea.vmem %s977_s3, %s983_s18 }
  0x30   : > { %711 = vmatpush3.bf16.msra.mxu0 %v757_v35  ;;  %v761_v39 = vld [vmem:[%s933_s8 + $0x28] sm:$0xff]   ;;  %v762_v40 = vld [vmem:[%s933_s8 + $0x60] sm:$0xff]   ;;  %v764_v42 = vld [vmem:[%s933_s8 + $0x58] sm:$0xff]   ;;  %v589_v10 = vshrl.u32 %v588_v9, 7  ;;  %s688_s15 = sshll.u32 %s983_s18, 2 }
  0x31   : > { %560 = vmatprep.mubr.bf16.mxu0 %v690_v33  ;;  %712 = vmatprep.subr.bf16.mxu0 %v758_v36  ;;  %v763_v41 = vld [vmem:[%s933_s8 + $0x20] sm:$0xff]   ;;  %v765_v43 = vld [vmem:[%s933_s8 + $0x18] sm:$0xff]   ;;  %v766_v44 = vld [vmem:[%s933_s8 + $0x50] sm:$0xff]   ;;  %s390_s21 = scalar_lea.vmem %s978_s4, %s688_s15 }
  0x32   : > { %v767_v45 = vld [vmem:[%s933_s8 + $0x10] sm:$0xff]   ;;  %v768_v46 = vld [vmem:[%s933_s8 + $0x48] sm:$0xff]   ;;  %v770_v48 = vld [vmem:[%s933_s8 + $0x40] sm:$0xff]   ;;  %v590_v12 = vsub.s32 0, %v589_v10 }
  0x33   : > { %v769_v47 = vld [vmem:[%s933_s8 + $0x8] sm:$0xff]   ;;  %v771_v49 = vld [vmem:[%s933_s8] sm:$0xff]  }
  0x34   : > { %713 = vmatpush3.bf16.msra.mxu0 %v759_v37  ;;  %v586_v11 = vld [vmem:[%s383_s11] sm:$0x1] }
  0x35   : > { %714 = vmatprep.subr.bf16.mxu0 %v760_v38  ;;  %v707_v16 = vld [vmem:[%s386_s14] ss:$0 sm:$0xff] }
  0x38   : > { %715 = vmatpush3.bf16.msra.mxu0 %v761_v39 }
  0x39   : > { %716 = vmatprep.subr.bf16.mxu0 %v762_v40 }
  0x3c   : > { %717 = vmatpush3.bf16.msra.mxu0 %v763_v41 }
  0x3d   : > { %718 = vmatprep.subr.bf16.mxu0 %v764_v42 }
  0x40   : > { %719 = vmatpush3.bf16.msra.mxu0 %v765_v43 }
  0x41   : > { %720 = vmatprep.subr.bf16.mxu0 %v766_v44 }
  0x44   : > { %721 = vmatpush3.bf16.msra.mxu0 %v767_v45 }
  0x45   : > { %722 = vmatprep.subr.bf16.mxu0 %v768_v46 }
  0x48   : > { %723 = vmatpush3.bf16.msra.mxu0 %v769_v47 }
  0x49   : > { %724 = vmatprep.subr.bf16.mxu0 %v770_v48 }
  0x4c   : > { %725 = vmatpush3.bf16.msra.mxu0 %v771_v49 }
  0x4f   : > { %561 = vmatmul.mubr.bf16.vlgmr.msra.gmra.mxu0 %v689_v50 }
 0x10f   : > { %v726_v51 = vpop.f32.mrf.mxu0 }
 0x111   : > { %v727_v52 = vpop.f32.mrf.mxu0 }
 0x112   : > { %v728_v53 = vadd.f32 %v727_v52, %v726_v51 }
 0x113   : > { %v729_v54 = vpop.f32.mrf.mxu0 }
 0x114   : > { %v568_v55 = vrot.slane %v728_v53, 4 }
 0x115   : > { %v730_v56 = vpop.f32.mrf.mxu0 }
 0x116   : > { %v569_v57 = vadd.f32 %v728_v53, %v568_v55 }
 0x118   : > { %v570_v58 = vrot.slane %v569_v57, 2 }
 0x11a   : > { %v571_v59 = vadd.f32 %v570_v58, %v569_v57 }
 0x11c   : > { %v572_v60 = vrot.slane %v571_v59, 1 }
 0x11e   : > { %v573_v61 = vadd.f32 %v572_v60, %v571_v59 }
 0x120   : > { %v574_v62 = vmul.f32 0.125, %v573_v61 }
 0x122   : > { %v575_v63 = vsub.f32 %v728_v53, %v574_v62 }
 0x124   : > { %v576_v0 = vmul.f32 %v575_v63, %v575_v63 }
 0x126   : > { %v577_v1 = vrot.slane %v576_v0, 4 }
 0x128   : > { %v578_v2 = vadd.f32 %v577_v1, %v576_v0 }
 0x12a   : > { %v579_v3 = vrot.slane %v578_v2, 2 }
 0x12c   : > { %v580_v4 = vadd.f32 %v579_v3, %v578_v2 }
 0x12e   : > { %v581_v5 = vrot.slane %v580_v4, 1 }
 0x130   : > { %v582_v6 = vadd.f32 %v581_v5, %v580_v4 }
 0x132   : > { %v583_v7 = vmul.f32 0.125, %v582_v6 }
 0x134   : > { %v584_v8 = vadd.f32 1e-05, %v583_v7 }
 0x136   : > { %774 = vrsqrt.f32 %v584_v8 }
 0x143   : > { %v775_v13 = vpop.eup %774 }
 0x144   : > { %v587_v14 = vmul.f32 %v775_v13, %v586_v11 }
 0x146   : > { %v591_v15 = vrot.slane %v587_v14, %v590_v12 }
 0x148   : > { %v592_v17 = vmul.f32 %v591_v15, %v575_v63 }
 0x14a   : > { %v600_v18 = vadd.f32 %v707_v16, %v592_v17 }
 0x14c   : > { %v601_v19 = vpack.c.bf16 %v600_v18, %v600_v18 }
 0x14e   : > { %602 = vst [vmem:[%s390_s21] sm:$0xf] %v601_v19 }
 0x14f PF: > { %p11_p9 = scmp.ge.s32.totalorder %s842_s19, 6   ;;  %s979_s15 = smov %s794_s16 }
 0x150   : > { %s980_s16 = smov %s851_s22  ;;  %s981_s17 = smov %s842_s19 }
 0x151   :  { %13 = sbr.rel (!%p11_p9) target bundleno = 2 (0x2), region = 118 }

// kernel: _lambda_.38
= control target key start
LH: loop header
LB: loop body
LE: loop exit
PB: predicated region body
PF: predicated region fallthrough
CT: control target
= control target key end

     0   :  { %vm1156_vm0 = vmmov 0   ;;  %s1422_s1 = inlined_call_operand.vmem [shape: bf16[1152,128], index: 1, kind: input, shape index: {}]   ;;  %s1423_s0 = inlined_call_operand.vmem [shape: bf16[8,1152], index: 0, kind: input, shape index: {}]   ;;  %s1424_s2 = inlined_call_operand.vmem [shape: f32[1,128], index: 2, kind: input, shape index: {}]   ;;  %s1425_s3 = inlined_call_operand.vmem [shape: f32[1,128], index: 3, kind: input, shape index: {}]   ;;  %s1426_s4 = inlined_call_operand.vmem [shape: bf16[8,128], index: 4, kind: output, shape index: {}]  }
   0x1   :  { %v1072_v0 = vld [vmem:[%s1422_s1 + $0x78] sm:$0xff]   ;;  %v1076_v4 = vld [vmem:[%s1422_s1 + $0x70] sm:$0xff]   ;;  %v1080_v8 = vld [vmem:[%s1422_s1 + $0x68] sm:$0xff]  }
   0x2   :  { %v1073_v1 = vld [vmem:[%s1422_s1 + $0xf8] sm:$0xff]   ;;  %953 = vmatprep.subr.bf16.mxu0 %v1072_v0  ;;  %v1077_v5 = vld [vmem:[%s1422_s1 + $0xf0] sm:$0xff]   ;;  %v1081_v9 = vld [vmem:[%s1422_s1 + $0xe8] sm:$0xff]  }
   0x3   :  { %v1074_v2 = vld [vmem:[%s1422_s1 + $0x38] sm:$0xff]   ;;  %975 = vmatprep.subr.bf16.mxu1 %v1073_v1  ;;  %v1078_v6 = vld [vmem:[%s1422_s1 + $0x30] sm:$0xff]   ;;  %v1082_v10 = vld [vmem:[%s1422_s1 + $0x28] sm:$0xff]  }
   0x4   :  { %v1075_v3 = vld [vmem:[%s1422_s1 + $0xb8] sm:$0xff]   ;;  %954 = vmatpush3.bf16.msra.mxu0 %v1074_v2  ;;  %v1079_v7 = vld [vmem:[%s1422_s1 + $0xb0] sm:$0xff]   ;;  %v1083_v11 = vld [vmem:[%s1422_s1 + $0xa8] sm:$0xff]  }
   0x5   :  { %976 = vmatpush3.bf16.msra.mxu1 %v1075_v3  ;;  %955 = vmatprep.subr.bf16.mxu0 %v1076_v4  ;;  %v1084_v12 = vld [vmem:[%s1422_s1 + $0x60] sm:$0xff]   ;;  %v1088_v16 = vld [vmem:[%s1422_s1 + $0x58] sm:$0xff]   ;;  %v1092_v20 = vld [vmem:[%s1422_s1 + $0x50] sm:$0xff]  }
   0x6   :  { %977 = vmatprep.subr.bf16.mxu1 %v1077_v5  ;;  %v1085_v13 = vld [vmem:[%s1422_s1 + $0xe0] sm:$0xff]   ;;  %v1089_v17 = vld [vmem:[%s1422_s1 + $0xd8] sm:$0xff]   ;;  %v1093_v21 = vld [vmem:[%s1422_s1 + $0xd0] sm:$0xff]  }
   0x7   :  { %v1086_v14 = vld [vmem:[%s1422_s1 + $0x20] sm:$0xff]   ;;  %v1090_v18 = vld [vmem:[%s1422_s1 + $0x18] sm:$0xff]   ;;  %v1094_v22 = vld [vmem:[%s1422_s1 + $0x10] sm:$0xff]  }
   0x8   :  { %956 = vmatpush3.bf16.msra.mxu0 %v1078_v6  ;;  %v1087_v15 = vld [vmem:[%s1422_s1 + $0xa0] sm:$0xff]   ;;  %v1091_v19 = vld [vmem:[%s1422_s1 + $0x98] sm:$0xff]   ;;  %v1095_v23 = vld [vmem:[%s1422_s1 + $0x90] sm:$0xff]  }
   0x9   :  { %978 = vmatpush3.bf16.msra.mxu1 %v1079_v7  ;;  %957 = vmatprep.subr.bf16.mxu0 %v1080_v8  ;;  %v1096_v24 = vld [vmem:[%s1422_s1 + $0x48] sm:$0xff]   ;;  %v1100_v28 = vld [vmem:[%s1422_s1 + $0x40] sm:$0xff]   ;;  %v1108_v38 = vld [vmem:[%s1422_s1 + $0x178] sm:$0xff]  }
   0xa   :  { %979 = vmatprep.subr.bf16.mxu1 %v1081_v9  ;;  %v1097_v25 = vld [vmem:[%s1422_s1 + $0xc8] sm:$0xff]   ;;  %v1101_v29 = vld [vmem:[%s1422_s1 + $0xc0] sm:$0xff]   ;;  %v1109_v39 = vld [vmem:[%s1422_s1 + $0x138] sm:$0xff]  }
   0xb   :  { %v1098_v26 = vld [vmem:[%s1422_s1 + $0x8] sm:$0xff]   ;;  %v1102_v30 = vld [vmem:[%s1422_s1] sm:$0xff]   ;;  %v1110_v40 = vld [vmem:[%s1422_s1 + $0x1f8] sm:$0xff]  }
   0xc   :  { %958 = vmatpush3.bf16.msra.mxu0 %v1082_v10  ;;  %v1099_v27 = vld [vmem:[%s1422_s1 + $0x88] sm:$0xff]   ;;  %v1103_v31 = vld [vmem:[%s1422_s1 + $0x80] sm:$0xff]   ;;  %v1111_v41 = vld [vmem:[%s1422_s1 + $0x1b8] sm:$0xff]  }
   0xd   :  { %980 = vmatpush3.bf16.msra.mxu1 %v1083_v11  ;;  %959 = vmatprep.subr.bf16.mxu0 %v1084_v12  ;;  %v18_v32 = vld [vmem:[%s1423_s0] sm:$0xff]  ;;  %v19_v33 = vld [vmem:[%s1423_s0 + $0x8] sm:$0xff]  ;;  %v1112_v42 = vld [vmem:[%s1422_s1 + $0x170] sm:$0xff]  }
   0xe   :  { %981 = vmatprep.subr.bf16.mxu1 %v1085_v13  ;;  %v871_v34 = vcombine.low %v18_v32, %v18_v32  ;;  %v872_v35 = vcombine.high %v18_v32, %v18_v32  ;;  %v873_v36 = vcombine.low %v19_v33, %v19_v33  ;;  %v874_v37 = vcombine.high %v19_v33, %v19_v33  ;;  %v1113_v43 = vld [vmem:[%s1422_s1 + $0x130] sm:$0xff]   ;;  %v1116_v46 = vld [vmem:[%s1422_s1 + $0x168] sm:$0xff]   ;;  %v1120_v50 = vld [vmem:[%s1422_s1 + $0x160] sm:$0xff]  }
   0xf   :  { %v1114_v44 = vld [vmem:[%s1422_s1 + $0x1f0] sm:$0xff]   ;;  %v1117_v47 = vld [vmem:[%s1422_s1 + $0x128] sm:$0xff]   ;;  %v1121_v51 = vld [vmem:[%s1422_s1 + $0x120] sm:$0xff]   ;;  %v1155_v13 = vmov 0.0  }
  0x10   :  { %960 = vmatpush3.bf16.msra.mxu0 %v1086_v14  ;;  %663 = vmatprep.mubr.bf16.mxu0 %v872_v35  ;;  %v1115_v45 = vld [vmem:[%s1422_s1 + $0x1b0] sm:$0xff]   ;;  %v1118_v48 = vld [vmem:[%s1422_s1 + $0x1e8] sm:$0xff]   ;;  %v1122_v52 = vld [vmem:[%s1422_s1 + $0x1e0] sm:$0xff]  }
  0x11   :  { %982 = vmatpush3.bf16.msra.mxu1 %v1087_v15  ;;  %961 = vmatprep.subr.bf16.mxu0 %v1088_v16  ;;  %v1119_v49 = vld [vmem:[%s1422_s1 + $0x1a8] sm:$0xff]   ;;  %v1123_v53 = vld [vmem:[%s1422_s1 + $0x1a0] sm:$0xff]   ;;  %v1124_v54 = vld [vmem:[%s1422_s1 + $0x158] sm:$0xff]  }
  0x12   :  { %983 = vmatprep.subr.bf16.mxu1 %v1089_v17  ;;  %703 = vmatprep.mubr.bf16.mxu1 %v874_v37  ;;  %v1125_v55 = vld [vmem:[%s1422_s1 + $0x118] sm:$0xff]   ;;  %v1128_v58 = vld [vmem:[%s1422_s1 + $0x150] sm:$0xff]   ;;  %v1132_v62 = vld [vmem:[%s1422_s1 + $0x148] sm:$0xff]  }
  0x13   :  { %v1126_v56 = vld [vmem:[%s1422_s1 + $0x1d8] sm:$0xff]   ;;  %v1129_v59 = vld [vmem:[%s1422_s1 + $0x110] sm:$0xff]   ;;  %v1133_v63 = vld [vmem:[%s1422_s1 + $0x108] sm:$0xff]  }
  0x14   :  { %962 = vmatpush3.bf16.msra.mxu0 %v1090_v18  ;;  %v1127_v57 = vld [vmem:[%s1422_s1 + $0x198] sm:$0xff]   ;;  %v1130_v60 = vld [vmem:[%s1422_s1 + $0x1d0] sm:$0xff]   ;;  %v1134_v0 = vld [vmem:[%s1422_s1 + $0x1c8] sm:$0xff]  }
  0x15   :  { %984 = vmatpush3.bf16.msra.mxu1 %v1091_v19  ;;  %963 = vmatprep.subr.bf16.mxu0 %v1092_v20  ;;  %v1131_v61 = vld [vmem:[%s1422_s1 + $0x190] sm:$0xff]   ;;  %v1135_v1 = vld [vmem:[%s1422_s1 + $0x188] sm:$0xff]   ;;  %v1136_v2 = vld [vmem:[%s1422_s1 + $0x140] sm:$0xff]  }
  0x16   :  { %985 = vmatprep.subr.bf16.mxu1 %v1093_v21  ;;  %v1137_v3 = vld [vmem:[%s1422_s1 + $0x100] sm:$0xff]   ;;  %v20_v5 = vld [vmem:[%s1423_s0 + $0x10] sm:$0xff]  ;;  %v21_v9 = vld [vmem:[%s1423_s0 + $0x18] sm:$0xff] }
  0x17   :  { %v1138_v4 = vld [vmem:[%s1422_s1 + $0x1c0] sm:$0xff]   ;;  %v876_v6 = vcombine.high %v20_v5, %v20_v5  ;;  %v875_v8 = vcombine.low %v20_v5, %v20_v5  ;;  %v877_v10 = vcombine.low %v21_v9, %v21_v9  ;;  %v878_v11 = vcombine.high %v21_v9, %v21_v9  ;;  %v1144_v12 = vld [vmem:[%s1422_s1 + $0x238] sm:$0xff]   ;;  %v1145_v14 = vld [vmem:[%s1422_s1 + $0x230] sm:$0xff]  }
  0x18   :  { %964 = vmatpush3.bf16.msra.mxu0 %v1094_v22  ;;  %v1141_v7 = vld [vmem:[%s1422_s1 + $0x180] sm:$0xff]   ;;  %v1146_v15 = vld [vmem:[%s1422_s1 + $0x228] sm:$0xff]   ;;  %v1148_v17 = vld [vmem:[%s1422_s1 + $0x218] sm:$0xff]  }
  0x19   :  { %986 = vmatpush3.bf16.msra.mxu1 %v1095_v23  ;;  %965 = vmatprep.subr.bf16.mxu0 %v1096_v24  ;;  %v1147_v16 = vld [vmem:[%s1422_s1 + $0x220] sm:$0xff]   ;;  %v1149_v18 = vld [vmem:[%s1422_s1 + $0x210] sm:$0xff]   ;;  %v1150_v19 = vld [vmem:[%s1422_s1 + $0x208] sm:$0xff]  }
  0x1a   :  { %987 = vmatprep.subr.bf16.mxu1 %v1097_v25  ;;  %v1151_v20 = vld [vmem:[%s1422_s1 + $0x200] sm:$0xff]  }
  0x1b   :  { %v1152_v21 = vld [vmem:[%s1423_s0 + $0x20] ss:$0 sps:$4 sm:$0xff]  }
  0x1c   :  { %966 = vmatpush3.bf16.msra.mxu0 %v1098_v26  ;;  %v849_v5 = vld [vmem:[%s1424_s2] sm:$0x1] }
  0x1d   :  { %988 = vmatpush3.bf16.msra.mxu1 %v1099_v27  ;;  %967 = vmatprep.subr.bf16.mxu0 %v1100_v28 }
  0x1e   :  { %989 = vmatprep.subr.bf16.mxu1 %v1101_v29 }
  0x20   :  { %968 = vmatpush3.bf16.msra.mxu0 %v1102_v30 }
  0x21   :  { %990 = vmatpush3.bf16.msra.mxu1 %v1103_v31  ;;  %997 = vmatprep.subr.bf16.mxu0 %v1108_v38 }
  0x22   :  { %1019 = vmatprep.subr.bf16.mxu1 %v1110_v40 }
  0x23   :  { %664 = vmatmul.mubr.bf16.vlgmr.msra.gmra.mxu0 %v871_v34 }
  0x24   :  { %704 = vmatmul.mubr.bf16.vlgmr.msra.gmra.mxu1 %v873_v36  ;;  %998 = vmatpush3.bf16.msra.mxu0 %v1109_v39 }
  0x25   :  { %1020 = vmatpush3.bf16.msra.mxu1 %v1111_v41  ;;  %999 = vmatprep.subr.bf16.mxu0 %v1112_v42 }
  0x26   :  { %1021 = vmatprep.subr.bf16.mxu1 %v1114_v44  ;;  %743 = vmatprep.mubr.bf16.mxu0 %v876_v6 }
  0x27   :  { %783 = vmatprep.mubr.bf16.mxu1 %v878_v11 }
  0x28   :  { %1000 = vmatpush3.bf16.msra.mxu0 %v1113_v43 }
  0x29   :  { %1022 = vmatpush3.bf16.msra.mxu1 %v1115_v45  ;;  %1001 = vmatprep.subr.bf16.mxu0 %v1116_v46 }
  0x2a   :  { %1023 = vmatprep.subr.bf16.mxu1 %v1118_v48 }
  0x2c   :  { %1002 = vmatpush3.bf16.msra.mxu0 %v1117_v47 }
  0x2d   :  { %1024 = vmatpush3.bf16.msra.mxu1 %v1119_v49  ;;  %1003 = vmatprep.subr.bf16.mxu0 %v1120_v50 }
  0x2e   :  { %1025 = vmatprep.subr.bf16.mxu1 %v1122_v52 }
  0x30   :  { %1004 = vmatpush3.bf16.msra.mxu0 %v1121_v51 }
  0x31   :  { %1026 = vmatpush3.bf16.msra.mxu1 %v1123_v53  ;;  %1005 = vmatprep.subr.bf16.mxu0 %v1124_v54 }
  0x32   :  { %1027 = vmatprep.subr.bf16.mxu1 %v1126_v56 }
  0x34   :  { %1006 = vmatpush3.bf16.msra.mxu0 %v1125_v55 }
  0x35   :  { %1028 = vmatpush3.bf16.msra.mxu1 %v1127_v57  ;;  %1007 = vmatprep.subr.bf16.mxu0 %v1128_v58 }
  0x36   :  { %1029 = vmatprep.subr.bf16.mxu1 %v1130_v60 }
  0x38   :  { %1008 = vmatpush3.bf16.msra.mxu0 %v1129_v59 }
  0x39   :  { %1030 = vmatpush3.bf16.msra.mxu1 %v1131_v61  ;;  %1009 = vmatprep.subr.bf16.mxu0 %v1132_v62 }
  0x3a   :  { %1031 = vmatprep.subr.bf16.mxu1 %v1134_v0 }
  0x3c   :  { %1010 = vmatpush3.bf16.msra.mxu0 %v1133_v63 }
  0x3d   :  { %1032 = vmatpush3.bf16.msra.mxu1 %v1135_v1  ;;  %1011 = vmatprep.subr.bf16.mxu0 %v1136_v2 }
  0x3e   :  { %1033 = vmatprep.subr.bf16.mxu1 %v1138_v4 }
  0x40   :  { %1012 = vmatpush3.bf16.msra.mxu0 %v1137_v3  ;;  %v851_v3 = vlaneseq }
  0x41   :  { %1034 = vmatpush3.bf16.msra.mxu1 %v1141_v7  ;;  %1050 = vmatprep.subr.bf16.mxu0 %v1155_v13 }
  0x42   :  { %v852_v4 = vshrl.u32 %v851_v3, 7 }
  0x43   :  { %744 = vmatmul.mubr.bf16.vlgmr.msra.gmra.mxu0 %v875_v8 }
  0x44   :  { %1051 = vmatpush3.bf16.msra.mxu0 %v1144_v12  ;;  %784 = vmatmul.mubr.bf16.vlgmr.msra.gmra.mxu1 %v877_v10  ;;  %v853_v6 = vsub.s32 0, %v852_v4  ;;  %v952_v10 = vld [vmem:[%s1425_s3] ss:$0 sm:$0xff] }
  0x45   :  { %1052 = vmatprep.subr.bf16.mxu0 %v1155_v13  ;;  %1066 = vmatprep.mubr.msk.bf16.mxu0 %vm1156_vm0, %v1155_v13 }
  0x48   :  { %1053 = vmatpush3.bf16.msra.mxu0 %v1145_v14 }
  0x49   :  { %1054 = vmatprep.subr.bf16.mxu0 %v1155_v13 }
  0x4c   :  { %1055 = vmatpush3.bf16.msra.mxu0 %v1146_v15 }
  0x4d   :  { %1056 = vmatprep.subr.bf16.mxu0 %v1155_v13 }
  0x50   :  { %1057 = vmatpush3.bf16.msra.mxu0 %v1147_v16 }
  0x51   :  { %1058 = vmatprep.subr.bf16.mxu0 %v1155_v13 }
  0x54   :  { %1059 = vmatpush3.bf16.msra.mxu0 %v1148_v17 }
  0x55   :  { %1060 = vmatprep.subr.bf16.mxu0 %v1155_v13 }
  0x58   :  { %1061 = vmatpush3.bf16.msra.mxu0 %v1149_v18 }
  0x59   :  { %1062 = vmatprep.subr.bf16.mxu0 %v1155_v13 }
  0x5c   :  { %1063 = vmatpush3.bf16.msra.mxu0 %v1150_v19 }
  0x5d   :  { %1064 = vmatprep.subr.bf16.mxu0 %v1155_v13 }
  0x60   :  { %1065 = vmatpush3.bf16.msra.mxu0 %v1151_v20 }
  0x63   :  { %1067 = vmatmul.mubr.bf16.vlgmr.msra.gmra.mxu0 %v1152_v21 }
  0xe3   :  { %v969_v22 = vpop.f32.mrf.mxu0 }
  0xe4   :  { %v991_v23 = vpop.f32.mrf.mxu1 }
  0xe5   :  { %v970_v24 = vpop.f32.mrf.mxu0 }
  0xe6   :  { %v992_v25 = vpop.f32.mrf.mxu1  ;;  %v971_v38 = vadd.f32 %v970_v24, %v969_v22 }
  0xe7   :  { %v972_v26 = vpop.f32.mrf.mxu0  ;;  %v993_v39 = vadd.f32 %v992_v25, %v991_v23 }
  0xe8   :  { %v994_v27 = vpop.f32.mrf.mxu1 }
  0xe9   :  { %v973_v28 = vpop.f32.mrf.mxu0  ;;  %v706_v41 = vadd.f32 %v993_v39, %v971_v38 }
  0xea   :  { %v995_v29 = vpop.f32.mrf.mxu1 }
 0x103   :  { %v1013_v30 = vpop.f32.mrf.mxu0 }
 0x104   :  { %v1035_v31 = vpop.f32.mrf.mxu1 }
 0x105   :  { %v1014_v32 = vpop.f32.mrf.mxu0 }
 0x106   :  { %v1036_v33 = vpop.f32.mrf.mxu1  ;;  %v1015_v40 = vadd.f32 %v1014_v32, %v1013_v30 }
 0x107   :  { %v1016_v34 = vpop.f32.mrf.mxu0  ;;  %v1037_v43 = vadd.f32 %v1036_v33, %v1035_v31 }
 0x108   :  { %v1038_v35 = vpop.f32.mrf.mxu1  ;;  %v746_v42 = vadd.f32 %v1015_v40, %v706_v41 }
 0x109   :  { %v1017_v36 = vpop.f32.mrf.mxu0 }
 0x10a   :  { %v1039_v37 = vpop.f32.mrf.mxu1  ;;  %v786_v44 = vadd.f32 %v1037_v43, %v746_v42 }
 0x123   :  { %v825_v45 = vpop.f32.mrf.mxu0 }
 0x124   :  { %v826_v46 = vadd.f32 %v825_v45, %v786_v44 }
 0x125   :  { %v1068_v47 = vpop.f32.mrf.mxu0 }
 0x126   :  { %v831_v48 = vrot.slane %v826_v46, 4 }
 0x127   :  { %v828_v49 = vpop.f32.mrf.mxu0 }
 0x128   :  { %v832_v50 = vadd.f32 %v831_v48, %v826_v46 }
 0x129   :  { %v1069_v51 = vpop.f32.mrf.mxu0 }
 0x12a   :  { %v833_v52 = vrot.slane %v832_v50, 2 }
 0x12c   :  { %v834_v53 = vadd.f32 %v833_v52, %v832_v50 }
 0x12e   :  { %v835_v54 = vrot.slane %v834_v53, 1 }
 0x130   :  { %v836_v55 = vadd.f32 %v835_v54, %v834_v53 }
 0x132   :  { %v837_v56 = vmul.f32 0.125, %v836_v55 }
 0x134   :  { %v838_v57 = vsub.f32 %v826_v46, %v837_v56 }
 0x136   :  { %v839_v58 = vmul.f32 %v838_v57, %v838_v57 }
 0x138   :  { %v840_v59 = vrot.slane %v839_v58, 4 }
 0x13a   :  { %v841_v60 = vadd.f32 %v840_v59, %v839_v58 }
 0x13c   :  { %v842_v61 = vrot.slane %v841_v60, 2 }
 0x13e   :  { %v843_v62 = vadd.f32 %v842_v61, %v841_v60 }
 0x140   :  { %v844_v63 = vrot.slane %v843_v62, 1 }
 0x142   :  { %v845_v0 = vadd.f32 %v844_v63, %v843_v62 }
 0x144   :  { %v846_v1 = vmul.f32 0.125, %v845_v0 }
 0x146   :  { %v847_v2 = vadd.f32 1e-05, %v846_v1 }
 0x148   :  { %1153 = vrsqrt.f32 %v847_v2 }
 0x155   :  { %v1154_v7 = vpop.eup %1153 }
 0x156   :  { %v850_v8 = vmul.f32 %v1154_v7, %v849_v5 }
 0x158   :  { %v854_v9 = vrot.slane %v850_v8, %v853_v6 }
 0x15a   :  { %v855_v11 = vmul.f32 %v854_v9, %v838_v57 }
 0x15c   :  { %v863_v12 = vadd.f32 %v952_v10, %v855_v11 }
 0x15e   :  { %v864_v13 = vmax.f32 %v863_v12, 0.0 }
 0x160   :  { %v865_v14 = vpack.c.bf16 %v864_v13, %v864_v13 }
 0x162   :  { %866 = vst [vmem:[%s1426_s4] sm:$0xf] %v865_v14 }

// kernel: _lambda_.41
= control target key start
LH: loop header
LB: loop body
LE: loop exit
PB: predicated region body
PF: predicated region fallthrough
CT: control target
= control target key end

     0   :  { %s665_s1 = inlined_call_operand.vmem [shape: bf16[512,128], index: 1, kind: input, shape index: {}]   ;;  %s666_s0 = inlined_call_operand.vmem [shape: bf16[8,512], index: 0, kind: input, shape index: {}]   ;;  %s667_s2 = inlined_call_operand.vmem [shape: f32[1,128], index: 2, kind: input, shape index: {}]   ;;  %s668_s3 = inlined_call_operand.vmem [shape: f32[1,128], index: 3, kind: input, shape index: {}]   ;;  %s669_s4 = inlined_call_operand.vmem [shape: bf16[8,128], index: 4, kind: output, shape index: {}]  }
   0x1   :  { %v491_v0 = vld [vmem:[%s665_s1 + $0x78] sm:$0xff]   ;;  %v495_v4 = vld [vmem:[%s665_s1 + $0x70] sm:$0xff]   ;;  %v499_v8 = vld [vmem:[%s665_s1 + $0x68] sm:$0xff]  }
   0x2   :  { %v492_v1 = vld [vmem:[%s665_s1 + $0xf8] sm:$0xff]   ;;  %447 = vmatprep.subr.bf16.mxu0 %v491_v0  ;;  %v496_v5 = vld [vmem:[%s665_s1 + $0xf0] sm:$0xff]   ;;  %v500_v9 = vld [vmem:[%s665_s1 + $0xe8] sm:$0xff]  }
   0x3   :  { %v493_v2 = vld [vmem:[%s665_s1 + $0x38] sm:$0xff]   ;;  %469 = vmatprep.subr.bf16.mxu1 %v492_v1  ;;  %v497_v6 = vld [vmem:[%s665_s1 + $0x30] sm:$0xff]   ;;  %v501_v10 = vld [vmem:[%s665_s1 + $0x28] sm:$0xff]  }
   0x4   :  { %v494_v3 = vld [vmem:[%s665_s1 + $0xb8] sm:$0xff]   ;;  %448 = vmatpush3.bf16.msra.mxu0 %v493_v2  ;;  %v498_v7 = vld [vmem:[%s665_s1 + $0xb0] sm:$0xff]   ;;  %v502_v11 = vld [vmem:[%s665_s1 + $0xa8] sm:$0xff]   ;;  %v390_v2 = vlaneseq }
   0x5   :  { %470 = vmatpush3.bf16.msra.mxu1 %v494_v3  ;;  %449 = vmatprep.subr.bf16.mxu0 %v495_v4  ;;  %v503_v12 = vld [vmem:[%s665_s1 + $0x60] sm:$0xff]   ;;  %v507_v16 = vld [vmem:[%s665_s1 + $0x58] sm:$0xff]   ;;  %v511_v20 = vld [vmem:[%s665_s1 + $0x50] sm:$0xff]  }
   0x6   :  { %471 = vmatprep.subr.bf16.mxu1 %v496_v5  ;;  %v504_v13 = vld [vmem:[%s665_s1 + $0xe0] sm:$0xff]   ;;  %v508_v17 = vld [vmem:[%s665_s1 + $0xd8] sm:$0xff]   ;;  %v512_v21 = vld [vmem:[%s665_s1 + $0xd0] sm:$0xff]   ;;  %v391_v3 = vshrl.u32 %v390_v2, 7 }
   0x7   :  { %v505_v14 = vld [vmem:[%s665_s1 + $0x20] sm:$0xff]   ;;  %v509_v18 = vld [vmem:[%s665_s1 + $0x18] sm:$0xff]   ;;  %v513_v22 = vld [vmem:[%s665_s1 + $0x10] sm:$0xff]  }
   0x8   :  { %450 = vmatpush3.bf16.msra.mxu0 %v497_v6  ;;  %v506_v15 = vld [vmem:[%s665_s1 + $0xa0] sm:$0xff]   ;;  %v510_v19 = vld [vmem:[%s665_s1 + $0x98] sm:$0xff]   ;;  %v514_v23 = vld [vmem:[%s665_s1 + $0x90] sm:$0xff]   ;;  %v392_v5 = vsub.s32 0, %v391_v3 }
   0x9   :  { %472 = vmatpush3.bf16.msra.mxu1 %v498_v7  ;;  %451 = vmatprep.subr.bf16.mxu0 %v499_v8  ;;  %v515_v24 = vld [vmem:[%s665_s1 + $0x48] sm:$0xff]   ;;  %v519_v28 = vld [vmem:[%s665_s1 + $0x40] sm:$0xff]  }
   0xa   :  { %473 = vmatprep.subr.bf16.mxu1 %v500_v9  ;;  %v516_v25 = vld [vmem:[%s665_s1 + $0xc8] sm:$0xff]   ;;  %v520_v29 = vld [vmem:[%s665_s1 + $0xc0] sm:$0xff]  }
   0xb   :  { %v517_v26 = vld [vmem:[%s665_s1 + $0x8] sm:$0xff]   ;;  %v521_v30 = vld [vmem:[%s665_s1] sm:$0xff]  }
   0xc   :  { %452 = vmatpush3.bf16.msra.mxu0 %v501_v10  ;;  %v518_v27 = vld [vmem:[%s665_s1 + $0x88] sm:$0xff]   ;;  %v522_v31 = vld [vmem:[%s665_s1 + $0x80] sm:$0xff]  }
   0xd   :  { %474 = vmatpush3.bf16.msra.mxu1 %v502_v11  ;;  %453 = vmatprep.subr.bf16.mxu0 %v503_v12  ;;  %v18_v32 = vld [vmem:[%s666_s0] sm:$0xff]  ;;  %v19_v33 = vld [vmem:[%s666_s0 + $0x8] sm:$0xff] }
   0xe   :  { %475 = vmatprep.subr.bf16.mxu1 %v504_v13  ;;  %v410_v34 = vcombine.low %v18_v32, %v18_v32  ;;  %v411_v35 = vcombine.high %v18_v32, %v18_v32  ;;  %v412_v36 = vcombine.low %v19_v33, %v19_v33  ;;  %v413_v37 = vcombine.high %v19_v33, %v19_v33  ;;  %v388_v4 = vld [vmem:[%s667_s2] sm:$0x1] }
   0xf   :  { %v446_v9 = vld [vmem:[%s668_s3] ss:$0 sm:$0xff] }
  0x10   :  { %454 = vmatpush3.bf16.msra.mxu0 %v505_v14  ;;  %322 = vmatprep.mubr.bf16.mxu0 %v411_v35 }
  0x11   :  { %476 = vmatpush3.bf16.msra.mxu1 %v506_v15  ;;  %455 = vmatprep.subr.bf16.mxu0 %v507_v16 }
  0x12   :  { %477 = vmatprep.subr.bf16.mxu1 %v508_v17  ;;  %362 = vmatprep.mubr.bf16.mxu1 %v413_v37 }
  0x14   :  { %456 = vmatpush3.bf16.msra.mxu0 %v509_v18 }
  0x15   :  { %478 = vmatpush3.bf16.msra.mxu1 %v510_v19  ;;  %457 = vmatprep.subr.bf16.mxu0 %v511_v20 }
  0x16   :  { %479 = vmatprep.subr.bf16.mxu1 %v512_v21 }
  0x18   :  { %458 = vmatpush3.bf16.msra.mxu0 %v513_v22 }
  0x19   :  { %480 = vmatpush3.bf16.msra.mxu1 %v514_v23  ;;  %459 = vmatprep.subr.bf16.mxu0 %v515_v24 }
  0x1a   :  { %481 = vmatprep.subr.bf16.mxu1 %v516_v25 }
  0x1c   :  { %460 = vmatpush3.bf16.msra.mxu0 %v517_v26 }
  0x1d   :  { %482 = vmatpush3.bf16.msra.mxu1 %v518_v27  ;;  %461 = vmatprep.subr.bf16.mxu0 %v519_v28 }
  0x1e   :  { %483 = vmatprep.subr.bf16.mxu1 %v520_v29 }
  0x20   :  { %462 = vmatpush3.bf16.msra.mxu0 %v521_v30 }
  0x21   :  { %484 = vmatpush3.bf16.msra.mxu1 %v522_v31 }
  0x23   :  { %323 = vmatmul.mubr.bf16.vlgmr.msra.gmra.mxu0 %v410_v34 }
  0x24   :  { %363 = vmatmul.mubr.bf16.vlgmr.msra.gmra.mxu1 %v412_v36 }
  0xe3   :  { %v463_v38 = vpop.f32.mrf.mxu0 }
  0xe4   :  { %v485_v39 = vpop.f32.mrf.mxu1 }
  0xe5   :  { %v464_v40 = vpop.f32.mrf.mxu0 }
  0xe6   :  { %v486_v41 = vpop.f32.mrf.mxu1  ;;  %v465_v42 = vadd.f32 %v464_v40, %v463_v38 }
  0xe7   :  { %v487_v43 = vadd.f32 %v486_v41, %v485_v39  ;;  %v466_v44 = vpop.f32.mrf.mxu0 }
  0xe8   :  { %v488_v45 = vpop.f32.mrf.mxu1 }
  0xe9   :  { %v365_v46 = vadd.f32 %v487_v43, %v465_v42  ;;  %v467_v47 = vpop.f32.mrf.mxu0 }
  0xea   :  { %v489_v48 = vpop.f32.mrf.mxu1 }
  0xeb   :  { %v370_v49 = vrot.slane %v365_v46, 4 }
  0xed   :  { %v371_v50 = vadd.f32 %v370_v49, %v365_v46 }
  0xef   :  { %v372_v51 = vrot.slane %v371_v50, 2 }
  0xf1   :  { %v373_v52 = vadd.f32 %v372_v51, %v371_v50 }
  0xf3   :  { %v374_v53 = vrot.slane %v373_v52, 1 }
  0xf5   :  { %v375_v54 = vadd.f32 %v374_v53, %v373_v52 }
  0xf7   :  { %v376_v55 = vmul.f32 0.125, %v375_v54 }
  0xf9   :  { %v377_v56 = vsub.f32 %v365_v46, %v376_v55 }
  0xfb   :  { %v378_v57 = vmul.f32 %v377_v56, %v377_v56 }
  0xfd   :  { %v379_v58 = vrot.slane %v378_v57, 4 }
  0xff   :  { %v380_v59 = vadd.f32 %v379_v58, %v378_v57 }
 0x101   :  { %v381_v60 = vrot.slane %v380_v59, 2 }
 0x103   :  { %v382_v61 = vadd.f32 %v381_v60, %v380_v59 }
 0x105   :  { %v383_v62 = vrot.slane %v382_v61, 1 }
 0x107   :  { %v384_v63 = vadd.f32 %v383_v62, %v382_v61 }
 0x109   :  { %v385_v0 = vmul.f32 0.125, %v384_v63 }
 0x10b   :  { %v386_v1 = vadd.f32 1e-05, %v385_v0 }
 0x10d   :  { %527 = vrsqrt.f32 %v386_v1 }
 0x11a   :  { %v528_v6 = vpop.eup %527 }
 0x11b   :  { %v389_v7 = vmul.f32 %v528_v6, %v388_v4 }
 0x11d   :  { %v393_v8 = vrot.slane %v389_v7, %v392_v5 }
 0x11f   :  { %v394_v10 = vmul.f32 %v393_v8, %v377_v56 }
 0x121   :  { %v402_v11 = vadd.f32 %v446_v9, %v394_v10 }
 0x123   :  { %v403_v12 = vmax.f32 %v402_v11, 0.0 }
 0x125   :  { %v404_v13 = vpack.c.bf16 %v403_v12, %v403_v12 }
 0x127   :  { %405 = vst [vmem:[%s669_s4] sm:$0xf] %v404_v13 }

</bundles_post_ra>
